<compile_context>
chip_gen: v6e
topology: v6e:2x2x1
jax: 0.10.0
libtpu: 0.0.40
codegen_flags: <defaults>
</compile_context>

<pallas_src>
import functools

import jax
import jax.numpy as jnp
from jax.experimental import pallas as pl
from jax.experimental.pallas import tpu as pltpu

MAX_TILE_M = 1024                      # 512-1024 rows ~ HBM-roofline sweet spot
VMEM_LIMIT = 32 * 1024 * 1024          # safe on v5e/v6e (128 MiB) and v7x (64 MiB)


def _round_up(x, m):
    return (x + m - 1) // m * m


def _compiler_params():
    return pltpu.CompilerParams(dimension_semantics=("parallel",),
                                vmem_limit_bytes=VMEM_LIMIT)


# ---------------------------------------------------------------------------
# Kernel 1: folded-tap conv matmul + one-pass BN partial statistics.
# ---------------------------------------------------------------------------
def _matmul_stats_kernel(x_ref, w_ref, y_ref, stats_ref):
    # x_ref: (TILE_M, K) bf16, w_ref: (K, C) bf16 -> f32 accumulate on the MXU.
    acc = jnp.dot(x_ref[...], w_ref[...], preferred_element_type=jnp.float32)
    y_ref[...] = acc
    s1 = jnp.sum(acc, axis=0, keepdims=True)            # (1, C)
    s2 = jnp.sum(acc * acc, axis=0, keepdims=True)       # (1, C)
    stats_ref[0] = jnp.concatenate([s1, s2], axis=0)      # (2, C)


def _matmul_with_stats(xcol, wmat):
    m, k = xcol.shape
    _, c = wmat.shape
    tile_m = min(MAX_TILE_M, _round_up(m, 8))
    m_pad = _round_up(m, tile_m)
    if m_pad != m:  # zero rows: contribute nothing to the BN sums, sliced off below
        xcol = jnp.pad(xcol, ((0, m_pad - m), (0, 0)))
    grid = (m_pad // tile_m,)
    y, stats = pl.pallas_call(
        _matmul_stats_kernel,
        grid=grid,
        in_specs=[pl.BlockSpec((tile_m, k), lambda i: (i, 0)),
                  pl.BlockSpec((k, c), lambda i: (0, 0))],
        out_specs=[pl.BlockSpec((tile_m, c), lambda i: (i, 0)),
                   pl.BlockSpec((1, 2, c), lambda i: (i, 0, 0))],
        out_shape=[jax.ShapeDtypeStruct((m_pad, c), jnp.float32),
                   jax.ShapeDtypeStruct((grid[0], 2, c), jnp.float32)],
        compiler_params=_compiler_params(),
        cost_estimate=pl.CostEstimate(
            flops=2 * m_pad * k * c, transcendentals=0,
            bytes_accessed=m_pad * k * 2 + k * c * 2 + m_pad * c * 4),
    )(xcol, wmat)
    return y[:m], stats


# ---------------------------------------------------------------------------
# Kernel 2: lane-dense BatchNorm affine + LeakyReLU on an (N*OH, OW*C) view.
# ---------------------------------------------------------------------------
def _bn_act_kernel(y_ref, scale_ref, shift_ref, o_ref, *, slope):
    z = y_ref[...] * scale_ref[...] + shift_ref[...]
    o_ref[...] = jnp.where(z >= 0, z, slope * z)


def _bn_act(y2d, scale_row, shift_row, slope):
    m, l = y2d.shape
    tile_m = min(MAX_TILE_M, _round_up(m, 8))
    m_pad = _round_up(m, tile_m)
    if m_pad != m:
        y2d = jnp.pad(y2d, ((0, m_pad - m), (0, 0)))
    grid = (m_pad // tile_m,)
    out = pl.pallas_call(
        functools.partial(_bn_act_kernel, slope=slope),
        grid=grid,
        in_specs=[pl.BlockSpec((tile_m, l), lambda i: (i, 0)),
                  pl.BlockSpec((1, l), lambda i: (0, 0)),
                  pl.BlockSpec((1, l), lambda i: (0, 0))],
        out_specs=pl.BlockSpec((tile_m, l), lambda i: (i, 0)),
        out_shape=jax.ShapeDtypeStruct((m_pad, l), jnp.float32),
        compiler_params=_compiler_params(),
    )(y2d, scale_row, shift_row)
    return out[:m]


# ---------------------------------------------------------------------------
# Kernel 3: 1x1 Conv2d (matmul + bias) for the final layer.
# ---------------------------------------------------------------------------
def _matmul_bias_kernel(x_ref, w_ref, b_ref, o_ref):
    o_ref[...] = (jnp.dot(x_ref[...], w_ref[...],
                          preferred_element_type=jnp.float32) + b_ref[...])


def _conv1x1_bias(x2d, wmat, bias, compute_dtype=jnp.bfloat16):
    m, k = x2d.shape
    _, c = wmat.shape
    tile_m = min(MAX_TILE_M, _round_up(m, 8))
    m_pad = _round_up(m, tile_m)
    x2d = x2d.astype(compute_dtype)
    if m_pad != m:
        x2d = jnp.pad(x2d, ((0, m_pad - m), (0, 0)))
    grid = (m_pad // tile_m,)
    out = pl.pallas_call(
        _matmul_bias_kernel,
        grid=grid,
        in_specs=[pl.BlockSpec((tile_m, k), lambda i: (i, 0)),
                  pl.BlockSpec((k, c), lambda i: (0, 0)),
                  pl.BlockSpec((1, c), lambda i: (0, 0))],
        out_specs=pl.BlockSpec((tile_m, c), lambda i: (i, 0)),
        out_shape=jax.ShapeDtypeStruct((m_pad, c), jnp.float32),
        compiler_params=_compiler_params(),
        cost_estimate=pl.CostEstimate(
            flops=2 * m_pad * k * c, transcendentals=0,
            bytes_accessed=m_pad * k * 2 + k * c * 2 + m_pad * c * 4),
    )(x2d, wmat.astype(compute_dtype), bias.reshape(1, c).astype(jnp.float32))
    return out[:m]


# ---------------------------------------------------------------------------
# GBlock: ConvTranspose2d(bias=False) -> BatchNorm2d(train) -> LeakyReLU(0.2)
# ---------------------------------------------------------------------------
def gblock_forward(x_nhwc, weight, gamma, beta, *, stride, padding,
                   eps=1e-5, slope=0.2, compute_dtype=jnp.bfloat16):
    """x_nhwc: (N,H,W,Cin) f32;  weight: (Cin,Cout,KH,KW) (PyTorch ConvTranspose2d)."""
    n, h, w, cin = x_nhwc.shape
    cin_w, cout, kh, kw = weight.shape
    assert cin == cin_w
    s, p = stride, padding
    oh = (h - 1) * s + kh - 2 * p
    ow = (w - 1) * s + kw - 2 * p

    pad = max(kh, kw)                      # generous halo so every tap is a static slice
    xp = jnp.pad(x_nhwc, ((0, 0), (pad, pad), (pad, pad), (0, 0))).astype(compute_dtype)

    conv = jnp.zeros((n, oh, ow, cout), jnp.float32)
    stat_parts = []

    # Sub-pixel decomposition: output pixel y belongs to phase (y + p) % s; only
    # taps i with i == (y + p) (mod s) contribute, at input row h = (y + p - i)/s.
    for ry in range(s):
        y0 = (ry - p) % s
        a_len = len(range(y0, oh, s))
        taps_i = [i for i in range(kh) if (y0 + p - i) % s == 0]
        if a_len == 0 or not taps_i:
            continue
        for rx in range(s):
            x0 = (rx - p) % s
            b_len = len(range(x0, ow, s))
            taps_j = [j for j in range(kw) if (x0 + p - j) % s == 0]
            if b_len == 0 or not taps_j:
                continue
            cols, wrows = [], []
            for i in taps_i:
                di = (y0 + p - i) // s
                for j in taps_j:
                    dj = (x0 + p - j) // s
                    patch = xp[:, pad + di: pad + di + a_len,
                               pad + dj: pad + dj + b_len, :]
                    cols.append(patch.reshape(n * a_len * b_len, cin))
                    wrows.append(weight[:, :, i, j])        # (Cin, Cout)
            xcol = jnp.concatenate(cols, axis=1) if len(cols) > 1 else cols[0]
            wmat = jnp.concatenate(wrows, axis=0) if len(wrows) > 1 else wrows[0]
            y_phase, stats = _matmul_with_stats(xcol, wmat.astype(compute_dtype))
            conv = conv.at[:, y0::s, x0::s, :].set(
                y_phase.reshape(n, a_len, b_len, cout))
            stat_parts.append(stats)

    # BatchNorm2d training-mode batch statistics (biased variance), one-pass sums.
    sums = jnp.sum(jnp.concatenate(stat_parts, axis=0), axis=0)     # (2, Cout)
    m_tot = float(n * oh * ow)
    mean = sums[0] / m_tot
    var = jnp.maximum(sums[1] / m_tot - mean * mean, 0.0)
    inv = jax.lax.rsqrt(var + eps)
    scale = gamma * inv
    shift = beta - mean * scale

    # Lane-dense normalize + LeakyReLU pass on an (N*OH, OW*Cout) view.
    y2d = conv.reshape(n * oh, ow * cout)
    scale_row = jnp.tile(scale, ow).reshape(1, ow * cout)
    shift_row = jnp.tile(shift, ow).reshape(1, ow * cout)
    act = _bn_act(y2d, scale_row, shift_row, slope)
    return act.reshape(n, oh, ow, cout)


# ---------------------------------------------------------------------------
# Full Generator forward.
# ---------------------------------------------------------------------------
def generator_forward(z, block_params, last_w, last_b, *,
                      compute_dtype=jnp.bfloat16):
    """z: (N, nz).  Returns NCHW (N, nc, 32, 32), matching Generator.forward."""
    n, nz = z.shape
    x = z.reshape(n, 1, 1, nz).astype(jnp.float32)      # z.view(-1, nz, 1, 1) as NHWC
    strides = [(1, 0), (2, 1), (2, 1), (2, 1)]
    for (w_t, gamma, beta), (s, p) in zip(block_params, strides):
        x = gblock_forward(x, w_t, gamma, beta, stride=s, padding=p,
                           compute_dtype=compute_dtype)
    n_, oh, ow, c = x.shape
    nc = last_w.shape[0]
    wmat = last_w[:, :, 0, 0].T                           # (32, nc)
    out = _conv1x1_bias(x.reshape(n_ * oh * ow, c), wmat, last_b,
                        compute_dtype=compute_dtype)
    out = out.reshape(n_, oh, ow, nc)
    return jnp.transpose(out, (0, 3, 1, 2))               # NHWC -> NCHW


# ---------------------------------------------------------------------------
# Pure-XLA reference (independent path: lhs-dilated conv), matched bf16 matmuls.
# ---------------------------------------------------------------------------
def _reference_forward(z, block_params, last_w, last_b, *, eps=1e-5, slope=0.2,
                       compute_dtype=jnp.bfloat16):
    n, nz = z.shape
    x = z.reshape(n, 1, 1, nz).astype(jnp.float32)
    strides = [(1, 0), (2, 1), (2, 1), (2, 1)]
    for (w_t, gamma, beta), (s, p) in zip(block_params, strides):
        cin, cout, kh, kw = w_t.shape
        w_hwio = jnp.transpose(w_t[:, :, ::-1, ::-1], (2, 3, 0, 1))
        conv = jax.lax.conv_general_dilated(
            x.astype(compute_dtype), w_hwio.astype(compute_dtype),
            window_strides=(1, 1),
            padding=[(kh - 1 - p, kh - 1 - p), (kw - 1 - p, kw - 1 - p)],
            lhs_dilation=(s, s),
            dimension_numbers=('NHWC', 'HWIO', 'NHWC'),
            preferred_element_type=jnp.float32)
        mean = jnp.mean(conv, axis=(0, 1, 2), keepdims=True)
        var = jnp.mean((conv - mean) ** 2, axis=(0, 1, 2), keepdims=True)
        yn = (conv - mean) * jax.lax.rsqrt(var + eps) * gamma + beta
        x = jnp.where(yn >= 0, yn, slope * yn)
    wmat = last_w[:, :, 0, 0].T
    out = jnp.einsum('nhwc,cd->nhwd', x.astype(compute_dtype),
                     wmat.astype(compute_dtype),
                     preferred_element_type=jnp.float32) + last_b
    return jnp.transpose(out, (0, 3, 1, 2))


if __name__ == "__main__":
    N, NZ, NC = 2, 32, 3
    key = jax.random.PRNGKey(0)
    keys = jax.random.split(key, 8)

    z = jax.random.normal(keys[0], (N, NZ), jnp.float32)

    # GBlock ConvTranspose2d weights (Cin, Cout, 4, 4), xavier_uniform_-style init.
    chans = [(NZ, 256), (256, 128), (128, 64), (64, 32)]
    block_params = []
    for idx, (cin, cout) in enumerate(chans):
        fan_in, fan_out = cout * 16, cin * 16
        bound = (6.0 / (fan_in + fan_out)) ** 0.5
        w_t = jax.random.uniform(keys[1 + idx], (cin, cout, 4, 4), jnp.float32,
                                 -bound, bound)
        gamma = jnp.ones((cout,), jnp.float32)     # BatchNorm2d weight init
        beta = jnp.zeros((cout,), jnp.float32)     # BatchNorm2d bias init
        block_params.append((w_t, gamma, beta))

    # last: Conv2d(32, nc, 1) with bias (default torch-style uniform init scale).
    b_last = 1.0 / (32.0 ** 0.5)
    last_w = jax.random.uniform(keys[5], (NC, 32, 1, 1), jnp.float32, -b_last, b_last)
    last_b = jax.random.uniform(keys[6], (NC,), jnp.float32, -b_last, b_last)

    fwd = jax.jit(generator_forward)
    out = jax.block_until_ready(fwd(z, block_params, last_w, last_b))

    ref = jax.block_until_ready(
        jax.jit(_reference_forward)(z, block_params, last_w, last_b))

    assert out.shape == (N, NC, 32, 32), out.shape
    err = float(jnp.max(jnp.abs(out - ref)))
    assert jnp.allclose(out, ref, atol=2e-2, rtol=2e-2), f"max abs err = {err}"

    print("KERNEL_OK")
</pallas_src>

<mosaic_0001>
module attributes {stable_mosaic.version = 11 : i64} {
  func.func @_matmul_stats_kernel(%arg0: i32, %arg1: memref<32x512xbf16, #tpu.memory_space<vmem>>, %arg2: memref<512x256xbf16, #tpu.memory_space<vmem>>, %arg3: memref<32x256xf32, #tpu.memory_space<vmem>>, %arg4: memref<1x2x256xf32, #tpu.memory_space<vmem>>) attributes {dimension_semantics = [#tpu.dimension_semantics<parallel>], iteration_bounds = array<i64: 1>, scalar_prefetch = 0 : i64, scratch_operands = 0 : i64, tpu.core_type = #tpu.core_type<tc>, window_params = [{transform_indices = @transform_0, window_bounds = array<i64: 32, 512>}, {pipeline_mode = #tpu.pipeline_mode<synchronous>, transform_indices = @transform_1, window_bounds = array<i64: 512, 256>}, {transform_indices = @transform_2, window_bounds = array<i64: 32, 256>}, {transform_indices = @transform_3, window_bounds = array<i64: 1, 2, 256>}]} {
    %c0 = arith.constant 0 : index
    %c0_0 = arith.constant 0 : index
    %0 = vector.load %arg1[%c0, %c0_0] : memref<32x512xbf16, #tpu.memory_space<vmem>>, vector<32x512xbf16>
    %c0_1 = arith.constant 0 : index
    %c0_2 = arith.constant 0 : index
    %1 = vector.load %arg2[%c0_1, %c0_2] : memref<512x256xbf16, #tpu.memory_space<vmem>>, vector<512x256xbf16>
    %cst = arith.constant dense<0.000000e+00> : vector<32x256xf32>
    %2 = tpu.matmul %0, %1, %cst {dimension_numbers = #tpu.dot_dimension_numbers<[1], [0], [0], [1], [0, 0, 1, 1], [], []>} : vector<32x512xbf16>, vector<512x256xbf16>, vector<32x256xf32> -> vector<32x256xf32>
    %c0_3 = arith.constant 0 : index
    %c0_4 = arith.constant 0 : index
    %3 = vector.load %arg3[%c0_3, %c0_4] : memref<32x256xf32, #tpu.memory_space<vmem>>, vector<32x256xf32>
    tpu.vector_store %arg3[%c0_3, %c0_4], %2 {strides = array<i32>} : memref<32x256xf32, #tpu.memory_space<vmem>>, vector<32x256xf32>,
    %cst_5 = arith.constant dense<0.000000e+00> : vector<256xf32>
    %4 = vector.multi_reduction <add>, %2, %cst_5 [0] : vector<32x256xf32> to vector<256xf32>
    %5 = vector.shape_cast %4 : vector<256xf32> to vector<1x256xf32>
    %6 = arith.mulf %2, %2 : vector<32x256xf32>
    %cst_6 = arith.constant dense<0.000000e+00> : vector<256xf32>
    %7 = vector.multi_reduction <add>, %6, %cst_6 [0] : vector<32x256xf32> to vector<256xf32>
    %8 = vector.shape_cast %7 : vector<256xf32> to vector<1x256xf32>
    %9 = tpu.concatenate %5, %8 in 0 : vector<1x256xf32>, vector<1x256xf32> -> vector<2x256xf32>
    %c0_7 = arith.constant 0 : index
    %c0_8 = arith.constant 0 : index
    %c0_9 = arith.constant 0 : index
    %10 = vector.load %arg4[%c0_7, %c0_8, %c0_9] : memref<1x2x256xf32, #tpu.memory_space<vmem>>, vector<1x2x256xf32>
    %11 = vector.shape_cast %10 : vector<1x2x256xf32> to vector<2x256xf32>
    %12 = vector.shape_cast %9 : vector<2x256xf32> to vector<1x2x256xf32>
    tpu.vector_store %arg4[%c0_7, %c0_8, %c0_9], %12 {strides = array<i32>} : memref<1x2x256xf32, #tpu.memory_space<vmem>>, vector<1x2x256xf32>,
    return
  }
  func.func @transform_0(%arg0: i32) -> (i32, i32) {
    %c0_i32 = arith.constant 0 : i32
    %c0_i32_0 = arith.constant 0 : i32
    return %arg0, %c0_i32 : i32, i32
  }
  func.func @transform_1(%arg0: i32) -> (i32, i32) {
    %c0_i32 = arith.constant 0 : i32
    %c0_i32_0 = arith.constant 0 : i32
    %c0_i32_1 = arith.constant 0 : i32
    return %c0_i32, %c0_i32_0 : i32, i32
  }
  func.func @transform_2(%arg0: i32) -> (i32, i32) {
    %c0_i32 = arith.constant 0 : i32
    %c0_i32_0 = arith.constant 0 : i32
    return %arg0, %c0_i32 : i32, i32
  }
  func.func @transform_3(%arg0: i32) -> (i32, i32, i32) {
    %c0_i32 = arith.constant 0 : i32
    %c0_i32_0 = arith.constant 0 : i32
    %c0_i32_1 = arith.constant 0 : i32
    return %arg0, %c0_i32, %c0_i32_0 : i32, i32, i32
  }
}

module attributes {stable_mosaic.version = 11 : i64} {
  func.func @_bn_act_kernel(%arg0: i32, %arg1: memref<8x1024xf32, #tpu.memory_space<vmem>>, %arg2: memref<1x1024xf32, #tpu.memory_space<vmem>>, %arg3: memref<1x1024xf32, #tpu.memory_space<vmem>>, %arg4: memref<8x1024xf32, #tpu.memory_space<vmem>>) attributes {dimension_semantics = [#tpu.dimension_semantics<parallel>], iteration_bounds = array<i64: 1>, scalar_prefetch = 0 : i64, scratch_operands = 0 : i64, tpu.core_type = #tpu.core_type<tc>, window_params = [{transform_indices = @transform_0, window_bounds = array<i64: 8, 1024>}, {pipeline_mode = #tpu.pipeline_mode<synchronous>, transform_indices = @transform_1, window_bounds = array<i64: 1, 1024>}, {pipeline_mode = #tpu.pipeline_mode<synchronous>, transform_indices = @transform_2, window_bounds = array<i64: 1, 1024>}, {transform_indices = @transform_3, window_bounds = array<i64: 8, 1024>}]} {
    %c0 = arith.constant 0 : index
    %c0_0 = arith.constant 0 : index
    %0 = vector.load %arg1[%c0, %c0_0] : memref<8x1024xf32, #tpu.memory_space<vmem>>, vector<8x1024xf32>
    %c0_1 = arith.constant 0 : index
    %c0_2 = arith.constant 0 : index
    %1 = vector.load %arg2[%c0_1, %c0_2] : memref<1x1024xf32, #tpu.memory_space<vmem>>, vector<1x1024xf32>
    %2 = vector.broadcast %1 : vector<1x1024xf32> to vector<8x1024xf32>
    %3 = arith.mulf %0, %2 : vector<8x1024xf32>
    %c0_3 = arith.constant 0 : index
    %c0_4 = arith.constant 0 : index
    %4 = vector.load %arg3[%c0_3, %c0_4] : memref<1x1024xf32, #tpu.memory_space<vmem>>, vector<1x1024xf32>
    %5 = vector.broadcast %4 : vector<1x1024xf32> to vector<8x1024xf32>
    %6 = arith.addf %3, %5 : vector<8x1024xf32>
    %cst = arith.constant 0.000000e+00 : f32
    %7 = vector.broadcast %cst : f32 to vector<8x1024xf32>
    %8 = arith.cmpf oge, %6, %7 : vector<8x1024xf32>
    %cst_5 = arith.constant 2.000000e-01 : f32
    %9 = vector.broadcast %cst_5 : f32 to vector<8x1024xf32>
    %10 = arith.mulf %9, %6 : vector<8x1024xf32>
    %11 = arith.select %8, %6, %10 : vector<8x1024xi1>, vector<8x1024xf32>
    %c0_6 = arith.constant 0 : index
    %c0_7 = arith.constant 0 : index
    %12 = vector.load %arg4[%c0_6, %c0_7] : memref<8x1024xf32, #tpu.memory_space<vmem>>, vector<8x1024xf32>
    tpu.vector_store %arg4[%c0_6, %c0_7], %11 {strides = array<i32>} : memref<8x1024xf32, #tpu.memory_space<vmem>>, vector<8x1024xf32>,
    return
  }
  func.func @transform_0(%arg0: i32) -> (i32, i32) {
    %c0_i32 = arith.constant 0 : i32
    %c0_i32_0 = arith.constant 0 : i32
    return %arg0, %c0_i32 : i32, i32
  }
  func.func @transform_1(%arg0: i32) -> (i32, i32) {
    %c0_i32 = arith.constant 0 : i32
    %c0_i32_0 = arith.constant 0 : i32
    %c0_i32_1 = arith.constant 0 : i32
    return %c0_i32, %c0_i32_0 : i32, i32
  }
  func.func @transform_2(%arg0: i32) -> (i32, i32) {
    %c0_i32 = arith.constant 0 : i32
    %c0_i32_0 = arith.constant 0 : i32
    %c0_i32_1 = arith.constant 0 : i32
    return %c0_i32, %c0_i32_0 : i32, i32
  }
  func.func @transform_3(%arg0: i32) -> (i32, i32) {
    %c0_i32 = arith.constant 0 : i32
    %c0_i32_0 = arith.constant 0 : i32
    return %arg0, %c0_i32 : i32, i32
  }
}

module attributes {stable_mosaic.version = 11 : i64} {
  func.func @_matmul_stats_kernel(%arg0: i32, %arg1: memref<32x1024xbf16, #tpu.memory_space<vmem>>, %arg2: memref<1024x128xbf16, #tpu.memory_space<vmem>>, %arg3: memref<32x128xf32, #tpu.memory_space<vmem>>, %arg4: memref<1x2x128xf32, #tpu.memory_space<vmem>>) attributes {dimension_semantics = [#tpu.dimension_semantics<parallel>], iteration_bounds = array<i64: 1>, scalar_prefetch = 0 : i64, scratch_operands = 0 : i64, tpu.core_type = #tpu.core_type<tc>, window_params = [{transform_indices = @transform_0, window_bounds = array<i64: 32, 1024>}, {pipeline_mode = #tpu.pipeline_mode<synchronous>, transform_indices = @transform_1, window_bounds = array<i64: 1024, 128>}, {transform_indices = @transform_2, window_bounds = array<i64: 32, 128>}, {transform_indices = @transform_3, window_bounds = array<i64: 1, 2, 128>}]} {
    %c0 = arith.constant 0 : index
    %c0_0 = arith.constant 0 : index
    %0 = vector.load %arg1[%c0, %c0_0] : memref<32x1024xbf16, #tpu.memory_space<vmem>>, vector<32x1024xbf16>
    %c0_1 = arith.constant 0 : index
    %c0_2 = arith.constant 0 : index
    %1 = vector.load %arg2[%c0_1, %c0_2] : memref<1024x128xbf16, #tpu.memory_space<vmem>>, vector<1024x128xbf16>
    %cst = arith.constant dense<0.000000e+00> : vector<32x128xf32>
    %2 = tpu.matmul %0, %1, %cst {dimension_numbers = #tpu.dot_dimension_numbers<[1], [0], [0], [1], [0, 0, 1, 1], [], []>} : vector<32x1024xbf16>, vector<1024x128xbf16>, vector<32x128xf32> -> vector<32x128xf32>
    %c0_3 = arith.constant 0 : index
    %c0_4 = arith.constant 0 : index
    %3 = vector.load %arg3[%c0_3, %c0_4] : memref<32x128xf32, #tpu.memory_space<vmem>>, vector<32x128xf32>
    tpu.vector_store %arg3[%c0_3, %c0_4], %2 {strides = array<i32>} : memref<32x128xf32, #tpu.memory_space<vmem>>, vector<32x128xf32>,
    %cst_5 = arith.constant dense<0.000000e+00> : vector<128xf32>
    %4 = vector.multi_reduction <add>, %2, %cst_5 [0] : vector<32x128xf32> to vector<128xf32>
    %5 = vector.shape_cast %4 : vector<128xf32> to vector<1x128xf32>
    %6 = arith.mulf %2, %2 : vector<32x128xf32>
    %cst_6 = arith.constant dense<0.000000e+00> : vector<128xf32>
    %7 = vector.multi_reduction <add>, %6, %cst_6 [0] : vector<32x128xf32> to vector<128xf32>
    %8 = vector.shape_cast %7 : vector<128xf32> to vector<1x128xf32>
    %9 = tpu.concatenate %5, %8 in 0 : vector<1x128xf32>, vector<1x128xf32> -> vector<2x128xf32>
    %c0_7 = arith.constant 0 : index
    %c0_8 = arith.constant 0 : index
    %c0_9 = arith.constant 0 : index
    %10 = vector.load %arg4[%c0_7, %c0_8, %c0_9] : memref<1x2x128xf32, #tpu.memory_space<vmem>>, vector<1x2x128xf32>
    %11 = vector.shape_cast %10 : vector<1x2x128xf32> to vector<2x128xf32>
    %12 = vector.shape_cast %9 : vector<2x128xf32> to vector<1x2x128xf32>
    tpu.vector_store %arg4[%c0_7, %c0_8, %c0_9], %12 {strides = array<i32>} : memref<1x2x128xf32, #tpu.memory_space<vmem>>, vector<1x2x128xf32>,
    return
  }
  func.func @transform_0(%arg0: i32) -> (i32, i32) {
    %c0_i32 = arith.constant 0 : i32
    %c0_i32_0 = arith.constant 0 : i32
    return %arg0, %c0_i32 : i32, i32
  }
  func.func @transform_1(%arg0: i32) -> (i32, i32) {
    %c0_i32 = arith.constant 0 : i32
    %c0_i32_0 = arith.constant 0 : i32
    %c0_i32_1 = arith.constant 0 : i32
    return %c0_i32, %c0_i32_0 : i32, i32
  }
  func.func @transform_2(%arg0: i32) -> (i32, i32) {
    %c0_i32 = arith.constant 0 : i32
    %c0_i32_0 = arith.constant 0 : i32
    return %arg0, %c0_i32 : i32, i32
  }
  func.func @transform_3(%arg0: i32) -> (i32, i32, i32) {
    %c0_i32 = arith.constant 0 : i32
    %c0_i32_0 = arith.constant 0 : i32
    %c0_i32_1 = arith.constant 0 : i32
    return %arg0, %c0_i32, %c0_i32_0 : i32, i32, i32
  }
}

module attributes {stable_mosaic.version = 11 : i64} {
  func.func @_bn_act_kernel(%arg0: i32, %arg1: memref<16x1024xf32, #tpu.memory_space<vmem>>, %arg2: memref<1x1024xf32, #tpu.memory_space<vmem>>, %arg3: memref<1x1024xf32, #tpu.memory_space<vmem>>, %arg4: memref<16x1024xf32, #tpu.memory_space<vmem>>) attributes {dimension_semantics = [#tpu.dimension_semantics<parallel>], iteration_bounds = array<i64: 1>, scalar_prefetch = 0 : i64, scratch_operands = 0 : i64, tpu.core_type = #tpu.core_type<tc>, window_params = [{transform_indices = @transform_0, window_bounds = array<i64: 16, 1024>}, {pipeline_mode = #tpu.pipeline_mode<synchronous>, transform_indices = @transform_1, window_bounds = array<i64: 1, 1024>}, {pipeline_mode = #tpu.pipeline_mode<synchronous>, transform_indices = @transform_2, window_bounds = array<i64: 1, 1024>}, {transform_indices = @transform_3, window_bounds = array<i64: 16, 1024>}]} {
    %c0 = arith.constant 0 : index
    %c0_0 = arith.constant 0 : index
    %0 = vector.load %arg1[%c0, %c0_0] : memref<16x1024xf32, #tpu.memory_space<vmem>>, vector<16x1024xf32>
    %c0_1 = arith.constant 0 : index
    %c0_2 = arith.constant 0 : index
    %1 = vector.load %arg2[%c0_1, %c0_2] : memref<1x1024xf32, #tpu.memory_space<vmem>>, vector<1x1024xf32>
    %2 = vector.broadcast %1 : vector<1x1024xf32> to vector<16x1024xf32>
    %3 = arith.mulf %0, %2 : vector<16x1024xf32>
    %c0_3 = arith.constant 0 : index
    %c0_4 = arith.constant 0 : index
    %4 = vector.load %arg3[%c0_3, %c0_4] : memref<1x1024xf32, #tpu.memory_space<vmem>>, vector<1x1024xf32>
    %5 = vector.broadcast %4 : vector<1x1024xf32> to vector<16x1024xf32>
    %6 = arith.addf %3, %5 : vector<16x1024xf32>
    %cst = arith.constant 0.000000e+00 : f32
    %7 = vector.broadcast %cst : f32 to vector<16x1024xf32>
    %8 = arith.cmpf oge, %6, %7 : vector<16x1024xf32>
    %cst_5 = arith.constant 2.000000e-01 : f32
    %9 = vector.broadcast %cst_5 : f32 to vector<16x1024xf32>
    %10 = arith.mulf %9, %6 : vector<16x1024xf32>
    %11 = arith.select %8, %6, %10 : vector<16x1024xi1>, vector<16x1024xf32>
    %c0_6 = arith.constant 0 : index
    %c0_7 = arith.constant 0 : index
    %12 = vector.load %arg4[%c0_6, %c0_7] : memref<16x1024xf32, #tpu.memory_space<vmem>>, vector<16x1024xf32>
    tpu.vector_store %arg4[%c0_6, %c0_7], %11 {strides = array<i32>} : memref<16x1024xf32, #tpu.memory_space<vmem>>, vector<16x1024xf32>,
    return
  }
  func.func @transform_0(%arg0: i32) -> (i32, i32) {
    %c0_i32 = arith.constant 0 : i32
    %c0_i32_0 = arith.constant 0 : i32
    return %arg0, %c0_i32 : i32, i32
  }
  func.func @transform_1(%arg0: i32) -> (i32, i32) {
    %c0_i32 = arith.constant 0 : i32
    %c0_i32_0 = arith.constant 0 : i32
    %c0_i32_1 = arith.constant 0 : i32
    return %c0_i32, %c0_i32_0 : i32, i32
  }
  func.func @transform_2(%arg0: i32) -> (i32, i32) {
    %c0_i32 = arith.constant 0 : i32
    %c0_i32_0 = arith.constant 0 : i32
    %c0_i32_1 = arith.constant 0 : i32
    return %c0_i32, %c0_i32_0 : i32, i32
  }
  func.func @transform_3(%arg0: i32) -> (i32, i32) {
    %c0_i32 = arith.constant 0 : i32
    %c0_i32_0 = arith.constant 0 : i32
    return %arg0, %c0_i32 : i32, i32
  }
}

module attributes {stable_mosaic.version = 11 : i64} {
  func.func @_matmul_stats_kernel(%arg0: i32, %arg1: memref<128x512xbf16, #tpu.memory_space<vmem>>, %arg2: memref<512x64xbf16, #tpu.memory_space<vmem>>, %arg3: memref<128x64xf32, #tpu.memory_space<vmem>>, %arg4: memref<1x2x64xf32, #tpu.memory_space<vmem>>) attributes {dimension_semantics = [#tpu.dimension_semantics<parallel>], iteration_bounds = array<i64: 1>, scalar_prefetch = 0 : i64, scratch_operands = 0 : i64, tpu.core_type = #tpu.core_type<tc>, window_params = [{transform_indices = @transform_0, window_bounds = array<i64: 128, 512>}, {pipeline_mode = #tpu.pipeline_mode<synchronous>, transform_indices = @transform_1, window_bounds = array<i64: 512, 64>}, {transform_indices = @transform_2, window_bounds = array<i64: 128, 64>}, {transform_indices = @transform_3, window_bounds = array<i64: 1, 2, 64>}]} {
    %c0 = arith.constant 0 : index
    %c0_0 = arith.constant 0 : index
    %0 = vector.load %arg1[%c0, %c0_0] : memref<128x512xbf16, #tpu.memory_space<vmem>>, vector<128x512xbf16>
    %c0_1 = arith.constant 0 : index
    %c0_2 = arith.constant 0 : index
    %1 = vector.load %arg2[%c0_1, %c0_2] : memref<512x64xbf16, #tpu.memory_space<vmem>>, vector<512x64xbf16>
    %cst = arith.constant dense<0.000000e+00> : vector<128x64xf32>
    %2 = tpu.matmul %0, %1, %cst {dimension_numbers = #tpu.dot_dimension_numbers<[1], [0], [0], [1], [0, 0, 1, 1], [], []>} : vector<128x512xbf16>, vector<512x64xbf16>, vector<128x64xf32> -> vector<128x64xf32>
    %c0_3 = arith.constant 0 : index
    %c0_4 = arith.constant 0 : index
    %3 = vector.load %arg3[%c0_3, %c0_4] : memref<128x64xf32, #tpu.memory_space<vmem>>, vector<128x64xf32>
    tpu.vector_store %arg3[%c0_3, %c0_4], %2 {strides = array<i32>} : memref<128x64xf32, #tpu.memory_space<vmem>>, vector<128x64xf32>,
    %cst_5 = arith.constant dense<0.000000e+00> : vector<64xf32>
    %4 = vector.multi_reduction <add>, %2, %cst_5 [0] : vector<128x64xf32> to vector<64xf32>
    %5 = vector.shape_cast %4 : vector<64xf32> to vector<1x64xf32>
    %6 = arith.mulf %2, %2 : vector<128x64xf32>
    %cst_6 = arith.constant dense<0.000000e+00> : vector<64xf32>
    %7 = vector.multi_reduction <add>, %6, %cst_6 [0] : vector<128x64xf32> to vector<64xf32>
    %8 = vector.shape_cast %7 : vector<64xf32> to vector<1x64xf32>
    %9 = tpu.concatenate %5, %8 in 0 : vector<1x64xf32>, vector<1x64xf32> -> vector<2x64xf32>
    %c0_7 = arith.constant 0 : index
    %c0_8 = arith.constant 0 : index
    %c0_9 = arith.constant 0 : index
    %10 = vector.load %arg4[%c0_7, %c0_8, %c0_9] : memref<1x2x64xf32, #tpu.memory_space<vmem>>, vector<1x2x64xf32>
    %11 = vector.shape_cast %10 : vector<1x2x64xf32> to vector<2x64xf32>
    %12 = vector.shape_cast %9 : vector<2x64xf32> to vector<1x2x64xf32>
    tpu.vector_store %arg4[%c0_7, %c0_8, %c0_9], %12 {strides = array<i32>} : memref<1x2x64xf32, #tpu.memory_space<vmem>>, vector<1x2x64xf32>,
    return
  }
  func.func @transform_0(%arg0: i32) -> (i32, i32) {
    %c0_i32 = arith.constant 0 : i32
    %c0_i32_0 = arith.constant 0 : i32
    return %arg0, %c0_i32 : i32, i32
  }
  func.func @transform_1(%arg0: i32) -> (i32, i32) {
    %c0_i32 = arith.constant 0 : i32
    %c0_i32_0 = arith.constant 0 : i32
    %c0_i32_1 = arith.constant 0 : i32
    return %c0_i32, %c0_i32_0 : i32, i32
  }
  func.func @transform_2(%arg0: i32) -> (i32, i32) {
    %c0_i32 = arith.constant 0 : i32
    %c0_i32_0 = arith.constant 0 : i32
    return %arg0, %c0_i32 : i32, i32
  }
  func.func @transform_3(%arg0: i32) -> (i32, i32, i32) {
    %c0_i32 = arith.constant 0 : i32
    %c0_i32_0 = arith.constant 0 : i32
    %c0_i32_1 = arith.constant 0 : i32
    return %arg0, %c0_i32, %c0_i32_0 : i32, i32, i32
  }
}

module attributes {stable_mosaic.version = 11 : i64} {
  func.func @_bn_act_kernel(%arg0: i32, %arg1: memref<32x1024xf32, #tpu.memory_space<vmem>>, %arg2: memref<1x1024xf32, #tpu.memory_space<vmem>>, %arg3: memref<1x1024xf32, #tpu.memory_space<vmem>>, %arg4: memref<32x1024xf32, #tpu.memory_space<vmem>>) attributes {dimension_semantics = [#tpu.dimension_semantics<parallel>], iteration_bounds = array<i64: 1>, scalar_prefetch = 0 : i64, scratch_operands = 0 : i64, tpu.core_type = #tpu.core_type<tc>, window_params = [{transform_indices = @transform_0, window_bounds = array<i64: 32, 1024>}, {pipeline_mode = #tpu.pipeline_mode<synchronous>, transform_indices = @transform_1, window_bounds = array<i64: 1, 1024>}, {pipeline_mode = #tpu.pipeline_mode<synchronous>, transform_indices = @transform_2, window_bounds = array<i64: 1, 1024>}, {transform_indices = @transform_3, window_bounds = array<i64: 32, 1024>}]} {
    %c0 = arith.constant 0 : index
    %c0_0 = arith.constant 0 : index
    %0 = vector.load %arg1[%c0, %c0_0] : memref<32x1024xf32, #tpu.memory_space<vmem>>, vector<32x1024xf32>
    %c0_1 = arith.constant 0 : index
    %c0_2 = arith.constant 0 : index
    %1 = vector.load %arg2[%c0_1, %c0_2] : memref<1x1024xf32, #tpu.memory_space<vmem>>, vector<1x1024xf32>
    %2 = vector.broadcast %1 : vector<1x1024xf32> to vector<32x1024xf32>
    %3 = arith.mulf %0, %2 : vector<32x1024xf32>
    %c0_3 = arith.constant 0 : index
    %c0_4 = arith.constant 0 : index
    %4 = vector.load %arg3[%c0_3, %c0_4] : memref<1x1024xf32, #tpu.memory_space<vmem>>, vector<1x1024xf32>
    %5 = vector.broadcast %4 : vector<1x1024xf32> to vector<32x1024xf32>
    %6 = arith.addf %3, %5 : vector<32x1024xf32>
    %cst = arith.constant 0.000000e+00 : f32
    %7 = vector.broadcast %cst : f32 to vector<32x1024xf32>
    %8 = arith.cmpf oge, %6, %7 : vector<32x1024xf32>
    %cst_5 = arith.constant 2.000000e-01 : f32
    %9 = vector.broadcast %cst_5 : f32 to vector<32x1024xf32>
    %10 = arith.mulf %9, %6 : vector<32x1024xf32>
    %11 = arith.select %8, %6, %10 : vector<32x1024xi1>, vector<32x1024xf32>
    %c0_6 = arith.constant 0 : index
    %c0_7 = arith.constant 0 : index
    %12 = vector.load %arg4[%c0_6, %c0_7] : memref<32x1024xf32, #tpu.memory_space<vmem>>, vector<32x1024xf32>
    tpu.vector_store %arg4[%c0_6, %c0_7], %11 {strides = array<i32>} : memref<32x1024xf32, #tpu.memory_space<vmem>>, vector<32x1024xf32>,
    return
  }
  func.func @transform_0(%arg0: i32) -> (i32, i32) {
    %c0_i32 = arith.constant 0 : i32
    %c0_i32_0 = arith.constant 0 : i32
    return %arg0, %c0_i32 : i32, i32
  }
  func.func @transform_1(%arg0: i32) -> (i32, i32) {
    %c0_i32 = arith.constant 0 : i32
    %c0_i32_0 = arith.constant 0 : i32
    %c0_i32_1 = arith.constant 0 : i32
    return %c0_i32, %c0_i32_0 : i32, i32
  }
  func.func @transform_2(%arg0: i32) -> (i32, i32) {
    %c0_i32 = arith.constant 0 : i32
    %c0_i32_0 = arith.constant 0 : i32
    %c0_i32_1 = arith.constant 0 : i32
    return %c0_i32, %c0_i32_0 : i32, i32
  }
  func.func @transform_3(%arg0: i32) -> (i32, i32) {
    %c0_i32 = arith.constant 0 : i32
    %c0_i32_0 = arith.constant 0 : i32
    return %arg0, %c0_i32 : i32, i32
  }
}

module attributes {stable_mosaic.version = 11 : i64} {
  func.func @_matmul_stats_kernel(%arg0: i32, %arg1: memref<512x256xbf16, #tpu.memory_space<vmem>>, %arg2: memref<256x32xbf16, #tpu.memory_space<vmem>>, %arg3: memref<512x32xf32, #tpu.memory_space<vmem>>, %arg4: memref<1x2x32xf32, #tpu.memory_space<vmem>>) attributes {dimension_semantics = [#tpu.dimension_semantics<parallel>], iteration_bounds = array<i64: 1>, scalar_prefetch = 0 : i64, scratch_operands = 0 : i64, tpu.core_type = #tpu.core_type<tc>, window_params = [{transform_indices = @transform_0, window_bounds = array<i64: 512, 256>}, {pipeline_mode = #tpu.pipeline_mode<synchronous>, transform_indices = @transform_1, window_bounds = array<i64: 256, 32>}, {transform_indices = @transform_2, window_bounds = array<i64: 512, 32>}, {transform_indices = @transform_3, window_bounds = array<i64: 1, 2, 32>}]} {
    %c0 = arith.constant 0 : index
    %c0_0 = arith.constant 0 : index
    %0 = vector.load %arg1[%c0, %c0_0] : memref<512x256xbf16, #tpu.memory_space<vmem>>, vector<512x256xbf16>
    %c0_1 = arith.constant 0 : index
    %c0_2 = arith.constant 0 : index
    %1 = vector.load %arg2[%c0_1, %c0_2] : memref<256x32xbf16, #tpu.memory_space<vmem>>, vector<256x32xbf16>
    %cst = arith.constant dense<0.000000e+00> : vector<512x32xf32>
    %2 = tpu.matmul %0, %1, %cst {dimension_numbers = #tpu.dot_dimension_numbers<[1], [0], [0], [1], [0, 0, 1, 1], [], []>} : vector<512x256xbf16>, vector<256x32xbf16>, vector<512x32xf32> -> vector<512x32xf32>
    %c0_3 = arith.constant 0 : index
    %c0_4 = arith.constant 0 : index
    %3 = vector.load %arg3[%c0_3, %c0_4] : memref<512x32xf32, #tpu.memory_space<vmem>>, vector<512x32xf32>
    tpu.vector_store %arg3[%c0_3, %c0_4], %2 {strides = array<i32>} : memref<512x32xf32, #tpu.memory_space<vmem>>, vector<512x32xf32>,
    %cst_5 = arith.constant dense<0.000000e+00> : vector<32xf32>
    %4 = vector.multi_reduction <add>, %2, %cst_5 [0] : vector<512x32xf32> to vector<32xf32>
    %5 = vector.shape_cast %4 : vector<32xf32> to vector<1x32xf32>
    %6 = arith.mulf %2, %2 : vector<512x32xf32>
    %cst_6 = arith.constant dense<0.000000e+00> : vector<32xf32>
    %7 = vector.multi_reduction <add>, %6, %cst_6 [0] : vector<512x32xf32> to vector<32xf32>
    %8 = vector.shape_cast %7 : vector<32xf32> to vector<1x32xf32>
    %9 = tpu.concatenate %5, %8 in 0 : vector<1x32xf32>, vector<1x32xf32> -> vector<2x32xf32>
    %c0_7 = arith.constant 0 : index
    %c0_8 = arith.constant 0 : index
    %c0_9 = arith.constant 0 : index
    %10 = vector.load %arg4[%c0_7, %c0_8, %c0_9] : memref<1x2x32xf32, #tpu.memory_space<vmem>>, vector<1x2x32xf32>
    %11 = vector.shape_cast %10 : vector<1x2x32xf32> to vector<2x32xf32>
    %12 = vector.shape_cast %9 : vector<2x32xf32> to vector<1x2x32xf32>
    tpu.vector_store %arg4[%c0_7, %c0_8, %c0_9], %12 {strides = array<i32>} : memref<1x2x32xf32, #tpu.memory_space<vmem>>, vector<1x2x32xf32>,
    return
  }
  func.func @transform_0(%arg0: i32) -> (i32, i32) {
    %c0_i32 = arith.constant 0 : i32
    %c0_i32_0 = arith.constant 0 : i32
    return %arg0, %c0_i32 : i32, i32
  }
  func.func @transform_1(%arg0: i32) -> (i32, i32) {
    %c0_i32 = arith.constant 0 : i32
    %c0_i32_0 = arith.constant 0 : i32
    %c0_i32_1 = arith.constant 0 : i32
    return %c0_i32, %c0_i32_0 : i32, i32
  }
  func.func @transform_2(%arg0: i32) -> (i32, i32) {
    %c0_i32 = arith.constant 0 : i32
    %c0_i32_0 = arith.constant 0 : i32
    return %arg0, %c0_i32 : i32, i32
  }
  func.func @transform_3(%arg0: i32) -> (i32, i32, i32) {
    %c0_i32 = arith.constant 0 : i32
    %c0_i32_0 = arith.constant 0 : i32
    %c0_i32_1 = arith.constant 0 : i32
    return %arg0, %c0_i32, %c0_i32_0 : i32, i32, i32
  }
}

module attributes {stable_mosaic.version = 11 : i64} {
  func.func @_bn_act_kernel(%arg0: i32, %arg1: memref<64x1024xf32, #tpu.memory_space<vmem>>, %arg2: memref<1x1024xf32, #tpu.memory_space<vmem>>, %arg3: memref<1x1024xf32, #tpu.memory_space<vmem>>, %arg4: memref<64x1024xf32, #tpu.memory_space<vmem>>) attributes {dimension_semantics = [#tpu.dimension_semantics<parallel>], iteration_bounds = array<i64: 1>, scalar_prefetch = 0 : i64, scratch_operands = 0 : i64, tpu.core_type = #tpu.core_type<tc>, window_params = [{transform_indices = @transform_0, window_bounds = array<i64: 64, 1024>}, {pipeline_mode = #tpu.pipeline_mode<synchronous>, transform_indices = @transform_1, window_bounds = array<i64: 1, 1024>}, {pipeline_mode = #tpu.pipeline_mode<synchronous>, transform_indices = @transform_2, window_bounds = array<i64: 1, 1024>}, {transform_indices = @transform_3, window_bounds = array<i64: 64, 1024>}]} {
    %c0 = arith.constant 0 : index
    %c0_0 = arith.constant 0 : index
    %0 = vector.load %arg1[%c0, %c0_0] : memref<64x1024xf32, #tpu.memory_space<vmem>>, vector<64x1024xf32>
    %c0_1 = arith.constant 0 : index
    %c0_2 = arith.constant 0 : index
    %1 = vector.load %arg2[%c0_1, %c0_2] : memref<1x1024xf32, #tpu.memory_space<vmem>>, vector<1x1024xf32>
    %2 = vector.broadcast %1 : vector<1x1024xf32> to vector<64x1024xf32>
    %3 = arith.mulf %0, %2 : vector<64x1024xf32>
    %c0_3 = arith.constant 0 : index
    %c0_4 = arith.constant 0 : index
    %4 = vector.load %arg3[%c0_3, %c0_4] : memref<1x1024xf32, #tpu.memory_space<vmem>>, vector<1x1024xf32>
    %5 = vector.broadcast %4 : vector<1x1024xf32> to vector<64x1024xf32>
    %6 = arith.addf %3, %5 : vector<64x1024xf32>
    %cst = arith.constant 0.000000e+00 : f32
    %7 = vector.broadcast %cst : f32 to vector<64x1024xf32>
    %8 = arith.cmpf oge, %6, %7 : vector<64x1024xf32>
    %cst_5 = arith.constant 2.000000e-01 : f32
    %9 = vector.broadcast %cst_5 : f32 to vector<64x1024xf32>
    %10 = arith.mulf %9, %6 : vector<64x1024xf32>
    %11 = arith.select %8, %6, %10 : vector<64x1024xi1>, vector<64x1024xf32>
    %c0_6 = arith.constant 0 : index
    %c0_7 = arith.constant 0 : index
    %12 = vector.load %arg4[%c0_6, %c0_7] : memref<64x1024xf32, #tpu.memory_space<vmem>>, vector<64x1024xf32>
    tpu.vector_store %arg4[%c0_6, %c0_7], %11 {strides = array<i32>} : memref<64x1024xf32, #tpu.memory_space<vmem>>, vector<64x1024xf32>,
    return
  }
  func.func @transform_0(%arg0: i32) -> (i32, i32) {
    %c0_i32 = arith.constant 0 : i32
    %c0_i32_0 = arith.constant 0 : i32
    return %arg0, %c0_i32 : i32, i32
  }
  func.func @transform_1(%arg0: i32) -> (i32, i32) {
    %c0_i32 = arith.constant 0 : i32
    %c0_i32_0 = arith.constant 0 : i32
    %c0_i32_1 = arith.constant 0 : i32
    return %c0_i32, %c0_i32_0 : i32, i32
  }
  func.func @transform_2(%arg0: i32) -> (i32, i32) {
    %c0_i32 = arith.constant 0 : i32
    %c0_i32_0 = arith.constant 0 : i32
    %c0_i32_1 = arith.constant 0 : i32
    return %c0_i32, %c0_i32_0 : i32, i32
  }
  func.func @transform_3(%arg0: i32) -> (i32, i32) {
    %c0_i32 = arith.constant 0 : i32
    %c0_i32_0 = arith.constant 0 : i32
    return %arg0, %c0_i32 : i32, i32
  }
}

module attributes {stable_mosaic.version = 11 : i64} {
  func.func @_matmul_bias_kernel(%arg0: i32, %arg1: memref<1024x32xbf16, #tpu.memory_space<vmem>>, %arg2: memref<32x3xbf16, #tpu.memory_space<vmem>>, %arg3: memref<1x3xf32, #tpu.memory_space<vmem>>, %arg4: memref<1024x3xf32, #tpu.memory_space<vmem>>) attributes {dimension_semantics = [#tpu.dimension_semantics<parallel>], iteration_bounds = array<i64: 2>, scalar_prefetch = 0 : i64, scratch_operands = 0 : i64, tpu.core_type = #tpu.core_type<tc>, window_params = [{transform_indices = @transform_0, window_bounds = array<i64: 1024, 32>}, {pipeline_mode = #tpu.pipeline_mode<synchronous>, transform_indices = @transform_1, window_bounds = array<i64: 32, 3>}, {pipeline_mode = #tpu.pipeline_mode<synchronous>, transform_indices = @transform_2, window_bounds = array<i64: 1, 3>}, {transform_indices = @transform_3, window_bounds = array<i64: 1024, 3>}]} {
    %c0 = arith.constant 0 : index
    %c0_0 = arith.constant 0 : index
    %0 = vector.load %arg1[%c0, %c0_0] : memref<1024x32xbf16, #tpu.memory_space<vmem>>, vector<1024x32xbf16>
    %c0_1 = arith.constant 0 : index
    %c0_2 = arith.constant 0 : index
    %1 = vector.load %arg2[%c0_1, %c0_2] : memref<32x3xbf16, #tpu.memory_space<vmem>>, vector<32x3xbf16>
    %cst = arith.constant dense<0.000000e+00> : vector<1024x3xf32>
    %2 = tpu.matmul %0, %1, %cst {dimension_numbers = #tpu.dot_dimension_numbers<[1], [0], [0], [1], [0, 0, 1, 1], [], []>} : vector<1024x32xbf16>, vector<32x3xbf16>, vector<1024x3xf32> -> vector<1024x3xf32>
    %c0_3 = arith.constant 0 : index
    %c0_4 = arith.constant 0 : index
    %3 = vector.load %arg3[%c0_3, %c0_4] : memref<1x3xf32, #tpu.memory_space<vmem>>, vector<1x3xf32>
    %4 = vector.broadcast %3 : vector<1x3xf32> to vector<1024x3xf32>
    %5 = arith.addf %2, %4 : vector<1024x3xf32>
    %c0_5 = arith.constant 0 : index
    %c0_6 = arith.constant 0 : index
    %6 = vector.load %arg4[%c0_5, %c0_6] : memref<1024x3xf32, #tpu.memory_space<vmem>>, vector<1024x3xf32>
    tpu.vector_store %arg4[%c0_5, %c0_6], %5 {strides = array<i32>} : memref<1024x3xf32, #tpu.memory_space<vmem>>, vector<1024x3xf32>,
    return
  }
  func.func @transform_0(%arg0: i32) -> (i32, i32) {
    %c0_i32 = arith.constant 0 : i32
    %c0_i32_0 = arith.constant 0 : i32
    return %arg0, %c0_i32 : i32, i32
  }
  func.func @transform_1(%arg0: i32) -> (i32, i32) {
    %c0_i32 = arith.constant 0 : i32
    %c0_i32_0 = arith.constant 0 : i32
    %c0_i32_1 = arith.constant 0 : i32
    return %c0_i32, %c0_i32_0 : i32, i32
  }
  func.func @transform_2(%arg0: i32) -> (i32, i32) {
    %c0_i32 = arith.constant 0 : i32
    %c0_i32_0 = arith.constant 0 : i32
    %c0_i32_1 = arith.constant 0 : i32
    return %c0_i32, %c0_i32_0 : i32, i32
  }
  func.func @transform_3(%arg0: i32) -> (i32, i32) {
    %c0_i32 = arith.constant 0 : i32
    %c0_i32_0 = arith.constant 0 : i32
    return %arg0, %c0_i32 : i32, i32
  }
}

</mosaic_0001>

<bundles_post_ra>
// kernel: generator_forward.19
= control target key start
LH: loop header
LB: loop body
LE: loop exit
PB: predicated region body
PF: predicated region fallthrough
CT: control target
= control target key end

     0   :  { %v24_v0 = vlaneseq  ;;  %s252_s1 = inlined_call_operand.vmem [shape: f32[1,1024], index: 1, kind: input, shape index: {}]   ;;  %s253_s2 = inlined_call_operand.vmem [shape: f32[1,1024], index: 2, kind: input, shape index: {}]   ;;  %s254_s0 = inlined_call_operand.vmem [shape: f32[8,1024], index: 0, kind: input, shape index: {}]   ;;  %s255_s3 = inlined_call_operand.vmem [shape: f32[8,1024], index: 3, kind: output, shape index: {}]  }
   0x1   :  { %v22_v2 = vld [vmem:[%s252_s1] sm:$0xff]  ;;  %v15_v9 = vld [vmem:[%s254_s0 + $0x8] sm:$0xff]  ;;  %v16_v18 = vld [vmem:[%s254_s0 + $0x10] sm:$0xff] }
   0x2   :  { %v178_v1 = vshrl.u32 %v24_v0, 7  ;;  %v186_v3 = vld [vmem:[%s253_s2] sm:$0xff]  ;;  %v17_v19 = vld [vmem:[%s254_s0 + $0x18] sm:$0xff]  ;;  %v19_v29 = vld [vmem:[%s254_s0 + $0x28] sm:$0xff] }
   0x3   :  { %v14_v8 = vld [vmem:[%s254_s0] sm:$0xff]  ;;  %v20_v41 = vld [vmem:[%s254_s0 + $0x30] sm:$0xff]  ;;  %v21_v51 = vld [vmem:[%s254_s0 + $0x38] sm:$0xff] }
   0x4   :  { %v26_v4 = vsub.s32 0, %v178_v1  ;;  %v30_v5 = vsub.s32 1, %v178_v1  ;;  %v34_v6 = vsub.s32 2, %v178_v1  ;;  %v38_v7 = vsub.s32 3, %v178_v1  ;;  %v18_v24 = vld [vmem:[%s254_s0 + $0x20] sm:$0xff] }
   0x5   :  { %v42_v10 = vsub.s32 4, %v178_v1  ;;  %v46_v11 = vsub.s32 5, %v178_v1  ;;  %v50_v12 = vsub.s32 6, %v178_v1  ;;  %v54_v13 = vsub.s32 7, %v178_v1 }
   0x6   :  { %v27_v14 = vrot.slane %v22_v2, %v26_v4  ;;  %v77_v15 = vrot.slane %v186_v3, %v26_v4  ;;  %v31_v16 = vrot.slane %v22_v2, %v30_v5  ;;  %v81_v17 = vrot.slane %v186_v3, %v30_v5 }
   0x7   :  { %v35_v20 = vrot.slane %v22_v2, %v34_v6  ;;  %v85_v21 = vrot.slane %v186_v3, %v34_v6  ;;  %v39_v22 = vrot.slane %v22_v2, %v38_v7  ;;  %v89_v23 = vrot.slane %v186_v3, %v38_v7 }
   0x8   :  { %v64_v25 = vmul.f32 %v27_v14, %v14_v8  ;;  %v65_v26 = vmul.f32 %v31_v16, %v15_v9  ;;  %v43_v27 = vrot.slane %v22_v2, %v42_v10  ;;  %v93_v28 = vrot.slane %v186_v3, %v42_v10 }
   0x9   :  { %v66_v30 = vmul.f32 %v35_v20, %v16_v18  ;;  %v67_v31 = vmul.f32 %v39_v22, %v17_v19  ;;  %v47_v32 = vrot.slane %v22_v2, %v46_v11  ;;  %v97_v33 = vrot.slane %v186_v3, %v46_v11 }
   0xa   :  { %v114_v34 = vadd.f32 %v77_v15, %v64_v25  ;;  %v115_v35 = vadd.f32 %v81_v17, %v65_v26  ;;  %v68_v36 = vmul.f32 %v43_v27, %v18_v24  ;;  %v51_v37 = vrot.slane %v22_v2, %v50_v12 }
   0xb   :  { %v116_v38 = vadd.f32 %v85_v21, %v66_v30  ;;  %v117_v39 = vadd.f32 %v89_v23, %v67_v31  ;;  %v69_v40 = vmul.f32 %v47_v32, %v19_v29  ;;  %v101_v42 = vrot.slane %v186_v3, %v50_v12 }
   0xc   :  { %vm122_vm0 = vcmp.ge.f32.partialorder %v114_v34, 0.0  ;;  %v130_v43 = vmul.f32 0.2, %v114_v34  ;;  %vm123_vm1 = vcmp.ge.f32.partialorder %v115_v35, 0.0  ;;  %v131_v44 = vmul.f32 0.2, %v115_v35 }
   0xd   :  { %vm124_vm2 = vcmp.ge.f32.partialorder %v116_v38, 0.0  ;;  %v132_v45 = vmul.f32 0.2, %v116_v38  ;;  %vm125_vm3 = vcmp.ge.f32.partialorder %v117_v39, 0.0  ;;  %v133_v46 = vmul.f32 0.2, %v117_v39 }
   0xe   :  { %v138_v47 = vsel %vm122_vm0, %v114_v34, %v130_v43  ;;  %v139_v48 = vsel %vm123_vm1, %v115_v35, %v131_v44  ;;  %v118_v49 = vadd.f32 %v93_v28, %v68_v36  ;;  %v119_v50 = vadd.f32 %v97_v33, %v69_v40 }
   0xf   :  { %146 = vst [vmem:[%s255_s3] sm:$0xff] %v138_v47  ;;  %147 = vst [vmem:[%s255_s3 + $0x8] sm:$0xff] %v139_v48  ;;  %v140_v52 = vsel %vm124_vm2, %v116_v38, %v132_v45  ;;  %v141_v53 = vsel %vm125_vm3, %v117_v39, %v133_v46  ;;  %v70_v54 = vmul.f32 %v51_v37, %v20_v41 }
  0x10   :  { %v55_v55 = vrot.slane %v22_v2, %v54_v13  ;;  %148 = vst [vmem:[%s255_s3 + $0x10] sm:$0xff] %v140_v52  ;;  %149 = vst [vmem:[%s255_s3 + $0x18] sm:$0xff] %v141_v53  ;;  %vm126_vm4 = vcmp.ge.f32.partialorder %v118_v49, 0.0  ;;  %v134_v56 = vmul.f32 0.2, %v118_v49  ;;  %vm127_vm5 = vcmp.ge.f32.partialorder %v119_v50, 0.0 }
  0x11   :  { %v135_v57 = vmul.f32 0.2, %v119_v50  ;;  %v120_v58 = vadd.f32 %v101_v42, %v70_v54  ;;  %v105_v60 = vrot.slane %v186_v3, %v54_v13 }
  0x12   :  { %v71_v59 = vmul.f32 %v55_v55, %v21_v51  ;;  %v142_v61 = vsel %vm126_vm4, %v118_v49, %v134_v56 }
  0x13   :  { %v143_v62 = vsel %vm127_vm5, %v119_v50, %v135_v57  ;;  %150 = vst [vmem:[%s255_s3 + $0x20] sm:$0xff] %v142_v61  ;;  %vm128_vm6 = vcmp.ge.f32.partialorder %v120_v58, 0.0  ;;  %v136_v63 = vmul.f32 0.2, %v120_v58 }
  0x14   :  { %151 = vst [vmem:[%s255_s3 + $0x28] sm:$0xff] %v143_v62  ;;  %v121_v0 = vadd.f32 %v105_v60, %v71_v59 }
  0x15   :  { %v144_v1 = vsel %vm128_vm6, %v120_v58, %v136_v63 }
  0x16   :  { %vm129_vm7 = vcmp.ge.f32.partialorder %v121_v0, 0.0  ;;  %v137_v2 = vmul.f32 0.2, %v121_v0  ;;  %152 = vst [vmem:[%s255_s3 + $0x30] sm:$0xff] %v144_v1 }
  0x18   :  { %v145_v3 = vsel %vm129_vm7, %v121_v0, %v137_v2 }
  0x19   :  { %153 = vst [vmem:[%s255_s3 + $0x38] sm:$0xff] %v145_v3 }

// kernel: generator_forward.18
= control target key start
LH: loop header
LB: loop body
LE: loop exit
PB: predicated region body
PF: predicated region fallthrough
CT: control target
= control target key end

     0   :  { %vm603_vm0 = vcmask 1040384   ;;  %s1070_s1 = inlined_call_operand.vmem [shape: bf16[512,256], index: 1, kind: input, shape index: {}]   ;;  %s1071_s0 = inlined_call_operand.vmem [shape: bf16[32,512], index: 0, kind: input, shape index: {}]   ;;  %s1072_s2 = inlined_call_operand.vmem [shape: f32[32,256], index: 2, kind: output, shape index: {0}]   ;;  %s1073_s3 = inlined_call_operand.vmem [shape: f32[1,2,256], index: 3, kind: output, shape index: {1}]  }
   0x1   :  { %v699_v0 = vld [vmem:[%s1070_s1 + $0x74] ss:$8 sps:$4 sm:$0xff]   ;;  %v703_v2 = vld [vmem:[%s1070_s1 + $0x70] ss:$8 sps:$4 sm:$0xff]   ;;  %v705_v4 = vld [vmem:[%s1070_s1 + $0x64] ss:$8 sps:$4 sm:$0xff]  }
   0x2   :  { %v701_v1 = vld [vmem:[%s1070_s1 + $0x174] ss:$8 sps:$4 sm:$0xff]   ;;  %445 = vmatprep.subr.bf16.mxu0 %v699_v0  ;;  %v704_v3 = vld [vmem:[%s1070_s1 + $0x170] ss:$8 sps:$4 sm:$0xff]   ;;  %v707_v5 = vld [vmem:[%s1070_s1 + $0x164] ss:$8 sps:$4 sm:$0xff]  }
   0x3   :  { %498 = vmatprep.subr.bf16.mxu1 %v701_v1  ;;  %446 = vmatpush1.bf16.msra.mxu0 %v703_v2  ;;  %v709_v6 = vld [vmem:[%s1070_s1 + $0x60] ss:$8 sps:$4 sm:$0xff]   ;;  %v711_v8 = vld [vmem:[%s1070_s1 + $0x54] ss:$8 sps:$4 sm:$0xff]   ;;  %v715_v10 = vld [vmem:[%s1070_s1 + $0x50] ss:$8 sps:$4 sm:$0xff]  }
   0x4   :  { %499 = vmatpush1.bf16.msra.mxu1 %v704_v3  ;;  %447 = vmatprep.subr.bf16.mxu0 %v705_v4  ;;  %v710_v7 = vld [vmem:[%s1070_s1 + $0x160] ss:$8 sps:$4 sm:$0xff]   ;;  %v713_v9 = vld [vmem:[%s1070_s1 + $0x154] ss:$8 sps:$4 sm:$0xff]   ;;  %v716_v11 = vld [vmem:[%s1070_s1 + $0x150] ss:$8 sps:$4 sm:$0xff]  }
   0x5   :  { %500 = vmatprep.subr.bf16.mxu1 %v707_v5  ;;  %v717_v12 = vld [vmem:[%s1070_s1 + $0x44] ss:$8 sps:$4 sm:$0xff]   ;;  %v721_v14 = vld [vmem:[%s1070_s1 + $0x40] ss:$8 sps:$4 sm:$0xff]   ;;  %v723_v16 = vld [vmem:[%s1070_s1 + $0x34] ss:$8 sps:$4 sm:$0xff]  }
   0x6   :  { %v719_v13 = vld [vmem:[%s1070_s1 + $0x144] ss:$8 sps:$4 sm:$0xff]   ;;  %v722_v15 = vld [vmem:[%s1070_s1 + $0x140] ss:$8 sps:$4 sm:$0xff]   ;;  %v725_v17 = vld [vmem:[%s1070_s1 + $0x134] ss:$8 sps:$4 sm:$0xff]  }
   0x7   :  { %448 = vmatpush1.bf16.msra.mxu0 %v709_v6  ;;  %v727_v18 = vld [vmem:[%s1070_s1 + $0x30] ss:$8 sps:$4 sm:$0xff]   ;;  %v729_v20 = vld [vmem:[%s1070_s1 + $0x24] ss:$8 sps:$4 sm:$0xff]   ;;  %v733_v22 = vld [vmem:[%s1070_s1 + $0x20] ss:$8 sps:$4 sm:$0xff]  }
   0x8   :  { %501 = vmatpush1.bf16.msra.mxu1 %v710_v7  ;;  %449 = vmatprep.subr.bf16.mxu0 %v711_v8  ;;  %v728_v19 = vld [vmem:[%s1070_s1 + $0x130] ss:$8 sps:$4 sm:$0xff]   ;;  %v731_v21 = vld [vmem:[%s1070_s1 + $0x124] ss:$8 sps:$4 sm:$0xff]   ;;  %v734_v23 = vld [vmem:[%s1070_s1 + $0x120] ss:$8 sps:$4 sm:$0xff]  }
   0x9   :  { %502 = vmatprep.subr.bf16.mxu1 %v713_v9  ;;  %v735_v24 = vld [vmem:[%s1070_s1 + $0x14] ss:$8 sps:$4 sm:$0xff]   ;;  %v739_v26 = vld [vmem:[%s1070_s1 + $0x10] ss:$8 sps:$4 sm:$0xff]   ;;  %v741_v28 = vld [vmem:[%s1070_s1 + $0x4] ss:$8 sps:$4 sm:$0xff]  }
   0xa   :  { %v737_v25 = vld [vmem:[%s1070_s1 + $0x114] ss:$8 sps:$4 sm:$0xff]   ;;  %v740_v27 = vld [vmem:[%s1070_s1 + $0x110] ss:$8 sps:$4 sm:$0xff]   ;;  %v743_v29 = vld [vmem:[%s1070_s1 + $0x104] ss:$8 sps:$4 sm:$0xff]  }
   0xb   :  { %450 = vmatpush1.bf16.msra.mxu0 %v715_v10  ;;  %v745_v30 = vld [vmem:[%s1070_s1] ss:$8 sps:$4 sm:$0xff]   ;;  %v747_v32 = vld [vmem:[%s1070_s1 + $0xf4] ss:$8 sps:$4 sm:$0xff]   ;;  %v751_v34 = vld [vmem:[%s1070_s1 + $0xf0] ss:$8 sps:$4 sm:$0xff]  }
   0xc   :  { %503 = vmatpush1.bf16.msra.mxu1 %v716_v11  ;;  %451 = vmatprep.subr.bf16.mxu0 %v717_v12  ;;  %v746_v31 = vld [vmem:[%s1070_s1 + $0x100] ss:$8 sps:$4 sm:$0xff]   ;;  %v749_v33 = vld [vmem:[%s1070_s1 + $0x1f4] ss:$8 sps:$4 sm:$0xff]   ;;  %v752_v35 = vld [vmem:[%s1070_s1 + $0x1f0] ss:$8 sps:$4 sm:$0xff]  }
   0xd   :  { %504 = vmatprep.subr.bf16.mxu1 %v719_v13  ;;  %v753_v36 = vld [vmem:[%s1070_s1 + $0xe4] ss:$8 sps:$4 sm:$0xff]   ;;  %v757_v38 = vld [vmem:[%s1070_s1 + $0xe0] ss:$8 sps:$4 sm:$0xff]   ;;  %v759_v40 = vld [vmem:[%s1070_s1 + $0xd4] ss:$8 sps:$4 sm:$0xff]  }
   0xe   :  { %v755_v37 = vld [vmem:[%s1070_s1 + $0x1e4] ss:$8 sps:$4 sm:$0xff]   ;;  %v758_v39 = vld [vmem:[%s1070_s1 + $0x1e0] ss:$8 sps:$4 sm:$0xff]   ;;  %v761_v41 = vld [vmem:[%s1070_s1 + $0x1d4] ss:$8 sps:$4 sm:$0xff]  }
   0xf   :  { %452 = vmatpush1.bf16.msra.mxu0 %v721_v14  ;;  %v763_v42 = vld [vmem:[%s1070_s1 + $0xd0] ss:$8 sps:$4 sm:$0xff]   ;;  %v765_v44 = vld [vmem:[%s1070_s1 + $0xc4] ss:$8 sps:$4 sm:$0xff]   ;;  %v769_v46 = vld [vmem:[%s1070_s1 + $0xc0] ss:$8 sps:$4 sm:$0xff]  }
  0x10   :  { %505 = vmatpush1.bf16.msra.mxu1 %v722_v15  ;;  %453 = vmatprep.subr.bf16.mxu0 %v723_v16  ;;  %v764_v43 = vld [vmem:[%s1070_s1 + $0x1d0] ss:$8 sps:$4 sm:$0xff]   ;;  %v767_v45 = vld [vmem:[%s1070_s1 + $0x1c4] ss:$8 sps:$4 sm:$0xff]   ;;  %v770_v47 = vld [vmem:[%s1070_s1 + $0x1c0] ss:$8 sps:$4 sm:$0xff]  }
  0x11   :  { %506 = vmatprep.subr.bf16.mxu1 %v725_v17  ;;  %v771_v48 = vld [vmem:[%s1070_s1 + $0xb4] ss:$8 sps:$4 sm:$0xff]   ;;  %v775_v52 = vld [vmem:[%s1070_s1 + $0xb0] ss:$8 sps:$4 sm:$0xff]   ;;  %v777_v54 = vld [vmem:[%s1070_s1 + $0xa4] ss:$8 sps:$4 sm:$0xff]  }
  0x12   :  { %v797_v49 = vld [vmem:[%s1071_s0 + $0x4] ss:$16 sps:$4 sm:$0xff]   ;;  %v800_v51 = vld [vmem:[%s1071_s0 + $0xc] ss:$16 sps:$4 sm:$0xff]   ;;  %v776_v53 = vld [vmem:[%s1070_s1 + $0x1b0] ss:$8 sps:$4 sm:$0xff]  }
  0x13   :  { %454 = vmatpush1.bf16.msra.mxu0 %v727_v18  ;;  %v773_v50 = vld [vmem:[%s1070_s1 + $0x1b4] ss:$8 sps:$4 sm:$0xff]   ;;  %477 = vmatprep.mubr.bf16.mxu0 %v797_v49  ;;  %v779_v55 = vld [vmem:[%s1070_s1 + $0x1a4] ss:$8 sps:$4 sm:$0xff]   ;;  %v781_v56 = vld [vmem:[%s1070_s1 + $0xa0] ss:$8 sps:$4 sm:$0xff]  }
  0x14   :  { %507 = vmatpush1.bf16.msra.mxu1 %v728_v19  ;;  %455 = vmatprep.subr.bf16.mxu0 %v729_v20  ;;  %v782_v57 = vld [vmem:[%s1070_s1 + $0x1a0] ss:$8 sps:$4 sm:$0xff]   ;;  %v783_v58 = vld [vmem:[%s1070_s1 + $0x94] ss:$8 sps:$4 sm:$0xff]   ;;  %v787_v60 = vld [vmem:[%s1070_s1 + $0x90] ss:$8 sps:$4 sm:$0xff]  }
  0x15   :  { %508 = vmatprep.subr.bf16.mxu1 %v731_v21  ;;  %530 = vmatprep.mubr.bf16.mxu1 %v800_v51  ;;  %v785_v59 = vld [vmem:[%s1070_s1 + $0x194] ss:$8 sps:$4 sm:$0xff]   ;;  %v788_v61 = vld [vmem:[%s1070_s1 + $0x190] ss:$8 sps:$4 sm:$0xff]   ;;  %v789_v62 = vld [vmem:[%s1070_s1 + $0x84] ss:$8 sps:$4 sm:$0xff]  }
  0x16   :  { %v791_v63 = vld [vmem:[%s1070_s1 + $0x184] ss:$8 sps:$4 sm:$0xff]   ;;  %v793_v0 = vld [vmem:[%s1070_s1 + $0x80] ss:$8 sps:$4 sm:$0xff]  }
  0x17   :  { %456 = vmatpush1.bf16.msra.mxu0 %v733_v22  ;;  %v794_v1 = vld [vmem:[%s1070_s1 + $0x180] ss:$8 sps:$4 sm:$0xff]   ;;  %v801_v4 = vld [vmem:[%s1071_s0 + $0x24] ss:$16 sps:$4 sm:$0xff]   ;;  %v803_v5 = vld [vmem:[%s1071_s0 + $0x2c] ss:$16 sps:$4 sm:$0xff]  }
  0x18   :  { %509 = vmatpush1.bf16.msra.mxu1 %v734_v23  ;;  %457 = vmatprep.subr.bf16.mxu0 %v735_v24  ;;  %v795_v2 = vld [vmem:[%s1071_s0] ss:$16 sps:$4 sm:$0xff]   ;;  %v798_v3 = vld [vmem:[%s1071_s0 + $0x8] ss:$16 sps:$4 sm:$0xff]  }
  0x19   :  { %510 = vmatprep.subr.bf16.mxu1 %v737_v25  ;;  %v805_v6 = vld [vmem:[%s1071_s0 + $0x20] ss:$16 sps:$4 sm:$0xff]   ;;  %v806_v7 = vld [vmem:[%s1071_s0 + $0x28] ss:$16 sps:$4 sm:$0xff]  }
  0x1b   :  { %458 = vmatpush1.bf16.msra.mxu0 %v739_v26 }
  0x1c   :  { %511 = vmatpush1.bf16.msra.mxu1 %v740_v27  ;;  %459 = vmatprep.subr.bf16.mxu0 %v741_v28 }
  0x1d   :  { %512 = vmatprep.subr.bf16.mxu1 %v743_v29 }
  0x1f   :  { %460 = vmatpush1.bf16.msra.mxu0 %v745_v30 }
  0x20   :  { %513 = vmatpush1.bf16.msra.mxu1 %v746_v31  ;;  %461 = vmatprep.subr.bf16.mxu0 %v747_v32 }
  0x21   :  { %514 = vmatprep.subr.bf16.mxu1 %v749_v33 }
  0x23   :  { %462 = vmatpush2.bf16.msra.mxu0 %v751_v34 }
  0x24   :  { %515 = vmatpush2.bf16.msra.mxu1 %v752_v35  ;;  %463 = vmatprep.subr.bf16.mxu0 %v753_v36 }
  0x25   :  { %516 = vmatprep.subr.bf16.mxu1 %v755_v37 }
  0x27   :  { %464 = vmatpush2.bf16.msra.mxu0 %v757_v38 }
  0x28   :  { %517 = vmatpush2.bf16.msra.mxu1 %v758_v39  ;;  %465 = vmatprep.subr.bf16.mxu0 %v759_v40 }
  0x29   :  { %518 = vmatprep.subr.bf16.mxu1 %v761_v41 }
  0x2b   :  { %466 = vmatpush2.bf16.msra.mxu0 %v763_v42 }
  0x2c   :  { %519 = vmatpush2.bf16.msra.mxu1 %v764_v43  ;;  %467 = vmatprep.subr.bf16.mxu0 %v765_v44 }
  0x2d   :  { %520 = vmatprep.subr.bf16.mxu1 %v767_v45 }
  0x2f   :  { %468 = vmatpush2.bf16.msra.mxu0 %v769_v46 }
  0x30   :  { %521 = vmatpush2.bf16.msra.mxu1 %v770_v47  ;;  %469 = vmatprep.subr.bf16.mxu0 %v771_v48 }
  0x31   :  { %522 = vmatprep.subr.bf16.mxu1 %v773_v50 }
  0x33   :  { %470 = vmatpush2.bf16.msra.mxu0 %v775_v52 }
  0x34   :  { %523 = vmatpush2.bf16.msra.mxu1 %v776_v53  ;;  %471 = vmatprep.subr.bf16.mxu0 %v777_v54 }
  0x35   :  { %524 = vmatprep.subr.bf16.mxu1 %v779_v55 }
  0x37   :  { %472 = vmatpush2.bf16.msra.mxu0 %v781_v56 }
  0x38   :  { %525 = vmatpush2.bf16.msra.mxu1 %v782_v57  ;;  %473 = vmatprep.subr.bf16.mxu0 %v783_v58 }
  0x39   :  { %526 = vmatprep.subr.bf16.mxu1 %v785_v59 }
  0x3b   :  { %474 = vmatpush2.bf16.msra.mxu0 %v787_v60 }
  0x3c   :  { %527 = vmatpush2.bf16.msra.mxu1 %v788_v61  ;;  %475 = vmatprep.subr.bf16.mxu0 %v789_v62 }
  0x3d   :  { %528 = vmatprep.subr.bf16.mxu1 %v791_v63 }
  0x3f   :  { %476 = vmatpush2.bf16.msra.mxu0 %v793_v0 }
  0x40   :  { %529 = vmatpush2.bf16.msra.mxu1 %v794_v1 }
  0x42   :  { %478 = vmatmul.mubr.bf16.vlgmr.msra.gmra.mxu0 %v795_v2 }
  0x43   :  { %531 = vmatmul.mubr.bf16.vlgmr.msra.gmra.mxu1 %v798_v3  ;;  %487 = vmatprep.mubr.bf16.mxu0 %v801_v4 }
  0x44   :  { %540 = vmatprep.mubr.bf16.mxu1 %v803_v5 }
  0x4a   :  { %488 = vmatmul.mubr.bf16.gmra.mxu0 %v805_v6 }
  0x4b   :  { %541 = vmatmul.mubr.bf16.gmra.mxu1 %v806_v7 }
 0x102   :  { %v479_v8 = vpop.f32.mrf.mxu0 }
 0x103   :  { %v532_v9 = vpop.f32.mrf.mxu1 }
 0x104   :  { %v533_v10 = vadd.f32 %v532_v9, %v479_v8  ;;  %v481_v11 = vpop.f32.mrf.mxu0 }
 0x105   :  { %v534_v12 = vpop.f32.mrf.mxu1 }
 0x106   :  { %551 = vst [vmem:[%s1072_s2] sm:$0xff] %v533_v10  ;;  %v535_v13 = vadd.f32 %v534_v12, %v481_v11  ;;  %v483_v14 = vpop.f32.mrf.mxu0  ;;  %v577_v24 = vmul.f32 %v533_v10, %v533_v10 }
 0x107   :  { %v536_v15 = vpop.f32.mrf.mxu1 }
 0x108   :  { %552 = vst [vmem:[%s1072_s2 + $0x8] sm:$0xff] %v535_v13  ;;  %v537_v16 = vadd.f32 %v536_v15, %v483_v14  ;;  %v485_v17 = vpop.f32.mrf.mxu0  ;;  %v578_v31 = vmul.f32 %v535_v13, %v535_v13 }
 0x109   :  { %v538_v18 = vpop.f32.mrf.mxu1 }
 0x10a   :  { %553 = vst [vmem:[%s1072_s2 + $0x10] sm:$0xff] %v537_v16  ;;  %v539_v19 = vadd.f32 %v538_v18, %v485_v17  ;;  %v579_v20 = vmul.f32 %v537_v16, %v537_v16  ;;  %v489_v21 = vpop.f32.mrf.mxu0  ;;  %v559_v28 = vadd.f32 %v537_v16, %v533_v10 }
 0x10b   :  { %v542_v22 = vpop.f32.mrf.mxu1 }
 0x10c   :  { %554 = vst [vmem:[%s1072_s2 + $0x18] sm:$0xff] %v539_v19  ;;  %v543_v23 = vadd.f32 %v542_v22, %v489_v21  ;;  %v580_v25 = vmul.f32 %v539_v19, %v539_v19  ;;  %v491_v26 = vpop.f32.mrf.mxu0  ;;  %v585_v32 = vadd.f32 %v579_v20, %v577_v24  ;;  %v568_v35 = vadd.f32 %v539_v19, %v535_v13 }
 0x10d   :  { %v544_v27 = vpop.f32.mrf.mxu1 }
 0x10e   :  { %555 = vst [vmem:[%s1072_s2 + $0x20] sm:$0xff] %v543_v23  ;;  %v581_v29 = vmul.f32 %v543_v23, %v543_v23  ;;  %v545_v30 = vadd.f32 %v544_v27, %v491_v26  ;;  %v493_v33 = vpop.f32.mrf.mxu0  ;;  %v560_v36 = vadd.f32 %v559_v28, %v543_v23  ;;  %v594_v39 = vadd.f32 %v580_v25, %v578_v31 }
 0x10f   :  { %v546_v34 = vpop.f32.mrf.mxu1 }
 0x110   :  { %556 = vst [vmem:[%s1072_s2 + $0x28] sm:$0xff] %v545_v30  ;;  %v582_v37 = vmul.f32 %v545_v30, %v545_v30  ;;  %v547_v38 = vadd.f32 %v546_v34, %v493_v33  ;;  %v586_v40 = vadd.f32 %v585_v32, %v581_v29  ;;  %v495_v41 = vpop.f32.mrf.mxu0  ;;  %v569_v43 = vadd.f32 %v568_v35, %v545_v30 }
 0x111   :  { %v548_v42 = vpop.f32.mrf.mxu1 }
 0x112   :  { %557 = vst [vmem:[%s1072_s2 + $0x30] sm:$0xff] %v547_v38  ;;  %v561_v44 = vadd.f32 %v560_v36, %v547_v38  ;;  %v583_v45 = vmul.f32 %v547_v38, %v547_v38  ;;  %v549_v46 = vadd.f32 %v548_v42, %v495_v41  ;;  %v595_v47 = vadd.f32 %v594_v39, %v582_v37 }
 0x114   :  { %v562_v48 = vrot.slane %v561_v44, 4  ;;  %v587_v49 = vadd.f32 %v586_v40, %v583_v45  ;;  %558 = vst [vmem:[%s1072_s2 + $0x38] sm:$0xff] %v549_v46  ;;  %v570_v50 = vadd.f32 %v569_v43, %v549_v46  ;;  %v584_v51 = vmul.f32 %v549_v46, %v549_v46 }
 0x116   :  { %v563_v52 = vadd.f32 %v562_v48, %v561_v44  ;;  %v588_v53 = vrot.slane %v587_v49, 4  ;;  %v571_v54 = vrot.slane %v570_v50, 4  ;;  %v596_v55 = vadd.f32 %v595_v47, %v584_v51 }
 0x118   :  { %v564_v56 = vrot.slane %v563_v52, 2  ;;  %v589_v57 = vadd.f32 %v588_v53, %v587_v49  ;;  %v572_v58 = vadd.f32 %v571_v54, %v570_v50  ;;  %v597_v59 = vrot.slane %v596_v55, 4 }
 0x11a   :  { %v565_v60 = vadd.f32 %v564_v56, %v563_v52  ;;  %v590_v61 = vrot.slane %v589_v57, 2  ;;  %v573_v62 = vrot.slane %v572_v58, 2  ;;  %v598_v63 = vadd.f32 %v597_v59, %v596_v55 }
 0x11c   :  { %v591_v0 = vadd.f32 %v590_v61, %v589_v57  ;;  %v574_v1 = vadd.f32 %v573_v62, %v572_v58  ;;  %v599_v2 = vrot.slane %v598_v63, 2  ;;  %v566_v3 = vrot.slane %v565_v60, 1 }
 0x11e   :  { %v592_v4 = vrot.slane %v591_v0, 1  ;;  %v575_v5 = vrot.slane %v574_v1, 1  ;;  %v600_v6 = vadd.f32 %v599_v2, %v598_v63  ;;  %v567_v9 = vadd.f32 %v566_v3, %v565_v60 }
 0x120   :  { %v593_v7 = vadd.f32 %v592_v4, %v591_v0  ;;  %v601_v8 = vrot.slane %v600_v6, 1  ;;  %v576_v10 = vadd.f32 %v575_v5, %v574_v1 }
 0x122   :  { %v602_v11 = vadd.f32 %v601_v8, %v600_v6  ;;  %v604_v12 = vsel %vm603_vm0, %v567_v9, %v593_v7 }
 0x124   :  { %v605_v13 = vsel %vm603_vm0, %v576_v10, %v602_v11 }
 0x125   :  { %v608_v14 = vcombine.low %v604_v12, %v605_v13 }
 0x127   :  { %698 = vst.sshfl [vmem:[%s1073_s3] sm:$0x33 pattern:$0x76325410] %v608_v14 }

// kernel: tile.53
= control target key start
LH: loop header
LB: loop body
LE: loop exit
PB: predicated region body
PF: predicated region fallthrough
CT: control target
= control target key end

     0   :  { %s22_s0 = inlined_call_operand.vmem [shape: f32[128], index: 0, kind: input, shape index: {}]   ;;  %s23_s1 = inlined_call_operand.vmem [shape: f32[8,128], index: 1, kind: output, shape index: {}]  }
   0x1   :  { %v4_v0 = vld [vmem:[%s22_s0] ss:$0 sm:$0xff] }
   0x2   :  { %5 = vst [vmem:[%s23_s1] sm:$0xff] %v4_v0 }

// kernel: generator_forward.23
= control target key start
LH: loop header
LB: loop body
LE: loop exit
PB: predicated region body
PF: predicated region fallthrough
CT: control target
= control target key end

     0   :  { %vm844_vm0 = vcmask 1040384   ;;  %s1386_s1 = inlined_call_operand.vmem [shape: bf16[1024,128], index: 1, kind: input, shape index: {}]   ;;  %s1387_s0 = inlined_call_operand.vmem [shape: bf16[32,1024], index: 0, kind: input, shape index: {}]   ;;  %s1388_s2 = inlined_call_operand.vmem [shape: f32[32,128], index: 2, kind: output, shape index: {0}]   ;;  %s1389_s3 = inlined_call_operand.vmem [shape: f32[1,2,128], index: 3, kind: output, shape index: {1}]  }
   0x1   :  { %v1047_v0 = vld [vmem:[%s1386_s1 + $0x78] sm:$0xff]   ;;  %v1051_v4 = vld [vmem:[%s1386_s1 + $0x70] sm:$0xff]   ;;  %v1055_v8 = vld [vmem:[%s1386_s1 + $0x68] sm:$0xff]  }
   0x2   :  { %v1048_v1 = vld [vmem:[%s1386_s1 + $0xf8] sm:$0xff]   ;;  %935 = vmatprep.subr.bf16.mxu0 %v1047_v0  ;;  %v1052_v5 = vld [vmem:[%s1386_s1 + $0xf0] sm:$0xff]   ;;  %v1056_v9 = vld [vmem:[%s1386_s1 + $0xe8] sm:$0xff]  }
   0x3   :  { %v1049_v2 = vld [vmem:[%s1386_s1 + $0x38] sm:$0xff]   ;;  %963 = vmatprep.subr.bf16.mxu1 %v1048_v1  ;;  %v1053_v6 = vld [vmem:[%s1386_s1 + $0x30] sm:$0xff]   ;;  %v1057_v10 = vld [vmem:[%s1386_s1 + $0x28] sm:$0xff]  }
   0x4   :  { %v1050_v3 = vld [vmem:[%s1386_s1 + $0xb8] sm:$0xff]   ;;  %936 = vmatpush3.bf16.msra.mxu0 %v1049_v2  ;;  %v1054_v7 = vld [vmem:[%s1386_s1 + $0xb0] sm:$0xff]   ;;  %v1058_v11 = vld [vmem:[%s1386_s1 + $0xa8] sm:$0xff]  }
   0x5   :  { %964 = vmatpush3.bf16.msra.mxu1 %v1050_v3  ;;  %937 = vmatprep.subr.bf16.mxu0 %v1051_v4  ;;  %v1059_v12 = vld [vmem:[%s1386_s1 + $0x60] sm:$0xff]   ;;  %v1063_v16 = vld [vmem:[%s1386_s1 + $0x58] sm:$0xff]   ;;  %v1067_v20 = vld [vmem:[%s1386_s1 + $0x50] sm:$0xff]  }
   0x6   :  { %965 = vmatprep.subr.bf16.mxu1 %v1052_v5  ;;  %v1060_v13 = vld [vmem:[%s1386_s1 + $0xe0] sm:$0xff]   ;;  %v1064_v17 = vld [vmem:[%s1386_s1 + $0xd8] sm:$0xff]   ;;  %v1068_v21 = vld [vmem:[%s1386_s1 + $0xd0] sm:$0xff]  }
   0x7   :  { %v1061_v14 = vld [vmem:[%s1386_s1 + $0x20] sm:$0xff]   ;;  %v1065_v18 = vld [vmem:[%s1386_s1 + $0x18] sm:$0xff]   ;;  %v1069_v22 = vld [vmem:[%s1386_s1 + $0x10] sm:$0xff]  }
   0x8   :  { %938 = vmatpush3.bf16.msra.mxu0 %v1053_v6  ;;  %v1062_v15 = vld [vmem:[%s1386_s1 + $0xa0] sm:$0xff]   ;;  %v1066_v19 = vld [vmem:[%s1386_s1 + $0x98] sm:$0xff]   ;;  %v1070_v23 = vld [vmem:[%s1386_s1 + $0x90] sm:$0xff]  }
   0x9   :  { %966 = vmatpush3.bf16.msra.mxu1 %v1054_v7  ;;  %939 = vmatprep.subr.bf16.mxu0 %v1055_v8  ;;  %v1071_v24 = vld [vmem:[%s1386_s1 + $0x48] sm:$0xff]   ;;  %v1075_v28 = vld [vmem:[%s1386_s1 + $0x40] sm:$0xff]   ;;  %v1079_v40 = vld [vmem:[%s1386_s1 + $0x178] sm:$0xff]  }
   0xa   :  { %967 = vmatprep.subr.bf16.mxu1 %v1056_v9  ;;  %v1072_v25 = vld [vmem:[%s1386_s1 + $0xc8] sm:$0xff]   ;;  %v1076_v29 = vld [vmem:[%s1386_s1 + $0xc0] sm:$0xff]   ;;  %v1080_v41 = vld [vmem:[%s1386_s1 + $0x1f8] sm:$0xff]  }
   0xb   :  { %v1073_v26 = vld [vmem:[%s1386_s1 + $0x8] sm:$0xff]   ;;  %v1077_v30 = vld [vmem:[%s1386_s1] sm:$0xff]   ;;  %v1081_v42 = vld [vmem:[%s1386_s1 + $0x138] sm:$0xff]  }
   0xc   :  { %940 = vmatpush3.bf16.msra.mxu0 %v1057_v10  ;;  %v1074_v27 = vld [vmem:[%s1386_s1 + $0x88] sm:$0xff]   ;;  %v1078_v31 = vld [vmem:[%s1386_s1 + $0x80] sm:$0xff]   ;;  %v1082_v43 = vld [vmem:[%s1386_s1 + $0x1b8] sm:$0xff]  }
   0xd   :  { %968 = vmatpush3.bf16.msra.mxu1 %v1058_v11  ;;  %941 = vmatprep.subr.bf16.mxu0 %v1059_v12  ;;  %v14_v32 = vld [vmem:[%s1387_s0] sm:$0xff]  ;;  %v15_v34 = vld [vmem:[%s1387_s0 + $0x8] sm:$0xff]  ;;  %v1083_v44 = vld [vmem:[%s1386_s1 + $0x170] sm:$0xff]  }
   0xe   :  { %969 = vmatprep.subr.bf16.mxu1 %v1060_v13  ;;  %v18_v33 = vld [vmem:[%s1387_s0 + $0x20] sm:$0xff]  ;;  %v19_v37 = vld [vmem:[%s1387_s0 + $0x28] sm:$0xff]  ;;  %v1084_v45 = vld [vmem:[%s1386_s1 + $0x1f0] sm:$0xff]  }
   0xf   :  { %v855_v35 = vcombine.low %v14_v32, %v18_v33  ;;  %v856_v36 = vcombine.high %v14_v32, %v18_v33  ;;  %v857_v38 = vcombine.low %v15_v34, %v19_v37  ;;  %v858_v39 = vcombine.high %v15_v34, %v19_v37  ;;  %v1085_v46 = vld [vmem:[%s1386_s1 + $0x130] sm:$0xff]   ;;  %v1087_v48 = vld [vmem:[%s1386_s1 + $0x168] sm:$0xff]   ;;  %v1091_v52 = vld [vmem:[%s1386_s1 + $0x160] sm:$0xff]  }
  0x10   :  { %942 = vmatpush3.bf16.msra.mxu0 %v1061_v14  ;;  %v1086_v47 = vld [vmem:[%s1386_s1 + $0x1b0] sm:$0xff]   ;;  %v1088_v49 = vld [vmem:[%s1386_s1 + $0x1e8] sm:$0xff]   ;;  %v1092_v53 = vld [vmem:[%s1386_s1 + $0x1e0] sm:$0xff]  }
  0x11   :  { %970 = vmatpush3.bf16.msra.mxu1 %v1062_v15  ;;  %943 = vmatprep.subr.bf16.mxu0 %v1063_v16  ;;  %v1089_v50 = vld [vmem:[%s1386_s1 + $0x128] sm:$0xff]   ;;  %v1093_v54 = vld [vmem:[%s1386_s1 + $0x120] sm:$0xff]   ;;  %v1095_v56 = vld [vmem:[%s1386_s1 + $0x158] sm:$0xff]  }
  0x12   :  { %971 = vmatprep.subr.bf16.mxu1 %v1064_v17  ;;  %654 = vmatprep.mubr.bf16.mxu0 %v856_v36  ;;  %v1090_v51 = vld [vmem:[%s1386_s1 + $0x1a8] sm:$0xff]   ;;  %v1094_v55 = vld [vmem:[%s1386_s1 + $0x1a0] sm:$0xff]   ;;  %v1096_v57 = vld [vmem:[%s1386_s1 + $0x1d8] sm:$0xff]  }
  0x13   :  { %703 = vmatprep.mubr.bf16.mxu1 %v858_v39  ;;  %v22_v58 = vld [vmem:[%s1387_s0 + $0x40] sm:$0xff]  ;;  %v23_v61 = vld [vmem:[%s1387_s0 + $0x48] sm:$0xff]  ;;  %v1097_v1 = vld [vmem:[%s1386_s1 + $0x118] sm:$0xff]  }
  0x14   :  { %944 = vmatpush3.bf16.msra.mxu0 %v1065_v18  ;;  %v26_v59 = vld [vmem:[%s1387_s0 + $0x60] sm:$0xff]  ;;  %v27_v62 = vld [vmem:[%s1387_s0 + $0x68] sm:$0xff]  ;;  %v1098_v3 = vld [vmem:[%s1386_s1 + $0x198] sm:$0xff]  }
  0x15   :  { %972 = vmatpush3.bf16.msra.mxu1 %v1066_v19  ;;  %945 = vmatprep.subr.bf16.mxu0 %v1067_v20  ;;  %v864_v60 = vcombine.high %v22_v58, %v26_v59  ;;  %v863_v63 = vcombine.low %v22_v58, %v26_v59  ;;  %v866_v0 = vcombine.high %v23_v61, %v27_v62  ;;  %v1099_v4 = vld [vmem:[%s1386_s1 + $0x150] sm:$0xff]   ;;  %v1103_v8 = vld [vmem:[%s1386_s1 + $0x148] sm:$0xff]   ;;  %v1107_v12 = vld [vmem:[%s1386_s1 + $0x140] sm:$0xff]  }
  0x16   :  { %973 = vmatprep.subr.bf16.mxu1 %v1068_v21  ;;  %v865_v2 = vcombine.low %v23_v61, %v27_v62  ;;  %v1100_v5 = vld [vmem:[%s1386_s1 + $0x1d0] sm:$0xff]   ;;  %v1104_v9 = vld [vmem:[%s1386_s1 + $0x1c8] sm:$0xff]   ;;  %v1108_v13 = vld [vmem:[%s1386_s1 + $0x1c0] sm:$0xff]  }
  0x17   :  { %v1101_v6 = vld [vmem:[%s1386_s1 + $0x110] sm:$0xff]   ;;  %v1105_v10 = vld [vmem:[%s1386_s1 + $0x108] sm:$0xff]   ;;  %v1109_v14 = vld [vmem:[%s1386_s1 + $0x100] sm:$0xff]  }
  0x18   :  { %946 = vmatpush3.bf16.msra.mxu0 %v1069_v22  ;;  %v1102_v7 = vld [vmem:[%s1386_s1 + $0x190] sm:$0xff]   ;;  %v1106_v11 = vld [vmem:[%s1386_s1 + $0x188] sm:$0xff]   ;;  %v1110_v15 = vld [vmem:[%s1386_s1 + $0x180] sm:$0xff]  }
  0x19   :  { %974 = vmatpush3.bf16.msra.mxu1 %v1070_v23  ;;  %947 = vmatprep.subr.bf16.mxu0 %v1071_v24  ;;  %v16_v16 = vld [vmem:[%s1387_s0 + $0x10] sm:$0xff]  ;;  %v17_v18 = vld [vmem:[%s1387_s0 + $0x18] sm:$0xff] }
  0x1a   :  { %975 = vmatprep.subr.bf16.mxu1 %v1072_v25  ;;  %v20_v17 = vld [vmem:[%s1387_s0 + $0x30] sm:$0xff]  ;;  %v21_v19 = vld [vmem:[%s1387_s0 + $0x38] sm:$0xff] }
  0x1b   :  { %v859_v20 = vcombine.low %v16_v16, %v20_v17  ;;  %v860_v21 = vcombine.high %v16_v16, %v20_v17  ;;  %v861_v22 = vcombine.low %v17_v18, %v21_v19  ;;  %v862_v23 = vcombine.high %v17_v18, %v21_v19  ;;  %v24_v24 = vld [vmem:[%s1387_s0 + $0x50] sm:$0xff] }
  0x1c   :  { %948 = vmatpush3.bf16.msra.mxu0 %v1073_v26  ;;  %v28_v25 = vld [vmem:[%s1387_s0 + $0x70] sm:$0xff]  ;;  %v25_v26 = vld [vmem:[%s1387_s0 + $0x58] sm:$0xff] }
  0x1d   :  { %976 = vmatpush3.bf16.msra.mxu1 %v1074_v27  ;;  %949 = vmatprep.subr.bf16.mxu0 %v1075_v28  ;;  %v868_v27 = vcombine.high %v24_v24, %v28_v25  ;;  %v29_v28 = vld [vmem:[%s1387_s0 + $0x78] sm:$0xff] }
  0x1e   :  { %977 = vmatprep.subr.bf16.mxu1 %v1076_v29  ;;  %v870_v29 = vcombine.high %v25_v26, %v29_v28 }
  0x20   :  { %950 = vmatpush3.bf16.msra.mxu0 %v1077_v30  ;;  %v867_v30 = vcombine.low %v24_v24, %v28_v25 }
  0x21   :  { %978 = vmatpush3.bf16.msra.mxu1 %v1078_v31  ;;  %991 = vmatprep.subr.bf16.mxu0 %v1079_v40  ;;  %v869_v31 = vcombine.low %v25_v26, %v29_v28 }
  0x22   :  { %1019 = vmatprep.subr.bf16.mxu1 %v1080_v41 }
  0x23   :  { %655 = vmatmul.mubr.bf16.vlgmr.msra.gmra.mxu0 %v855_v35 }
  0x24   :  { %704 = vmatmul.mubr.bf16.vlgmr.msra.gmra.mxu1 %v857_v38  ;;  %992 = vmatpush3.bf16.msra.mxu0 %v1081_v42 }
  0x25   :  { %1020 = vmatpush3.bf16.msra.mxu1 %v1082_v43  ;;  %993 = vmatprep.subr.bf16.mxu0 %v1083_v44 }
  0x26   :  { %1021 = vmatprep.subr.bf16.mxu1 %v1084_v45  ;;  %662 = vmatprep.mubr.bf16.mxu0 %v864_v60 }
  0x27   :  { %711 = vmatprep.mubr.bf16.mxu1 %v866_v0 }
  0x28   :  { %994 = vmatpush3.bf16.msra.mxu0 %v1085_v46 }
  0x29   :  { %1022 = vmatpush3.bf16.msra.mxu1 %v1086_v47  ;;  %995 = vmatprep.subr.bf16.mxu0 %v1087_v48 }
  0x2a   :  { %1023 = vmatprep.subr.bf16.mxu1 %v1088_v49 }
  0x2b   :  { %663 = vmatmul.mubr.bf16.gmra.mxu0 %v863_v63 }
  0x2c   :  { %996 = vmatpush3.bf16.msra.mxu0 %v1089_v50  ;;  %712 = vmatmul.mubr.bf16.gmra.mxu1 %v865_v2 }
  0x2d   :  { %1024 = vmatpush3.bf16.msra.mxu1 %v1090_v51  ;;  %997 = vmatprep.subr.bf16.mxu0 %v1091_v52 }
  0x2e   :  { %1025 = vmatprep.subr.bf16.mxu1 %v1092_v53  ;;  %752 = vmatprep.mubr.bf16.mxu0 %v860_v21 }
  0x2f   :  { %801 = vmatprep.mubr.bf16.mxu1 %v862_v23 }
  0x30   :  { %998 = vmatpush3.bf16.msra.mxu0 %v1093_v54 }
  0x31   :  { %1026 = vmatpush3.bf16.msra.mxu1 %v1094_v55  ;;  %999 = vmatprep.subr.bf16.mxu0 %v1095_v56 }
  0x32   :  { %1027 = vmatprep.subr.bf16.mxu1 %v1096_v57 }
  0x34   :  { %1000 = vmatpush3.bf16.msra.mxu0 %v1097_v1 }
  0x35   :  { %1028 = vmatpush3.bf16.msra.mxu1 %v1098_v3  ;;  %1001 = vmatprep.subr.bf16.mxu0 %v1099_v4 }
  0x36   :  { %1029 = vmatprep.subr.bf16.mxu1 %v1100_v5 }
  0x38   :  { %1002 = vmatpush3.bf16.msra.mxu0 %v1101_v6 }
  0x39   :  { %1030 = vmatpush3.bf16.msra.mxu1 %v1102_v7  ;;  %1003 = vmatprep.subr.bf16.mxu0 %v1103_v8 }
  0x3a   :  { %1031 = vmatprep.subr.bf16.mxu1 %v1104_v9 }
  0x3c   :  { %1004 = vmatpush3.bf16.msra.mxu0 %v1105_v10 }
  0x3d   :  { %1032 = vmatpush3.bf16.msra.mxu1 %v1106_v11  ;;  %1005 = vmatprep.subr.bf16.mxu0 %v1107_v12 }
  0x3e   :  { %1033 = vmatprep.subr.bf16.mxu1 %v1108_v13 }
  0x40   :  { %1006 = vmatpush3.bf16.msra.mxu0 %v1109_v14 }
  0x41   :  { %1034 = vmatpush3.bf16.msra.mxu1 %v1110_v15 }
  0x43   :  { %753 = vmatmul.mubr.bf16.vlgmr.msra.gmra.mxu0 %v859_v20 }
  0x44   :  { %802 = vmatmul.mubr.bf16.vlgmr.msra.gmra.mxu1 %v861_v22  ;;  %760 = vmatprep.mubr.bf16.mxu0 %v868_v27 }
  0x45   :  { %809 = vmatprep.mubr.bf16.mxu1 %v870_v29 }
  0x4b   :  { %761 = vmatmul.mubr.bf16.gmra.mxu0 %v867_v30 }
  0x4c   :  { %810 = vmatmul.mubr.bf16.gmra.mxu1 %v869_v31 }
  0xe3   :  { %v951_v32 = vpop.f32.mrf.mxu0 }
  0xe4   :  { %v979_v33 = vpop.f32.mrf.mxu1 }
  0xe5   :  { %v952_v34 = vpop.f32.mrf.mxu0 }
  0xe6   :  { %v980_v35 = vpop.f32.mrf.mxu1  ;;  %v953_v48 = vadd.f32 %v952_v34, %v951_v32 }
  0xe7   :  { %v954_v36 = vpop.f32.mrf.mxu0  ;;  %v981_v49 = vadd.f32 %v980_v35, %v979_v33 }
  0xe8   :  { %v982_v37 = vpop.f32.mrf.mxu1 }
  0xe9   :  { %v955_v38 = vpop.f32.mrf.mxu0  ;;  %v706_v54 = vadd.f32 %v981_v49, %v953_v48 }
  0xea   :  { %v983_v39 = vpop.f32.mrf.mxu1  ;;  %v956_v55 = vadd.f32 %v955_v38, %v954_v36 }
  0xeb   :  { %v957_v40 = vpop.f32.mrf.mxu0  ;;  %v984_v56 = vadd.f32 %v983_v39, %v982_v37 }
  0xec   :  { %v985_v41 = vpop.f32.mrf.mxu1 }
  0xed   :  { %v958_v42 = vpop.f32.mrf.mxu0  ;;  %v709_v2 = vadd.f32 %v984_v56, %v956_v55 }
  0xee   :  { %v986_v43 = vpop.f32.mrf.mxu1  ;;  %v959_v62 = vadd.f32 %v958_v42, %v957_v40 }
  0xef   :  { %v960_v44 = vpop.f32.mrf.mxu0  ;;  %v987_v63 = vadd.f32 %v986_v43, %v985_v41 }
  0xf0   :  { %v988_v45 = vpop.f32.mrf.mxu1 }
  0xf1   :  { %v961_v46 = vpop.f32.mrf.mxu0  ;;  %v714_v9 = vadd.f32 %v987_v63, %v959_v62 }
  0xf2   :  { %v989_v47 = vpop.f32.mrf.mxu1  ;;  %v962_v12 = vadd.f32 %v961_v46, %v960_v44 }
  0xf3   :  { %v990_v13 = vadd.f32 %v989_v47, %v988_v45 }
  0xf5   :  { %v717_v22 = vadd.f32 %v990_v13, %v962_v12 }
 0x103   :  { %v1007_v50 = vpop.f32.mrf.mxu0 }
 0x104   :  { %v1035_v51 = vpop.f32.mrf.mxu1 }
 0x105   :  { %v1008_v52 = vpop.f32.mrf.mxu0 }
 0x106   :  { %v1036_v53 = vpop.f32.mrf.mxu1  ;;  %v1009_v57 = vadd.f32 %v1008_v52, %v1007_v50 }
 0x107   :  { %v1010_v58 = vpop.f32.mrf.mxu0  ;;  %v1037_v61 = vadd.f32 %v1036_v53, %v1035_v51 }
 0x108   :  { %v1038_v59 = vpop.f32.mrf.mxu1  ;;  %v755_v60 = vadd.f32 %v1009_v57, %v706_v54 }
 0x109   :  { %v1011_v0 = vpop.f32.mrf.mxu0 }
 0x10a   :  { %v1039_v1 = vpop.f32.mrf.mxu1  ;;  %v804_v3 = vadd.f32 %v1037_v61, %v755_v60  ;;  %v1012_v4 = vadd.f32 %v1011_v0, %v1010_v58 }
 0x10b   :  { %v1013_v5 = vpop.f32.mrf.mxu0  ;;  %v1040_v8 = vadd.f32 %v1039_v1, %v1038_v59 }
 0x10c   :  { %v1041_v6 = vpop.f32.mrf.mxu1  ;;  %818 = vst [vmem:[%s1388_s2] sm:$0xff] %v804_v3  ;;  %v758_v7 = vadd.f32 %v1012_v4, %v709_v2  ;;  %v831_v26 = vmul.f32 %v804_v3, %v804_v3 }
 0x10d   :  { %v1014_v10 = vpop.f32.mrf.mxu0 }
 0x10e   :  { %v1042_v11 = vpop.f32.mrf.mxu1  ;;  %v807_v14 = vadd.f32 %v1040_v8, %v758_v7  ;;  %v1015_v15 = vadd.f32 %v1014_v10, %v1013_v5 }
 0x10f   :  { %v1016_v16 = vpop.f32.mrf.mxu0  ;;  %v1043_v19 = vadd.f32 %v1042_v11, %v1041_v6 }
 0x110   :  { %v1044_v17 = vpop.f32.mrf.mxu1  ;;  %819 = vst [vmem:[%s1388_s2 + $0x8] sm:$0xff] %v807_v14  ;;  %v763_v18 = vadd.f32 %v1015_v15, %v714_v9  ;;  %v832_v23 = vmul.f32 %v807_v14, %v807_v14  ;;  %v822_v27 = vadd.f32 %v807_v14, %v804_v3 }
 0x111   :  { %v1017_v20 = vpop.f32.mrf.mxu0 }
 0x112   :  { %v1045_v21 = vpop.f32.mrf.mxu1  ;;  %v812_v24 = vadd.f32 %v1043_v19, %v763_v18  ;;  %v1018_v25 = vadd.f32 %v1017_v20, %v1016_v16  ;;  %v835_v31 = vadd.f32 %v832_v23, %v831_v26 }
 0x113   :  { %v1046_v30 = vadd.f32 %v1045_v21, %v1044_v17 }
 0x114   :  { %820 = vst [vmem:[%s1388_s2 + $0x10] sm:$0xff] %v812_v24  ;;  %v833_v28 = vmul.f32 %v812_v24, %v812_v24  ;;  %v766_v29 = vadd.f32 %v1018_v25, %v717_v22  ;;  %v823_v32 = vadd.f32 %v822_v27, %v812_v24 }
 0x116   :  { %v815_v33 = vadd.f32 %v1046_v30, %v766_v29  ;;  %v836_v34 = vadd.f32 %v835_v31, %v833_v28 }
 0x118   :  { %821 = vst [vmem:[%s1388_s2 + $0x18] sm:$0xff] %v815_v33  ;;  %v824_v35 = vadd.f32 %v823_v32, %v815_v33  ;;  %v834_v36 = vmul.f32 %v815_v33, %v815_v33 }
 0x11a   :  { %v825_v37 = vrot.slane %v824_v35, 4  ;;  %v837_v38 = vadd.f32 %v836_v34, %v834_v36 }
 0x11c   :  { %v826_v39 = vadd.f32 %v825_v37, %v824_v35  ;;  %v838_v40 = vrot.slane %v837_v38, 4 }
 0x11e   :  { %v827_v41 = vrot.slane %v826_v39, 2  ;;  %v839_v42 = vadd.f32 %v838_v40, %v837_v38 }
 0x120   :  { %v828_v43 = vadd.f32 %v827_v41, %v826_v39  ;;  %v840_v44 = vrot.slane %v839_v42, 2 }
 0x122   :  { %v829_v45 = vrot.slane %v828_v43, 1  ;;  %v841_v46 = vadd.f32 %v840_v44, %v839_v42 }
 0x124   :  { %v842_v47 = vrot.slane %v841_v46, 1  ;;  %v830_v48 = vadd.f32 %v829_v45, %v828_v43 }
 0x126   :  { %v843_v49 = vadd.f32 %v842_v47, %v841_v46 }
 0x128   :  { %v845_v50 = vsel %vm844_vm0, %v830_v48, %v843_v49 }
 0x129   :  { %846 = vst [vmem:[%s1389_s3] sm:$0x3] %v845_v50 }

// kernel: generator_forward.24
= control target key start
LH: loop header
LB: loop body
LE: loop exit
PB: predicated region body
PF: predicated region fallthrough
CT: control target
= control target key end

     0   :  { %v32_v0 = vlaneseq  ;;  %s404_s1 = inlined_call_operand.vmem [shape: f32[1,1024], index: 1, kind: input, shape index: {}]   ;;  %s405_s2 = inlined_call_operand.vmem [shape: f32[1,1024], index: 2, kind: input, shape index: {}]   ;;  %s406_s0 = inlined_call_operand.vmem [shape: f32[16,1024], index: 0, kind: input, shape index: {}]   ;;  %s407_s3 = inlined_call_operand.vmem [shape: f32[16,1024], index: 3, kind: output, shape index: {}]  }
   0x1   :  { %v30_v2 = vld [vmem:[%s404_s1] sm:$0xff]  ;;  %v15_v9 = vld [vmem:[%s406_s0 + $0x8] sm:$0xff]  ;;  %v16_v18 = vld [vmem:[%s406_s0 + $0x10] sm:$0xff] }
   0x2   :  { %v234_v1 = vshrl.u32 %v32_v0, 7  ;;  %v242_v3 = vld [vmem:[%s405_s2] sm:$0xff]  ;;  %v17_v19 = vld [vmem:[%s406_s0 + $0x18] sm:$0xff]  ;;  %v19_v29 = vld [vmem:[%s406_s0 + $0x28] sm:$0xff] }
   0x3   :  { %v14_v8 = vld [vmem:[%s406_s0] sm:$0xff]  ;;  %v20_v41 = vld [vmem:[%s406_s0 + $0x30] sm:$0xff]  ;;  %v21_v51 = vld [vmem:[%s406_s0 + $0x38] sm:$0xff] }
   0x4   :  { %v34_v4 = vsub.s32 0, %v234_v1  ;;  %v38_v5 = vsub.s32 1, %v234_v1  ;;  %v42_v6 = vsub.s32 2, %v234_v1  ;;  %v46_v7 = vsub.s32 3, %v234_v1  ;;  %v18_v24 = vld [vmem:[%s406_s0 + $0x20] sm:$0xff]  ;;  %v23_v57 = vld [vmem:[%s406_s0 + $0x48] sm:$0xff] }
   0x5   :  { %v50_v10 = vsub.s32 4, %v234_v1  ;;  %v54_v11 = vsub.s32 5, %v234_v1  ;;  %v58_v12 = vsub.s32 6, %v234_v1  ;;  %v62_v13 = vsub.s32 7, %v234_v1  ;;  %v22_v52 = vld [vmem:[%s406_s0 + $0x40] sm:$0xff]  ;;  %v24_v58 = vld [vmem:[%s406_s0 + $0x50] sm:$0xff] }
   0x6   :  { %v35_v14 = vrot.slane %v30_v2, %v34_v4  ;;  %v259_v15 = vrot.slane %v242_v3, %v34_v4  ;;  %v261_v16 = vrot.slane %v30_v2, %v38_v5  ;;  %v264_v17 = vrot.slane %v242_v3, %v38_v5  ;;  %v25_v1 = vld [vmem:[%s406_s0 + $0x58] sm:$0xff] }
   0x7   :  { %v43_v20 = vrot.slane %v30_v2, %v42_v6  ;;  %v273_v21 = vrot.slane %v242_v3, %v42_v6  ;;  %v275_v22 = vrot.slane %v30_v2, %v46_v7  ;;  %v278_v23 = vrot.slane %v242_v3, %v46_v7 }
   0x8   :  { %v72_v25 = vmul.f32 %v35_v14, %v14_v8  ;;  %v73_v26 = vmul.f32 %v261_v16, %v15_v9  ;;  %v284_v27 = vrot.slane %v30_v2, %v50_v10  ;;  %v287_v28 = vrot.slane %v242_v3, %v50_v10 }
   0x9   :  { %v74_v30 = vmul.f32 %v43_v20, %v16_v18  ;;  %v75_v31 = vmul.f32 %v275_v22, %v17_v19  ;;  %v293_v32 = vrot.slane %v30_v2, %v54_v11  ;;  %v296_v33 = vrot.slane %v242_v3, %v54_v11  ;;  %v27_v18 = vld [vmem:[%s406_s0 + $0x68] sm:$0xff] }
   0xa   :  { %v130_v34 = vadd.f32 %v259_v15, %v72_v25  ;;  %v131_v35 = vadd.f32 %v264_v17, %v73_v26  ;;  %v76_v36 = vmul.f32 %v284_v27, %v18_v24  ;;  %v301_v37 = vrot.slane %v30_v2, %v58_v12  ;;  %v29_v25 = vld [vmem:[%s406_s0 + $0x78] sm:$0xff] }
   0xb   :  { %v132_v38 = vadd.f32 %v273_v21, %v74_v30  ;;  %v133_v39 = vadd.f32 %v278_v23, %v75_v31  ;;  %v77_v40 = vmul.f32 %v293_v32, %v19_v29  ;;  %v310_v42 = vrot.slane %v242_v3, %v58_v12 }
   0xc   :  { %vm146_vm0 = vcmp.ge.f32.partialorder %v130_v34, 0.0  ;;  %v162_v43 = vmul.f32 0.2, %v130_v34  ;;  %vm147_vm1 = vcmp.ge.f32.partialorder %v131_v35, 0.0  ;;  %v163_v44 = vmul.f32 0.2, %v131_v35 }
   0xd   :  { %vm148_vm2 = vcmp.ge.f32.partialorder %v132_v38, 0.0  ;;  %v164_v45 = vmul.f32 0.2, %v132_v38  ;;  %vm149_vm3 = vcmp.ge.f32.partialorder %v133_v39, 0.0  ;;  %v165_v46 = vmul.f32 0.2, %v133_v39 }
   0xe   :  { %v178_v47 = vsel %vm146_vm0, %v130_v34, %v162_v43  ;;  %v179_v48 = vsel %vm147_vm1, %v131_v35, %v163_v44  ;;  %v134_v49 = vadd.f32 %v287_v28, %v76_v36  ;;  %v135_v50 = vadd.f32 %v296_v33, %v77_v40 }
   0xf   :  { %194 = vst [vmem:[%s407_s3] sm:$0xff] %v178_v47  ;;  %195 = vst [vmem:[%s407_s3 + $0x8] sm:$0xff] %v179_v48  ;;  %v180_v53 = vsel %vm148_vm2, %v132_v38, %v164_v45  ;;  %v181_v54 = vsel %vm149_vm3, %v133_v39, %v165_v46  ;;  %v78_v55 = vmul.f32 %v301_v37, %v20_v41 }
  0x10   :  { %v63_v56 = vrot.slane %v30_v2, %v62_v13  ;;  %196 = vst [vmem:[%s407_s3 + $0x10] sm:$0xff] %v180_v53  ;;  %197 = vst [vmem:[%s407_s3 + $0x18] sm:$0xff] %v181_v54  ;;  %vm150_vm4 = vcmp.ge.f32.partialorder %v134_v49, 0.0  ;;  %v166_v59 = vmul.f32 0.2, %v134_v49  ;;  %vm151_vm5 = vcmp.ge.f32.partialorder %v135_v50, 0.0 }
  0x11   :  { %v167_v60 = vmul.f32 0.2, %v135_v50  ;;  %v136_v61 = vadd.f32 %v310_v42, %v78_v55  ;;  %v121_v63 = vrot.slane %v242_v3, %v62_v13  ;;  %v80_v0 = vmul.f32 %v35_v14, %v22_v52  ;;  %v26_v2 = vld [vmem:[%s406_s0 + $0x60] sm:$0xff] }
  0x12   :  { %v79_v62 = vmul.f32 %v63_v56, %v21_v51  ;;  %v182_v4 = vsel %vm150_vm4, %v134_v49, %v166_v59  ;;  %v81_v6 = vmul.f32 %v261_v16, %v23_v57  ;;  %v82_v7 = vmul.f32 %v43_v20, %v24_v58 }
  0x13   :  { %v183_v5 = vsel %vm151_vm5, %v135_v50, %v167_v60  ;;  %198 = vst [vmem:[%s407_s3 + $0x20] sm:$0xff] %v182_v4  ;;  %vm152_vm6 = vcmp.ge.f32.partialorder %v136_v61, 0.0  ;;  %v168_v3 = vmul.f32 0.2, %v136_v61  ;;  %v138_v9 = vadd.f32 %v259_v15, %v80_v0  ;;  %v28_v15 = vld [vmem:[%s406_s0 + $0x70] sm:$0xff] }
  0x14   :  { %199 = vst [vmem:[%s407_s3 + $0x28] sm:$0xff] %v183_v5  ;;  %v137_v8 = vadd.f32 %v121_v63, %v79_v62  ;;  %v139_v10 = vadd.f32 %v264_v17, %v81_v6  ;;  %v140_v11 = vadd.f32 %v273_v21, %v82_v7  ;;  %v83_v12 = vmul.f32 %v275_v22, %v25_v1 }
  0x15   :  { %v84_v13 = vmul.f32 %v284_v27, %v26_v2  ;;  %v184_v14 = vsel %vm152_vm6, %v136_v61, %v168_v3  ;;  %vm154_vm8 = vcmp.ge.f32.partialorder %v138_v9, 0.0  ;;  %v170_v17 = vmul.f32 0.2, %v138_v9 }
  0x16   :  { %vm153_vm7 = vcmp.ge.f32.partialorder %v137_v8, 0.0  ;;  %v169_v16 = vmul.f32 0.2, %v137_v8  ;;  %200 = vst [vmem:[%s407_s3 + $0x30] sm:$0xff] %v184_v14  ;;  %vm155_vm9 = vcmp.ge.f32.partialorder %v139_v10, 0.0  ;;  %vm156_vm10 = vcmp.ge.f32.partialorder %v140_v11, 0.0 }
  0x17   :  { %v171_v19 = vmul.f32 0.2, %v139_v10  ;;  %v172_v21 = vmul.f32 0.2, %v140_v11  ;;  %v141_v22 = vadd.f32 %v278_v23, %v83_v12  ;;  %v142_v24 = vadd.f32 %v287_v28, %v84_v13 }
  0x18   :  { %v185_v20 = vsel %vm153_vm7, %v137_v8, %v169_v16  ;;  %v186_v26 = vsel %vm154_vm8, %v138_v9, %v170_v17  ;;  %v85_v29 = vmul.f32 %v293_v32, %v27_v18  ;;  %v86_v30 = vmul.f32 %v301_v37, %v28_v15 }
  0x19   :  { %201 = vst [vmem:[%s407_s3 + $0x38] sm:$0xff] %v185_v20  ;;  %v187_v27 = vsel %vm155_vm9, %v139_v10, %v171_v19  ;;  %202 = vst [vmem:[%s407_s3 + $0x40] sm:$0xff] %v186_v26  ;;  %v188_v23 = vsel %vm156_vm10, %v140_v11, %v172_v21  ;;  %vm157_vm11 = vcmp.ge.f32.partialorder %v141_v22, 0.0  ;;  %v173_v28 = vmul.f32 0.2, %v141_v22 }
  0x1a   :  { %203 = vst [vmem:[%s407_s3 + $0x48] sm:$0xff] %v187_v27  ;;  %vm158_vm12 = vcmp.ge.f32.partialorder %v142_v24, 0.0  ;;  %204 = vst [vmem:[%s407_s3 + $0x50] sm:$0xff] %v188_v23  ;;  %v174_v31 = vmul.f32 0.2, %v142_v24  ;;  %v143_v32 = vadd.f32 %v296_v33, %v85_v29  ;;  %v144_v34 = vadd.f32 %v310_v42, %v86_v30 }
  0x1b   :  { %v87_v35 = vmul.f32 %v63_v56, %v29_v25  ;;  %v189_v36 = vsel %vm157_vm11, %v141_v22, %v173_v28 }
  0x1c   :  { %205 = vst [vmem:[%s407_s3 + $0x58] sm:$0xff] %v189_v36  ;;  %v190_v37 = vsel %vm158_vm12, %v142_v24, %v174_v31  ;;  %vm159_vm13 = vcmp.ge.f32.partialorder %v143_v32, 0.0  ;;  %v175_v38 = vmul.f32 0.2, %v143_v32  ;;  %vm160_vm14 = vcmp.ge.f32.partialorder %v144_v34, 0.0 }
  0x1d   :  { %206 = vst [vmem:[%s407_s3 + $0x60] sm:$0xff] %v190_v37  ;;  %v176_v39 = vmul.f32 0.2, %v144_v34  ;;  %v145_v40 = vadd.f32 %v121_v63, %v87_v35 }
  0x1e   :  { %v191_v41 = vsel %vm159_vm13, %v143_v32, %v175_v38 }
  0x1f   :  { %207 = vst [vmem:[%s407_s3 + $0x68] sm:$0xff] %v191_v41  ;;  %v192_v33 = vsel %vm160_vm14, %v144_v34, %v176_v39  ;;  %vm161_vm15 = vcmp.ge.f32.partialorder %v145_v40, 0.0  ;;  %v177_v42 = vmul.f32 0.2, %v145_v40 }
  0x20   :  { %208 = vst [vmem:[%s407_s3 + $0x70] sm:$0xff] %v192_v33 }
  0x21   :  { %v193_v43 = vsel %vm161_vm15, %v145_v40, %v177_v42 }
  0x22   :  { %209 = vst [vmem:[%s407_s3 + $0x78] sm:$0xff] %v193_v43 }

// kernel: tile.63
= control target key start
LH: loop header
LB: loop body
LE: loop exit
PB: predicated region body
PF: predicated region fallthrough
CT: control target
= control target key end

     0   :  { %s28_s0 = inlined_call_operand.vmem [shape: f32[64], index: 0, kind: input, shape index: {}]   ;;  %s29_s1 = inlined_call_operand.vmem [shape: f32[16,64], index: 1, kind: output, shape index: {}]  }
   0x1   :  { %v4_v0 = vld [vmem:[%s28_s0] ss:$0 sm:$0xff] }
   0x2   :  { %5 = vst [vmem:[%s29_s1] sm:$0xff] %v4_v0  ;;  %8 = vst [vmem:[%s29_s1 + $0x8] sm:$0xff] %v4_v0 }

// kernel: tile.64
= control target key start
LH: loop header
LB: loop body
LE: loop exit
PB: predicated region body
PF: predicated region fallthrough
CT: control target
= control target key end

     0   :  { %vm3_vm0 = vcmask 523264   ;;  %vm10_vm1 = vcmask 1048064   ;;  %s125_s0 = inlined_call_operand.vmem [shape: f32[16,64], index: 0, kind: input, shape index: {}]   ;;  %s126_s1 = inlined_call_operand.vmem [shape: f32[1,1024], index: 1, kind: output, shape index: {}]  }
   0x1   :  { %v75_v0 = vld [vmem:[%s125_s0 + $0x1] ss:$2 sm:$0xff]   ;;  %v2_v1 = vld [vmem:[%s125_s0] ss:$2 sm:$0xff]   ;;  %s84_s0 = smov 64  }
   0x2   :  { %8 = vrot.lane.b32.xlu0 %v75_v0, %s84_s0  ;;  %4 = vst.msk [vmem:[#allocation0] ss:$8 sm:$0xf] %vm3_vm0, %v2_v1   ;;  %5 = vst.msk [vmem:[#allocation0] ss:$8 sm:$0xf0] %vm3_vm0, %v2_v1  }
  0x74   :  { %v9_v2 = vpop.permute.xlu0 %8  }
  0x75   :  { %11 = vst.msk [vmem:[#allocation0] ss:$8 sm:$0xf] %vm10_vm1, %v9_v2   ;;  %12 = vst.msk [vmem:[#allocation0] ss:$8 sm:$0xf0] %vm10_vm1, %v9_v2  }
  0x7c   :  { %v17_v3 = vld [vmem:[#allocation0] sm:$0x1]  ;;  %v22_v4 = vld [vmem:[#allocation0 + $0x8] sm:$0x1]  ;;  %v28_v5 = vld [vmem:[#allocation0 + $0x10] sm:$0x1] }
  0x7d   :  { %20 = vst [vmem:[%s126_s1] sm:$0x1] %v17_v3  ;;  %76 = vst [vmem:[%s126_s1 + $0x1] sm:$0x1] %v22_v4  ;;  %v35_v6 = vld [vmem:[#allocation0 + $0x18] sm:$0x1] }
  0x7e   :  { %77 = vst [vmem:[%s126_s1 + $0x2] sm:$0x1] %v28_v5  ;;  %v42_v7 = vld [vmem:[#allocation0 + $0x20] sm:$0x1]  ;;  %v49_v8 = vld [vmem:[#allocation0 + $0x28] sm:$0x1] }
  0x7f   :  { %78 = vst [vmem:[%s126_s1 + $0x3] sm:$0x1] %v35_v6  ;;  %79 = vst [vmem:[%s126_s1 + $0x4] sm:$0x1] %v42_v7  ;;  %v56_v9 = vld [vmem:[#allocation0 + $0x30] sm:$0x1] }
  0x80   :  { %80 = vst [vmem:[%s126_s1 + $0x5] sm:$0x1] %v49_v8  ;;  %v63_v10 = vld [vmem:[#allocation0 + $0x38] sm:$0x1]  ;;  %81 = vst [vmem:[%s126_s1 + $0x6] sm:$0x1] %v56_v9 }
  0x81   :  { %82 = vst [vmem:[%s126_s1 + $0x7] sm:$0x1] %v63_v10 }

// kernel: generator_forward.28
= control target key start
LH: loop header
LB: loop body
LE: loop exit
PB: predicated region body
PF: predicated region fallthrough
CT: control target
= control target key end

     0   :  { %vm656_vm0 = vcmask 523264   ;;  %vm763_vm1 = vcmask 1040384   ;;  %vm765_vm2 = vcmask 517120   ;;  %s1370_s1 = inlined_call_operand.vmem [shape: bf16[512,64], index: 1, kind: input, shape index: {}]   ;;  %s1371_s0 = inlined_call_operand.vmem [shape: bf16[128,512], index: 0, kind: input, shape index: {}]   ;;  %s1372_s2 = inlined_call_operand.vmem [shape: f32[128,64], index: 2, kind: output, shape index: {0}]   ;;  %s1373_s3 = inlined_call_operand.vmem [shape: f32[1,2,64], index: 3, kind: output, shape index: {1}]  }
   0x1   :  { %v967_v0 = vld [vmem:[%s1370_s1 + $0x78] sm:$0xff]   ;;  %v971_v4 = vld [vmem:[%s1370_s1 + $0x70] sm:$0xff]   ;;  %v975_v8 = vld [vmem:[%s1370_s1 + $0x68] sm:$0xff]  }
   0x2   :  { %v968_v1 = vld [vmem:[%s1370_s1 + $0xf8] sm:$0xff]   ;;  %839 = vmatprep.subr.bf16.mxu0 %v967_v0  ;;  %v972_v5 = vld [vmem:[%s1370_s1 + $0xf0] sm:$0xff]   ;;  %v976_v9 = vld [vmem:[%s1370_s1 + $0xe8] sm:$0xff]  }
   0x3   :  { %v969_v2 = vld [vmem:[%s1370_s1 + $0x38] sm:$0xff]   ;;  %903 = vmatprep.subr.bf16.mxu1 %v968_v1  ;;  %v973_v6 = vld [vmem:[%s1370_s1 + $0x30] sm:$0xff]   ;;  %v977_v10 = vld [vmem:[%s1370_s1 + $0x28] sm:$0xff]  }
   0x4   :  { %v970_v3 = vld [vmem:[%s1370_s1 + $0xb8] sm:$0xff]   ;;  %840 = vmatpush3.bf16.msra.mxu0 %v969_v2  ;;  %v974_v7 = vld [vmem:[%s1370_s1 + $0xb0] sm:$0xff]   ;;  %v978_v11 = vld [vmem:[%s1370_s1 + $0xa8] sm:$0xff]  }
   0x5   :  { %904 = vmatpush3.bf16.msra.mxu1 %v970_v3  ;;  %841 = vmatprep.subr.bf16.mxu0 %v971_v4  ;;  %v979_v12 = vld [vmem:[%s1370_s1 + $0x60] sm:$0xff]   ;;  %v983_v16 = vld [vmem:[%s1370_s1 + $0x58] sm:$0xff]   ;;  %v987_v20 = vld [vmem:[%s1370_s1 + $0x50] sm:$0xff]  }
   0x6   :  { %905 = vmatprep.subr.bf16.mxu1 %v972_v5  ;;  %v980_v13 = vld [vmem:[%s1370_s1 + $0xe0] sm:$0xff]   ;;  %v984_v17 = vld [vmem:[%s1370_s1 + $0xd8] sm:$0xff]   ;;  %v988_v21 = vld [vmem:[%s1370_s1 + $0xd0] sm:$0xff]  }
   0x7   :  { %v981_v14 = vld [vmem:[%s1370_s1 + $0x20] sm:$0xff]   ;;  %v985_v18 = vld [vmem:[%s1370_s1 + $0x18] sm:$0xff]   ;;  %v989_v22 = vld [vmem:[%s1370_s1 + $0x10] sm:$0xff]  }
   0x8   :  { %842 = vmatpush3.bf16.msra.mxu0 %v973_v6  ;;  %v982_v15 = vld [vmem:[%s1370_s1 + $0xa0] sm:$0xff]   ;;  %v986_v19 = vld [vmem:[%s1370_s1 + $0x98] sm:$0xff]   ;;  %v990_v23 = vld [vmem:[%s1370_s1 + $0x90] sm:$0xff]  }
   0x9   :  { %906 = vmatpush3.bf16.msra.mxu1 %v974_v7  ;;  %843 = vmatprep.subr.bf16.mxu0 %v975_v8  ;;  %v991_v24 = vld [vmem:[%s1370_s1 + $0x48] sm:$0xff]   ;;  %v995_v28 = vld [vmem:[%s1370_s1 + $0x40] sm:$0xff]  }
   0xa   :  { %907 = vmatprep.subr.bf16.mxu1 %v976_v9  ;;  %v992_v25 = vld [vmem:[%s1370_s1 + $0xc8] sm:$0xff]   ;;  %v996_v29 = vld [vmem:[%s1370_s1 + $0xc0] sm:$0xff]  }
   0xb   :  { %v993_v26 = vld [vmem:[%s1370_s1 + $0x8] sm:$0xff]   ;;  %v997_v30 = vld [vmem:[%s1370_s1] sm:$0xff]  }
   0xc   :  { %844 = vmatpush3.bf16.msra.mxu0 %v977_v10  ;;  %v994_v27 = vld [vmem:[%s1370_s1 + $0x88] sm:$0xff]   ;;  %v998_v31 = vld [vmem:[%s1370_s1 + $0x80] sm:$0xff]  }
   0xd   :  { %908 = vmatpush3.bf16.msra.mxu1 %v978_v11  ;;  %845 = vmatprep.subr.bf16.mxu0 %v979_v12  ;;  %v999_v32 = vld [vmem:[%s1371_s0] ss:$16 sps:$4 sm:$0xff]   ;;  %v1001_v33 = vld [vmem:[%s1371_s0 + $0x4] ss:$16 sps:$4 sm:$0xff]   ;;  %v1002_v34 = vld [vmem:[%s1371_s0 + $0x8] ss:$16 sps:$4 sm:$0xff]  }
   0xe   :  { %909 = vmatprep.subr.bf16.mxu1 %v980_v13  ;;  %v1004_v35 = vld [vmem:[%s1371_s0 + $0xc] ss:$16 sps:$4 sm:$0xff]   ;;  %494 = vmatprep.mubr.bf16.mxu0 %v1001_v33  ;;  %v1005_v36 = vld [vmem:[%s1371_s0 + $0x24] ss:$16 sps:$4 sm:$0xff]   ;;  %v1009_v38 = vld [vmem:[%s1371_s0 + $0x20] ss:$16 sps:$4 sm:$0xff]  }
   0xf   :  { %591 = vmatprep.mubr.bf16.mxu1 %v1004_v35  ;;  %v1007_v37 = vld [vmem:[%s1371_s0 + $0x2c] ss:$16 sps:$4 sm:$0xff]   ;;  %v1010_v39 = vld [vmem:[%s1371_s0 + $0x28] ss:$16 sps:$4 sm:$0xff]   ;;  %v1011_v40 = vld [vmem:[%s1371_s0 + $0x44] ss:$16 sps:$4 sm:$0xff]  }
  0x10   :  { %846 = vmatpush3.bf16.msra.mxu0 %v981_v14  ;;  %v1013_v41 = vld [vmem:[%s1371_s0 + $0x4c] ss:$16 sps:$4 sm:$0xff]   ;;  %v1015_v42 = vld [vmem:[%s1371_s0 + $0x40] ss:$16 sps:$4 sm:$0xff]   ;;  %v1016_v43 = vld [vmem:[%s1371_s0 + $0x48] ss:$16 sps:$4 sm:$0xff]  }
  0x11   :  { %910 = vmatpush3.bf16.msra.mxu1 %v982_v15  ;;  %847 = vmatprep.subr.bf16.mxu0 %v983_v16  ;;  %v1017_v44 = vld [vmem:[%s1371_s0 + $0x64] ss:$16 sps:$4 sm:$0xff]   ;;  %v1019_v45 = vld [vmem:[%s1371_s0 + $0x6c] ss:$16 sps:$4 sm:$0xff]   ;;  %v1021_v46 = vld [vmem:[%s1371_s0 + $0x60] ss:$16 sps:$4 sm:$0xff]  }
  0x12   :  { %911 = vmatprep.subr.bf16.mxu1 %v984_v17  ;;  %v1022_v47 = vld [vmem:[%s1371_s0 + $0x68] ss:$16 sps:$4 sm:$0xff]   ;;  %v1023_v48 = vld [vmem:[%s1371_s0 + $0x84] ss:$16 sps:$4 sm:$0xff]   ;;  %v1025_v49 = vld [vmem:[%s1371_s0 + $0x8c] ss:$16 sps:$4 sm:$0xff]  }
  0x13   :  { %v1027_v50 = vld [vmem:[%s1371_s0 + $0x80] ss:$16 sps:$4 sm:$0xff]   ;;  %v1028_v51 = vld [vmem:[%s1371_s0 + $0x88] ss:$16 sps:$4 sm:$0xff]   ;;  %v1029_v52 = vld [vmem:[%s1371_s0 + $0xa4] ss:$16 sps:$4 sm:$0xff]  }
  0x14   :  { %848 = vmatpush3.bf16.msra.mxu0 %v985_v18  ;;  %v1031_v53 = vld [vmem:[%s1371_s0 + $0xac] ss:$16 sps:$4 sm:$0xff]   ;;  %v1033_v54 = vld [vmem:[%s1371_s0 + $0xa0] ss:$16 sps:$4 sm:$0xff]   ;;  %v1034_v55 = vld [vmem:[%s1371_s0 + $0xa8] ss:$16 sps:$4 sm:$0xff]  }
  0x15   :  { %912 = vmatpush3.bf16.msra.mxu1 %v986_v19  ;;  %849 = vmatprep.subr.bf16.mxu0 %v987_v20  ;;  %v1035_v56 = vld [vmem:[%s1371_s0 + $0xc4] ss:$16 sps:$4 sm:$0xff]   ;;  %v1037_v57 = vld [vmem:[%s1371_s0 + $0xcc] ss:$16 sps:$4 sm:$0xff]   ;;  %v1039_v58 = vld [vmem:[%s1371_s0 + $0xc0] ss:$16 sps:$4 sm:$0xff]  }
  0x16   :  { %913 = vmatprep.subr.bf16.mxu1 %v988_v21  ;;  %v1040_v59 = vld [vmem:[%s1371_s0 + $0xc8] ss:$16 sps:$4 sm:$0xff]   ;;  %v1041_v60 = vld [vmem:[%s1371_s0 + $0xe4] ss:$16 sps:$4 sm:$0xff]   ;;  %v1043_v61 = vld [vmem:[%s1371_s0 + $0xec] ss:$16 sps:$4 sm:$0xff]  }
  0x17   :  { %v1045_v62 = vld [vmem:[%s1371_s0 + $0xe0] ss:$16 sps:$4 sm:$0xff]   ;;  %v1046_v63 = vld [vmem:[%s1371_s0 + $0xe8] ss:$16 sps:$4 sm:$0xff]  }
  0x18   :  { %850 = vmatpush3.bf16.msra.mxu0 %v989_v22 }
  0x19   :  { %914 = vmatpush3.bf16.msra.mxu1 %v990_v23  ;;  %851 = vmatprep.subr.bf16.mxu0 %v991_v24 }
  0x1a   :  { %915 = vmatprep.subr.bf16.mxu1 %v992_v25 }
  0x1c   :  { %852 = vmatpush3.bf16.msra.mxu0 %v993_v26 }
  0x1d   :  { %916 = vmatpush3.bf16.msra.mxu1 %v994_v27  ;;  %853 = vmatprep.subr.bf16.mxu0 %v995_v28 }
  0x1e   :  { %917 = vmatprep.subr.bf16.mxu1 %v996_v29 }
  0x20   :  { %854 = vmatpush3.bf16.msra.mxu0 %v997_v30 }
  0x21   :  { %918 = vmatpush3.bf16.msra.mxu1 %v998_v31 }
  0x23   :  { %495 = vmatmul.mubr.bf16.vlgmr.msra.gmra.mxu0 %v999_v32 }
  0x24   :  { %592 = vmatmul.mubr.bf16.vlgmr.msra.gmra.mxu1 %v1002_v34  ;;  %502 = vmatprep.mubr.bf16.mxu0 %v1005_v36 }
  0x25   :  { %599 = vmatprep.mubr.bf16.mxu1 %v1007_v37 }
  0x2b   :  { %503 = vmatmul.mubr.bf16.gmra.mxu0 %v1009_v38 }
  0x2c   :  { %600 = vmatmul.mubr.bf16.gmra.mxu1 %v1010_v39  ;;  %510 = vmatprep.mubr.bf16.mxu0 %v1011_v40 }
  0x2d   :  { %607 = vmatprep.mubr.bf16.mxu1 %v1013_v41 }
  0x33   :  { %511 = vmatmul.mubr.bf16.gmra.mxu0 %v1015_v42 }
  0x34   :  { %608 = vmatmul.mubr.bf16.gmra.mxu1 %v1016_v43  ;;  %518 = vmatprep.mubr.bf16.mxu0 %v1017_v44 }
  0x35   :  { %615 = vmatprep.mubr.bf16.mxu1 %v1019_v45 }
  0x3b   :  { %519 = vmatmul.mubr.bf16.gmra.mxu0 %v1021_v46 }
  0x3c   :  { %616 = vmatmul.mubr.bf16.gmra.mxu1 %v1022_v47  ;;  %526 = vmatprep.mubr.bf16.mxu0 %v1023_v48 }
  0x3d   :  { %623 = vmatprep.mubr.bf16.mxu1 %v1025_v49 }
  0x43   :  { %527 = vmatmul.mubr.bf16.gmra.mxu0 %v1027_v50 }
  0x44   :  { %624 = vmatmul.mubr.bf16.gmra.mxu1 %v1028_v51  ;;  %534 = vmatprep.mubr.bf16.mxu0 %v1029_v52 }
  0x45   :  { %631 = vmatprep.mubr.bf16.mxu1 %v1031_v53 }
  0x4b   :  { %535 = vmatmul.mubr.bf16.gmra.mxu0 %v1033_v54 }
  0x4c   :  { %632 = vmatmul.mubr.bf16.gmra.mxu1 %v1034_v55  ;;  %542 = vmatprep.mubr.bf16.mxu0 %v1035_v56 }
  0x4d   :  { %639 = vmatprep.mubr.bf16.mxu1 %v1037_v57 }
  0x53   :  { %543 = vmatmul.mubr.bf16.gmra.mxu0 %v1039_v58 }
  0x54   :  { %640 = vmatmul.mubr.bf16.gmra.mxu1 %v1040_v59  ;;  %550 = vmatprep.mubr.bf16.mxu0 %v1041_v60 }
  0x55   :  { %647 = vmatprep.mubr.bf16.mxu1 %v1043_v61 }
  0x5b   :  { %551 = vmatmul.mubr.bf16.gmra.mxu0 %v1045_v62 }
  0x5c   :  { %648 = vmatmul.mubr.bf16.gmra.mxu1 %v1046_v63 }
  0xe3   :  { %v855_v0 = vpop.f32.mrf.mxu0 }
  0xe4   :  { %v919_v1 = vpop.f32.mrf.mxu1 }
  0xe5   :  { %v856_v2 = vpop.f32.mrf.mxu0 }
  0xe6   :  { %v857_v3 = vadd.f32 %v856_v2, %v855_v0  ;;  %v920_v4 = vpop.f32.mrf.mxu1 }
  0xe7   :  { %v921_v5 = vadd.f32 %v920_v4, %v919_v1  ;;  %v858_v6 = vpop.f32.mrf.mxu0 }
  0xe8   :  { %v922_v7 = vpop.f32.mrf.mxu1 }
  0xe9   :  { %v1259_v8 = vadd.f32 %v921_v5, %v857_v3  ;;  %v859_v9 = vpop.f32.mrf.mxu0 }
  0xea   :  { %v860_v10 = vadd.f32 %v859_v9, %v858_v6  ;;  %v923_v11 = vpop.f32.mrf.mxu1 }
  0xeb   :  { %657 = vst.msk [vmem:[%s1372_s2] sm:$0xff] %vm656_vm0, %v1259_v8  ;;  %v924_v12 = vadd.f32 %v923_v11, %v922_v7  ;;  %v861_v13 = vpop.f32.mrf.mxu0  ;;  %v710_v0 = vmul.f32 %v1259_v8, %v1259_v8  ;;  %v673_v6 = vsel %vm656_vm0, %v1259_v8, 0.0 }
  0xec   :  { %v925_v14 = vpop.f32.mrf.mxu1 }
  0xed   :  { %v597_v15 = vadd.f32 %v924_v12, %v860_v10  ;;  %v862_v16 = vpop.f32.mrf.mxu0 }
  0xee   :  { %v863_v17 = vadd.f32 %v862_v16, %v861_v13  ;;  %v926_v18 = vpop.f32.mrf.mxu1 }
  0xef   :  { %658 = vst.msk [vmem:[%s1372_s2 + $0x8] sm:$0xff] %vm656_vm0, %v597_v15  ;;  %v927_v19 = vadd.f32 %v926_v18, %v925_v14  ;;  %v864_v20 = vpop.f32.mrf.mxu0  ;;  %v711_v61 = vmul.f32 %v597_v15, %v597_v15  ;;  %v674_v2 = vsel %vm656_vm0, %v597_v15, 0.0  ;;  %v726_v15 = vsel %vm656_vm0, %v710_v0, 0.0 }
  0xf0   :  { %v928_v21 = vpop.f32.mrf.mxu1  ;;  %v675_v16 = vadd.f32 %v674_v2, %v673_v6 }
  0xf1   :  { %v602_v22 = vadd.f32 %v927_v19, %v863_v17  ;;  %v865_v23 = vpop.f32.mrf.mxu0  ;;  %v727_v10 = vsel %vm656_vm0, %v711_v61, 0.0 }
  0xf2   :  { %v866_v24 = vadd.f32 %v865_v23, %v864_v20  ;;  %v929_v25 = vpop.f32.mrf.mxu1 }
  0xf3   :  { %659 = vst.msk [vmem:[%s1372_s2 + $0x10] sm:$0xff] %vm656_vm0, %v602_v22  ;;  %v930_v26 = vadd.f32 %v929_v25, %v928_v21  ;;  %v867_v27 = vpop.f32.mrf.mxu0  ;;  %v712_v3 = vmul.f32 %v602_v22, %v602_v22  ;;  %v676_v11 = vsel %vm656_vm0, %v602_v22, 0.0  ;;  %v728_v22 = vadd.f32 %v727_v10, %v726_v15 }
  0xf4   :  { %v931_v28 = vpop.f32.mrf.mxu1  ;;  %v677_v23 = vadd.f32 %v676_v11, %v675_v16 }
  0xf5   :  { %v605_v29 = vadd.f32 %v930_v26, %v866_v24  ;;  %v868_v30 = vpop.f32.mrf.mxu0  ;;  %v729_v8 = vsel %vm656_vm0, %v712_v3, 0.0 }
  0xf6   :  { %v869_v31 = vadd.f32 %v868_v30, %v867_v27  ;;  %v932_v32 = vpop.f32.mrf.mxu1 }
  0xf7   :  { %660 = vst.msk [vmem:[%s1372_s2 + $0x18] sm:$0xff] %vm656_vm0, %v605_v29  ;;  %v933_v33 = vadd.f32 %v932_v32, %v931_v28  ;;  %v870_v34 = vpop.f32.mrf.mxu0  ;;  %v713_v12 = vmul.f32 %v605_v29, %v605_v29  ;;  %v678_v18 = vsel %vm656_vm0, %v605_v29, 0.0  ;;  %v730_v29 = vadd.f32 %v729_v8, %v728_v22 }
  0xf8   :  { %v934_v35 = vpop.f32.mrf.mxu1  ;;  %v679_v32 = vadd.f32 %v678_v18, %v677_v23 }
  0xf9   :  { %v610_v36 = vadd.f32 %v933_v33, %v869_v31  ;;  %v871_v37 = vpop.f32.mrf.mxu0  ;;  %v731_v26 = vsel %vm656_vm0, %v713_v12, 0.0 }
  0xfa   :  { %v872_v38 = vadd.f32 %v871_v37, %v870_v34  ;;  %v935_v39 = vpop.f32.mrf.mxu1 }
  0xfb   :  { %661 = vst.msk [vmem:[%s1372_s2 + $0x20] sm:$0xff] %vm656_vm0, %v610_v36  ;;  %v936_v40 = vadd.f32 %v935_v39, %v934_v35  ;;  %v873_v41 = vpop.f32.mrf.mxu0  ;;  %v714_v19 = vmul.f32 %v610_v36, %v610_v36  ;;  %v680_v27 = vsel %vm656_vm0, %v610_v36, 0.0 }
  0xfc   :  { %v937_v42 = vpop.f32.mrf.mxu1  ;;  %v681_v36 = vadd.f32 %v680_v27, %v679_v32 }
  0xfd   :  { %v613_v43 = vadd.f32 %v936_v40, %v872_v38  ;;  %v874_v44 = vpop.f32.mrf.mxu0  ;;  %v733_v34 = vsel %vm656_vm0, %v714_v19, 0.0  ;;  %v732_v40 = vadd.f32 %v731_v26, %v730_v29 }
  0xfe   :  { %v875_v45 = vadd.f32 %v874_v44, %v873_v41  ;;  %v938_v46 = vpop.f32.mrf.mxu1 }
  0xff   :  { %662 = vst.msk [vmem:[%s1372_s2 + $0x28] sm:$0xff] %vm656_vm0, %v613_v43  ;;  %v939_v47 = vadd.f32 %v938_v46, %v937_v42  ;;  %v876_v48 = vpop.f32.mrf.mxu0  ;;  %v715_v28 = vmul.f32 %v613_v43, %v613_v43  ;;  %v682_v35 = vsel %vm656_vm0, %v613_v43, 0.0 }
 0x100   :  { %v940_v49 = vpop.f32.mrf.mxu1 }
 0x101   :  { %v618_v50 = vadd.f32 %v939_v47, %v875_v45  ;;  %v877_v51 = vpop.f32.mrf.mxu0  ;;  %v735_v44 = vsel %vm656_vm0, %v715_v28, 0.0 }
 0x102   :  { %v878_v52 = vadd.f32 %v877_v51, %v876_v48  ;;  %v941_v53 = vpop.f32.mrf.mxu1  ;;  %v734_v48 = vadd.f32 %v733_v34, %v732_v40 }
 0x103   :  { %663 = vst.msk [vmem:[%s1372_s2 + $0x30] sm:$0xff] %vm656_vm0, %v618_v50  ;;  %v942_v54 = vadd.f32 %v941_v53, %v940_v49  ;;  %v879_v55 = vpop.f32.mrf.mxu0  ;;  %v716_v37 = vmul.f32 %v618_v50, %v618_v50  ;;  %v684_v45 = vsel %vm656_vm0, %v618_v50, 0.0  ;;  %v683_v49 = vadd.f32 %v682_v35, %v681_v36 }
 0x104   :  { %v943_v56 = vpop.f32.mrf.mxu1 }
 0x105   :  { %v1290_v57 = vadd.f32 %v942_v54, %v878_v52  ;;  %v880_v58 = vpop.f32.mrf.mxu0  ;;  %v737_v52 = vsel %vm656_vm0, %v716_v37, 0.0 }
 0x106   :  { %v881_v59 = vadd.f32 %v880_v58, %v879_v55  ;;  %v944_v60 = vpop.f32.mrf.mxu1  ;;  %v685_v58 = vadd.f32 %v684_v45, %v683_v49 }
 0x107   :  { %664 = vst.msk [vmem:[%s1372_s2 + $0x38] sm:$0xff] %vm656_vm0, %v1290_v57  ;;  %v945_v62 = vadd.f32 %v944_v60, %v943_v56  ;;  %v882_v63 = vpop.f32.mrf.mxu0  ;;  %v717_v46 = vmul.f32 %v1290_v57, %v1290_v57  ;;  %v686_v53 = vsel %vm656_vm0, %v1290_v57, 0.0  ;;  %v736_v56 = vadd.f32 %v735_v44, %v734_v48 }
 0x108   :  { %v946_v1 = vpop.f32.mrf.mxu1  ;;  %v687_v2 = vadd.f32 %v686_v53, %v685_v58 }
 0x109   :  { %v626_v4 = vadd.f32 %v945_v62, %v881_v59  ;;  %v883_v5 = vpop.f32.mrf.mxu0  ;;  %v739_v61 = vsel %vm656_vm0, %v717_v46, 0.0  ;;  %v738_v57 = vadd.f32 %v737_v52, %v736_v56 }
 0x10a   :  { %v884_v7 = vadd.f32 %v883_v5, %v882_v63  ;;  %v947_v9 = vpop.f32.mrf.mxu1 }
 0x10b   :  { %665 = vst.msk [vmem:[%s1372_s2 + $0x40] sm:$0xff] %vm656_vm0, %v626_v4  ;;  %v948_v13 = vadd.f32 %v947_v9, %v946_v1  ;;  %v885_v14 = vpop.f32.mrf.mxu0  ;;  %v718_v54 = vmul.f32 %v626_v4, %v626_v4  ;;  %v688_v62 = vsel %vm656_vm0, %v626_v4, 0.0  ;;  %v740_v11 = vadd.f32 %v739_v61, %v738_v57 }
 0x10c   :  { %v949_v17 = vpop.f32.mrf.mxu1  ;;  %v689_v4 = vadd.f32 %v688_v62, %v687_v2 }
 0x10d   :  { %v629_v20 = vadd.f32 %v948_v13, %v884_v7  ;;  %v886_v21 = vpop.f32.mrf.mxu0  ;;  %v741_v5 = vsel %vm656_vm0, %v718_v54, 0.0 }
 0x10e   :  { %v887_v24 = vadd.f32 %v886_v21, %v885_v14  ;;  %v950_v25 = vpop.f32.mrf.mxu1  ;;  %v742_v18 = vadd.f32 %v741_v5, %v740_v11 }
 0x10f   :  { %666 = vst.msk [vmem:[%s1372_s2 + $0x48] sm:$0xff] %vm656_vm0, %v629_v20  ;;  %v951_v30 = vadd.f32 %v950_v25, %v949_v17  ;;  %v888_v31 = vpop.f32.mrf.mxu0  ;;  %v719_v63 = vmul.f32 %v629_v20, %v629_v20  ;;  %v690_v6 = vsel %vm656_vm0, %v629_v20, 0.0 }
 0x110   :  { %v952_v33 = vpop.f32.mrf.mxu1  ;;  %v691_v19 = vadd.f32 %v690_v6, %v689_v4 }
 0x111   :  { %v634_v38 = vadd.f32 %v951_v30, %v887_v24  ;;  %v889_v39 = vpop.f32.mrf.mxu0  ;;  %v743_v14 = vsel %vm656_vm0, %v719_v63, 0.0 }
 0x112   :  { %v890_v41 = vadd.f32 %v889_v39, %v888_v31  ;;  %v953_v42 = vpop.f32.mrf.mxu1  ;;  %v744_v26 = vadd.f32 %v743_v14, %v742_v18 }
 0x113   :  { %667 = vst.msk [vmem:[%s1372_s2 + $0x50] sm:$0xff] %vm656_vm0, %v634_v38  ;;  %v954_v43 = vadd.f32 %v953_v42, %v952_v33  ;;  %v891_v47 = vpop.f32.mrf.mxu0  ;;  %v720_v7 = vmul.f32 %v634_v38, %v634_v38  ;;  %v692_v15 = vsel %vm656_vm0, %v634_v38, 0.0 }
 0x114   :  { %v955_v51 = vpop.f32.mrf.mxu1  ;;  %v693_v27 = vadd.f32 %v692_v15, %v691_v19 }
 0x115   :  { %v637_v50 = vadd.f32 %v954_v43, %v890_v41  ;;  %v892_v55 = vpop.f32.mrf.mxu0  ;;  %v745_v21 = vsel %vm656_vm0, %v720_v7, 0.0 }
 0x116   :  { %v893_v59 = vadd.f32 %v892_v55, %v891_v47  ;;  %v956_v60 = vpop.f32.mrf.mxu1  ;;  %v746_v35 = vadd.f32 %v745_v21, %v744_v26 }
 0x117   :  { %668 = vst.msk [vmem:[%s1372_s2 + $0x58] sm:$0xff] %vm656_vm0, %v637_v50  ;;  %v957_v0 = vadd.f32 %v956_v60, %v955_v51  ;;  %v894_v1 = vpop.f32.mrf.mxu0  ;;  %v721_v16 = vmul.f32 %v637_v50, %v637_v50  ;;  %v694_v22 = vsel %vm656_vm0, %v637_v50, 0.0 }
 0x118   :  { %v958_v3 = vpop.f32.mrf.mxu1  ;;  %v695_v37 = vadd.f32 %v694_v22, %v693_v27 }
 0x119   :  { %v642_v9 = vadd.f32 %v957_v0, %v893_v59  ;;  %v895_v10 = vpop.f32.mrf.mxu0  ;;  %v747_v31 = vsel %vm656_vm0, %v721_v16, 0.0 }
 0x11a   :  { %v896_v12 = vadd.f32 %v895_v10, %v894_v1  ;;  %v959_v13 = vpop.f32.mrf.mxu1  ;;  %v748_v42 = vadd.f32 %v747_v31, %v746_v35 }
 0x11b   :  { %669 = vst.msk [vmem:[%s1372_s2 + $0x60] sm:$0xff] %vm656_vm0, %v642_v9  ;;  %v960_v17 = vadd.f32 %v959_v13, %v958_v3  ;;  %v897_v8 = vpop.f32.mrf.mxu0  ;;  %v722_v23 = vmul.f32 %v642_v9, %v642_v9  ;;  %v696_v29 = vsel %vm656_vm0, %v642_v9, 0.0 }
 0x11c   :  { %v961_v20 = vpop.f32.mrf.mxu1  ;;  %v697_v44 = vadd.f32 %v696_v29, %v695_v37 }
 0x11d   :  { %v645_v24 = vadd.f32 %v960_v17, %v896_v12  ;;  %v898_v25 = vpop.f32.mrf.mxu0  ;;  %v749_v39 = vsel %vm656_vm0, %v722_v23, 0.0 }
 0x11e   :  { %v899_v28 = vadd.f32 %v898_v25, %v897_v8  ;;  %v962_v30 = vpop.f32.mrf.mxu1  ;;  %v750_v51 = vadd.f32 %v749_v39, %v748_v42 }
 0x11f   :  { %670 = vst.msk [vmem:[%s1372_s2 + $0x68] sm:$0xff] %vm656_vm0, %v645_v24  ;;  %v723_v32 = vmul.f32 %v645_v24, %v645_v24  ;;  %v963_v33 = vadd.f32 %v962_v30, %v961_v20  ;;  %v900_v34 = vpop.f32.mrf.mxu0  ;;  %v698_v40 = vsel %vm656_vm0, %v645_v24, 0.0 }
 0x120   :  { %v964_v38 = vpop.f32.mrf.mxu1  ;;  %v699_v52 = vadd.f32 %v698_v40, %v697_v44 }
 0x121   :  { %v650_v36 = vadd.f32 %v963_v33, %v899_v28  ;;  %v901_v41 = vpop.f32.mrf.mxu0  ;;  %v751_v43 = vsel %vm656_vm0, %v723_v32, 0.0 }
 0x122   :  { %v902_v45 = vadd.f32 %v901_v41, %v900_v34  ;;  %v965_v46 = vpop.f32.mrf.mxu1  ;;  %v752_v50 = vadd.f32 %v751_v43, %v750_v51 }
 0x123   :  { %671 = vst.msk [vmem:[%s1372_s2 + $0x70] sm:$0xff] %vm656_vm0, %v650_v36  ;;  %v700_v47 = vsel %vm656_vm0, %v650_v36, 0.0  ;;  %v724_v48 = vmul.f32 %v650_v36, %v650_v36  ;;  %v966_v49 = vadd.f32 %v965_v46, %v964_v38 }
 0x124   :  { %v701_v55 = vadd.f32 %v700_v47, %v699_v52 }
 0x125   :  { %v753_v53 = vsel %vm656_vm0, %v724_v48, 0.0  ;;  %v653_v54 = vadd.f32 %v966_v49, %v902_v45 }
 0x126   :  { %v754_v59 = vadd.f32 %v753_v53, %v752_v50 }
 0x127   :  { %672 = vst.msk [vmem:[%s1372_s2 + $0x78] sm:$0xff] %vm656_vm0, %v653_v54  ;;  %v702_v56 = vsel %vm656_vm0, %v653_v54, 0.0  ;;  %v725_v58 = vmul.f32 %v653_v54, %v653_v54 }
 0x128   :  { %v703_v60 = vadd.f32 %v702_v56, %v701_v55 }
 0x129   :  { %v755_v61 = vsel %vm656_vm0, %v725_v58, 0.0 }
 0x12a   :  { %v704_v62 = vrot.slane %v703_v60, 4  ;;  %v756_v63 = vadd.f32 %v755_v61, %v754_v59 }
 0x12c   :  { %v705_v0 = vadd.f32 %v704_v62, %v703_v60  ;;  %v757_v1 = vrot.slane %v756_v63, 4 }
 0x12e   :  { %v706_v57 = vrot.slane %v705_v0, 2  ;;  %v758_v2 = vadd.f32 %v757_v1, %v756_v63 }
 0x130   :  { %v707_v3 = vadd.f32 %v706_v57, %v705_v0  ;;  %v759_v5 = vrot.slane %v758_v2, 2 }
 0x132   :  { %v708_v6 = vrot.slane %v707_v3, 1  ;;  %v760_v7 = vadd.f32 %v759_v5, %v758_v2 }
 0x134   :  { %v761_v9 = vrot.slane %v760_v7, 1  ;;  %v709_v10 = vadd.f32 %v708_v6, %v707_v3 }
 0x136   :  { %v762_v11 = vadd.f32 %v761_v9, %v760_v7 }
 0x138   :  { %v764_v4 = vsel %vm763_vm1, %v709_v10, %v762_v11 }
 0x139   :  { %766 = vst.msk [vmem:[%s1373_s3] sm:$0x3] %vm765_vm2, %v764_v4 }

// kernel: generator_forward.29
= control target key start
LH: loop header
LB: loop body
LE: loop exit
PB: predicated region body
PF: predicated region fallthrough
CT: control target
= control target key end

     0   :  { %v48_v0 = vlaneseq  ;;  %s662_s1 = inlined_call_operand.vmem [shape: f32[1,1024], index: 1, kind: input, shape index: {}]   ;;  %s663_s2 = inlined_call_operand.vmem [shape: f32[1,1024], index: 2, kind: input, shape index: {}]   ;;  %s664_s0 = inlined_call_operand.vmem [shape: f32[32,1024], index: 0, kind: input, shape index: {}]   ;;  %s665_s3 = inlined_call_operand.vmem [shape: f32[32,1024], index: 3, kind: output, shape index: {}]  }
   0x1   :  { %v46_v2 = vld [vmem:[%s662_s1] sm:$0xff]  ;;  %v15_v9 = vld [vmem:[%s664_s0 + $0x8] sm:$0xff]  ;;  %v16_v18 = vld [vmem:[%s664_s0 + $0x10] sm:$0xff] }
   0x2   :  { %v346_v1 = vshrl.u32 %v48_v0, 7  ;;  %v354_v3 = vld [vmem:[%s663_s2] sm:$0xff]  ;;  %v17_v19 = vld [vmem:[%s664_s0 + $0x18] sm:$0xff]  ;;  %v19_v29 = vld [vmem:[%s664_s0 + $0x28] sm:$0xff] }
   0x3   :  { %v14_v8 = vld [vmem:[%s664_s0] sm:$0xff]  ;;  %v20_v41 = vld [vmem:[%s664_s0 + $0x30] sm:$0xff]  ;;  %v21_v51 = vld [vmem:[%s664_s0 + $0x38] sm:$0xff] }
   0x4   :  { %v50_v4 = vsub.s32 0, %v346_v1  ;;  %v54_v5 = vsub.s32 1, %v346_v1  ;;  %v58_v6 = vsub.s32 2, %v346_v1  ;;  %v62_v7 = vsub.s32 3, %v346_v1  ;;  %v18_v24 = vld [vmem:[%s664_s0 + $0x20] sm:$0xff]  ;;  %v23_v57 = vld [vmem:[%s664_s0 + $0x48] sm:$0xff] }
   0x5   :  { %v66_v10 = vsub.s32 4, %v346_v1  ;;  %v70_v11 = vsub.s32 5, %v346_v1  ;;  %v74_v12 = vsub.s32 6, %v346_v1  ;;  %v78_v13 = vsub.s32 7, %v346_v1  ;;  %v22_v52 = vld [vmem:[%s664_s0 + $0x40] sm:$0xff]  ;;  %v24_v58 = vld [vmem:[%s664_s0 + $0x50] sm:$0xff] }
   0x6   :  { %v370_v14 = vrot.slane %v46_v2, %v50_v4  ;;  %v373_v15 = vrot.slane %v354_v3, %v50_v4  ;;  %v375_v16 = vrot.slane %v46_v2, %v54_v5  ;;  %v378_v17 = vrot.slane %v354_v3, %v54_v5  ;;  %v25_v1 = vld [vmem:[%s664_s0 + $0x58] sm:$0xff] }
   0x7   :  { %v386_v20 = vrot.slane %v46_v2, %v58_v6  ;;  %v389_v21 = vrot.slane %v354_v3, %v58_v6  ;;  %v391_v22 = vrot.slane %v46_v2, %v62_v7  ;;  %v394_v23 = vrot.slane %v354_v3, %v62_v7 }
   0x8   :  { %v88_v25 = vmul.f32 %v370_v14, %v14_v8  ;;  %v89_v26 = vmul.f32 %v375_v16, %v15_v9  ;;  %v401_v27 = vrot.slane %v46_v2, %v66_v10  ;;  %v404_v28 = vrot.slane %v354_v3, %v66_v10 }
   0x9   :  { %v90_v30 = vmul.f32 %v386_v20, %v16_v18  ;;  %v91_v31 = vmul.f32 %v391_v22, %v17_v19  ;;  %v411_v32 = vrot.slane %v46_v2, %v70_v11  ;;  %v414_v33 = vrot.slane %v354_v3, %v70_v11 }
   0xa   :  { %v162_v34 = vadd.f32 %v373_v15, %v88_v25  ;;  %v163_v35 = vadd.f32 %v378_v17, %v89_v26  ;;  %v92_v36 = vmul.f32 %v401_v27, %v18_v24  ;;  %v419_v37 = vrot.slane %v46_v2, %v74_v12  ;;  %v27_v24 = vld [vmem:[%s664_s0 + $0x68] sm:$0xff]  ;;  %v28_v25 = vld [vmem:[%s664_s0 + $0x70] sm:$0xff] }
   0xb   :  { %v164_v38 = vadd.f32 %v389_v21, %v90_v30  ;;  %v165_v39 = vadd.f32 %v394_v23, %v91_v31  ;;  %v93_v40 = vmul.f32 %v411_v32, %v19_v29  ;;  %v428_v42 = vrot.slane %v354_v3, %v74_v12 }
   0xc   :  { %vm194_vm0 = vcmp.ge.f32.partialorder %v162_v34, 0.0  ;;  %v226_v43 = vmul.f32 0.2, %v162_v34  ;;  %vm195_vm1 = vcmp.ge.f32.partialorder %v163_v35, 0.0  ;;  %v227_v44 = vmul.f32 0.2, %v163_v35 }
   0xd   :  { %vm196_vm2 = vcmp.ge.f32.partialorder %v164_v38, 0.0  ;;  %v228_v45 = vmul.f32 0.2, %v164_v38  ;;  %vm197_vm3 = vcmp.ge.f32.partialorder %v165_v39, 0.0  ;;  %v229_v46 = vmul.f32 0.2, %v165_v39 }
   0xe   :  { %v258_v47 = vsel %vm194_vm0, %v162_v34, %v226_v43  ;;  %v259_v48 = vsel %vm195_vm1, %v163_v35, %v227_v44  ;;  %v166_v49 = vadd.f32 %v404_v28, %v92_v36  ;;  %v167_v50 = vadd.f32 %v414_v33, %v93_v40  ;;  %v29_v36 = vld [vmem:[%s664_s0 + $0x78] sm:$0xff]  ;;  %v30_v43 = vld [vmem:[%s664_s0 + $0x80] sm:$0xff]  ;;  %v31_v44 = vld [vmem:[%s664_s0 + $0x88] sm:$0xff] }
   0xf   :  { %290 = vst [vmem:[%s665_s3] sm:$0xff] %v258_v47  ;;  %291 = vst [vmem:[%s665_s3 + $0x8] sm:$0xff] %v259_v48  ;;  %v260_v53 = vsel %vm196_vm2, %v164_v38, %v228_v45  ;;  %v261_v54 = vsel %vm197_vm3, %v165_v39, %v229_v46  ;;  %v94_v55 = vmul.f32 %v419_v37, %v20_v41  ;;  %v32_v45 = vld [vmem:[%s664_s0 + $0x90] sm:$0xff] }
  0x10   :  { %v445_v56 = vrot.slane %v46_v2, %v78_v13  ;;  %292 = vst [vmem:[%s665_s3 + $0x10] sm:$0xff] %v260_v53  ;;  %293 = vst [vmem:[%s665_s3 + $0x18] sm:$0xff] %v261_v54  ;;  %vm198_vm4 = vcmp.ge.f32.partialorder %v166_v49, 0.0  ;;  %v230_v59 = vmul.f32 0.2, %v166_v49  ;;  %vm199_vm5 = vcmp.ge.f32.partialorder %v167_v50, 0.0 }
  0x11   :  { %v231_v60 = vmul.f32 0.2, %v167_v50  ;;  %v168_v61 = vadd.f32 %v428_v42, %v94_v55  ;;  %v462_v63 = vrot.slane %v354_v3, %v78_v13  ;;  %v96_v0 = vmul.f32 %v370_v14, %v22_v52  ;;  %v26_v2 = vld [vmem:[%s664_s0 + $0x60] sm:$0xff] }
  0x12   :  { %v95_v62 = vmul.f32 %v445_v56, %v21_v51  ;;  %v262_v4 = vsel %vm198_vm4, %v166_v49, %v230_v59  ;;  %v97_v6 = vmul.f32 %v375_v16, %v23_v57  ;;  %v98_v7 = vmul.f32 %v386_v20, %v24_v58  ;;  %v33_v57 = vld [vmem:[%s664_s0 + $0x98] sm:$0xff]  ;;  %v34_v58 = vld [vmem:[%s664_s0 + $0xa0] sm:$0xff] }
  0x13   :  { %v263_v5 = vsel %vm199_vm5, %v167_v50, %v231_v60  ;;  %294 = vst [vmem:[%s665_s3 + $0x20] sm:$0xff] %v262_v4  ;;  %vm200_vm6 = vcmp.ge.f32.partialorder %v168_v61, 0.0  ;;  %v232_v3 = vmul.f32 0.2, %v168_v61  ;;  %v170_v9 = vadd.f32 %v373_v15, %v96_v0 }
  0x14   :  { %295 = vst [vmem:[%s665_s3 + $0x28] sm:$0xff] %v263_v5  ;;  %v169_v8 = vadd.f32 %v462_v63, %v95_v62  ;;  %v171_v10 = vadd.f32 %v378_v17, %v97_v6  ;;  %v172_v11 = vadd.f32 %v389_v21, %v98_v7  ;;  %v99_v12 = vmul.f32 %v391_v22, %v25_v1 }
  0x15   :  { %v100_v13 = vmul.f32 %v401_v27, %v26_v2  ;;  %v264_v18 = vsel %vm200_vm6, %v168_v61, %v232_v3  ;;  %vm202_vm8 = vcmp.ge.f32.partialorder %v170_v9, 0.0  ;;  %v234_v26 = vmul.f32 0.2, %v170_v9 }
  0x16   :  { %vm201_vm7 = vcmp.ge.f32.partialorder %v169_v8, 0.0  ;;  %v233_v19 = vmul.f32 0.2, %v169_v8  ;;  %296 = vst [vmem:[%s665_s3 + $0x30] sm:$0xff] %v264_v18  ;;  %vm203_vm9 = vcmp.ge.f32.partialorder %v171_v10, 0.0  ;;  %vm204_vm10 = vcmp.ge.f32.partialorder %v172_v11, 0.0 }
  0x17   :  { %v235_v29 = vmul.f32 0.2, %v171_v10  ;;  %v236_v31 = vmul.f32 0.2, %v172_v11  ;;  %v173_v34 = vadd.f32 %v394_v23, %v99_v12  ;;  %v174_v35 = vadd.f32 %v404_v28, %v100_v13 }
  0x18   :  { %v265_v30 = vsel %vm201_vm7, %v169_v8, %v233_v19  ;;  %v266_v38 = vsel %vm202_vm8, %v170_v9, %v234_v26  ;;  %v101_v40 = vmul.f32 %v411_v32, %v27_v24  ;;  %v102_v41 = vmul.f32 %v419_v37, %v28_v25  ;;  %v35_v8 = vld [vmem:[%s664_s0 + $0xa8] sm:$0xff]  ;;  %v36_v9 = vld [vmem:[%s664_s0 + $0xb0] sm:$0xff]  ;;  %v37_v24 = vld [vmem:[%s664_s0 + $0xb8] sm:$0xff] }
  0x19   :  { %297 = vst [vmem:[%s665_s3 + $0x38] sm:$0xff] %v265_v30  ;;  %v267_v39 = vsel %vm203_vm9, %v171_v10, %v235_v29  ;;  %298 = vst [vmem:[%s665_s3 + $0x40] sm:$0xff] %v266_v38  ;;  %v268_v46 = vsel %vm204_vm10, %v172_v11, %v236_v31  ;;  %vm205_vm11 = vcmp.ge.f32.partialorder %v173_v34, 0.0  ;;  %v237_v47 = vmul.f32 0.2, %v173_v34  ;;  %v38_v31 = vld [vmem:[%s664_s0 + $0xc0] sm:$0xff] }
  0x1a   :  { %299 = vst [vmem:[%s665_s3 + $0x48] sm:$0xff] %v267_v39  ;;  %vm206_vm12 = vcmp.ge.f32.partialorder %v174_v35, 0.0  ;;  %300 = vst [vmem:[%s665_s3 + $0x50] sm:$0xff] %v268_v46  ;;  %v238_v48 = vmul.f32 0.2, %v174_v35  ;;  %v175_v49 = vadd.f32 %v414_v33, %v101_v40  ;;  %v176_v50 = vadd.f32 %v428_v42, %v102_v41 }
  0x1b   :  { %v103_v51 = vmul.f32 %v445_v56, %v29_v36  ;;  %v269_v52 = vsel %vm205_vm11, %v173_v34, %v237_v47  ;;  %v104_v53 = vmul.f32 %v370_v14, %v30_v43  ;;  %v105_v54 = vmul.f32 %v375_v16, %v31_v44  ;;  %v39_v34 = vld [vmem:[%s664_s0 + $0xc8] sm:$0xff] }
  0x1c   :  { %v106_v55 = vmul.f32 %v386_v20, %v32_v45  ;;  %301 = vst [vmem:[%s665_s3 + $0x58] sm:$0xff] %v269_v52  ;;  %v270_v59 = vsel %vm206_vm12, %v174_v35, %v238_v48  ;;  %vm207_vm13 = vcmp.ge.f32.partialorder %v175_v49, 0.0  ;;  %v239_v60 = vmul.f32 0.2, %v175_v49  ;;  %v40_v35 = vld [vmem:[%s664_s0 + $0xd0] sm:$0xff]  ;;  %v41_v48 = vld [vmem:[%s664_s0 + $0xd8] sm:$0xff] }
  0x1d   :  { %vm208_vm14 = vcmp.ge.f32.partialorder %v176_v50, 0.0  ;;  %302 = vst [vmem:[%s665_s3 + $0x60] sm:$0xff] %v270_v59  ;;  %v240_v61 = vmul.f32 0.2, %v176_v50  ;;  %v177_v62 = vadd.f32 %v462_v63, %v103_v51  ;;  %v178_v0 = vadd.f32 %v373_v15, %v104_v53 }
  0x1e   :  { %v179_v1 = vadd.f32 %v378_v17, %v105_v54  ;;  %v271_v2 = vsel %vm207_vm13, %v175_v49, %v239_v60  ;;  %v180_v4 = vadd.f32 %v389_v21, %v106_v55  ;;  %v107_v5 = vmul.f32 %v391_v22, %v33_v57  ;;  %v42_v49 = vld [vmem:[%s664_s0 + $0xe0] sm:$0xff] }
  0x1f   :  { %v108_v6 = vmul.f32 %v401_v27, %v34_v58  ;;  %303 = vst [vmem:[%s665_s3 + $0x68] sm:$0xff] %v271_v2  ;;  %v272_v7 = vsel %vm208_vm14, %v176_v50, %v240_v61  ;;  %vm209_vm15 = vcmp.ge.f32.partialorder %v177_v62, 0.0  ;;  %v241_v3 = vmul.f32 0.2, %v177_v62 }
  0x20   :  { %vm210_vm0 = vcmp.ge.f32.partialorder %v178_v0, 0.0  ;;  %304 = vst [vmem:[%s665_s3 + $0x70] sm:$0xff] %v272_v7  ;;  %v242_v10 = vmul.f32 0.2, %v178_v0  ;;  %vm211_vm1 = vcmp.ge.f32.partialorder %v179_v1, 0.0  ;;  %vm212_vm2 = vcmp.ge.f32.partialorder %v180_v4, 0.0 }
  0x21   :  { %v243_v11 = vmul.f32 0.2, %v179_v1  ;;  %v273_v12 = vsel %vm209_vm15, %v177_v62, %v241_v3  ;;  %v244_v13 = vmul.f32 0.2, %v180_v4  ;;  %v181_v18 = vadd.f32 %v394_v23, %v107_v5 }
  0x22   :  { %v182_v19 = vadd.f32 %v404_v28, %v108_v6  ;;  %305 = vst [vmem:[%s665_s3 + $0x78] sm:$0xff] %v273_v12  ;;  %v274_v25 = vsel %vm210_vm0, %v178_v0, %v242_v10  ;;  %v109_v29 = vmul.f32 %v411_v32, %v35_v8  ;;  %v110_v30 = vmul.f32 %v419_v37, %v36_v9  ;;  %v45_v0 = vld [vmem:[%s664_s0 + $0xf8] sm:$0xff] }
  0x23   :  { %v275_v26 = vsel %vm211_vm1, %v179_v1, %v243_v11  ;;  %306 = vst [vmem:[%s665_s3 + $0x80] sm:$0xff] %v274_v25  ;;  %v276_v36 = vsel %vm212_vm2, %v180_v4, %v244_v13  ;;  %vm213_vm3 = vcmp.ge.f32.partialorder %v181_v18, 0.0  ;;  %v245_v38 = vmul.f32 0.2, %v181_v18 }
  0x24   :  { %307 = vst [vmem:[%s665_s3 + $0x88] sm:$0xff] %v275_v26  ;;  %vm214_vm4 = vcmp.ge.f32.partialorder %v182_v19, 0.0  ;;  %308 = vst [vmem:[%s665_s3 + $0x90] sm:$0xff] %v276_v36  ;;  %v246_v39 = vmul.f32 0.2, %v182_v19  ;;  %v183_v40 = vadd.f32 %v414_v33, %v109_v29  ;;  %v184_v41 = vadd.f32 %v428_v42, %v110_v30 }
  0x25   :  { %v111_v43 = vmul.f32 %v445_v56, %v37_v24  ;;  %v277_v44 = vsel %vm213_vm3, %v181_v18, %v245_v38  ;;  %v112_v45 = vmul.f32 %v370_v14, %v38_v31  ;;  %v113_v46 = vmul.f32 %v375_v16, %v39_v34 }
  0x26   :  { %v114_v47 = vmul.f32 %v386_v20, %v40_v35  ;;  %309 = vst [vmem:[%s665_s3 + $0x98] sm:$0xff] %v277_v44  ;;  %v278_v50 = vsel %vm214_vm4, %v182_v19, %v246_v39  ;;  %vm215_vm5 = vcmp.ge.f32.partialorder %v183_v40, 0.0  ;;  %v247_v51 = vmul.f32 0.2, %v183_v40 }
  0x27   :  { %vm216_vm6 = vcmp.ge.f32.partialorder %v184_v41, 0.0  ;;  %310 = vst [vmem:[%s665_s3 + $0xa0] sm:$0xff] %v278_v50  ;;  %v248_v14 = vmul.f32 0.2, %v184_v41  ;;  %v185_v16 = vadd.f32 %v462_v63, %v111_v43  ;;  %v186_v20 = vadd.f32 %v373_v15, %v112_v45  ;;  %v43_v15 = vld [vmem:[%s664_s0 + $0xe8] sm:$0xff] }
  0x28   :  { %v187_v52 = vadd.f32 %v378_v17, %v113_v46  ;;  %v279_v53 = vsel %vm215_vm5, %v183_v40, %v247_v51  ;;  %v188_v54 = vadd.f32 %v389_v21, %v114_v47  ;;  %v115_v55 = vmul.f32 %v391_v22, %v41_v48  ;;  %v44_v17 = vld [vmem:[%s664_s0 + $0xf0] sm:$0xff] }
  0x29   :  { %v116_v57 = vmul.f32 %v401_v27, %v42_v49  ;;  %311 = vst [vmem:[%s665_s3 + $0xa8] sm:$0xff] %v279_v53  ;;  %v280_v58 = vsel %vm216_vm6, %v184_v41, %v248_v14  ;;  %vm217_vm7 = vcmp.ge.f32.partialorder %v185_v16, 0.0  ;;  %v249_v59 = vmul.f32 0.2, %v185_v16 }
  0x2a   :  { %vm218_vm8 = vcmp.ge.f32.partialorder %v186_v20, 0.0  ;;  %312 = vst [vmem:[%s665_s3 + $0xb0] sm:$0xff] %v280_v58  ;;  %v250_v21 = vmul.f32 0.2, %v186_v20  ;;  %vm219_vm9 = vcmp.ge.f32.partialorder %v187_v52, 0.0  ;;  %vm220_vm10 = vcmp.ge.f32.partialorder %v188_v54, 0.0 }
  0x2b   :  { %v251_v22 = vmul.f32 0.2, %v187_v52  ;;  %v281_v27 = vsel %vm217_vm7, %v185_v16, %v249_v59  ;;  %v252_v60 = vmul.f32 0.2, %v188_v54  ;;  %v189_v61 = vadd.f32 %v394_v23, %v115_v55 }
  0x2c   :  { %v190_v62 = vadd.f32 %v404_v28, %v116_v57  ;;  %313 = vst [vmem:[%s665_s3 + $0xb8] sm:$0xff] %v281_v27  ;;  %v282_v1 = vsel %vm218_vm8, %v186_v20, %v250_v21  ;;  %v117_v4 = vmul.f32 %v411_v32, %v43_v15  ;;  %v118_v5 = vmul.f32 %v419_v37, %v44_v17 }
  0x2d   :  { %v283_v2 = vsel %vm219_vm9, %v187_v52, %v251_v22  ;;  %314 = vst [vmem:[%s665_s3 + $0xc0] sm:$0xff] %v282_v1  ;;  %v284_v23 = vsel %vm220_vm10, %v188_v54, %v252_v60  ;;  %vm221_vm11 = vcmp.ge.f32.partialorder %v189_v61, 0.0  ;;  %v253_v28 = vmul.f32 0.2, %v189_v61 }
  0x2e   :  { %315 = vst [vmem:[%s665_s3 + $0xc8] sm:$0xff] %v283_v2  ;;  %vm222_vm12 = vcmp.ge.f32.partialorder %v190_v62, 0.0  ;;  %316 = vst [vmem:[%s665_s3 + $0xd0] sm:$0xff] %v284_v23  ;;  %v254_v6 = vmul.f32 0.2, %v190_v62  ;;  %v191_v32 = vadd.f32 %v414_v33, %v117_v4  ;;  %v192_v37 = vadd.f32 %v428_v42, %v118_v5 }
  0x2f   :  { %v119_v7 = vmul.f32 %v445_v56, %v45_v0  ;;  %v285_v3 = vsel %vm221_vm11, %v189_v61, %v253_v28 }
  0x30   :  { %317 = vst [vmem:[%s665_s3 + $0xd8] sm:$0xff] %v285_v3  ;;  %v286_v8 = vsel %vm222_vm12, %v190_v62, %v254_v6  ;;  %vm223_vm13 = vcmp.ge.f32.partialorder %v191_v32, 0.0  ;;  %v255_v9 = vmul.f32 0.2, %v191_v32  ;;  %vm224_vm14 = vcmp.ge.f32.partialorder %v192_v37, 0.0 }
  0x31   :  { %318 = vst [vmem:[%s665_s3 + $0xe0] sm:$0xff] %v286_v8  ;;  %v256_v10 = vmul.f32 0.2, %v192_v37  ;;  %v193_v33 = vadd.f32 %v462_v63, %v119_v7 }
  0x32   :  { %v287_v11 = vsel %vm223_vm13, %v191_v32, %v255_v9 }
  0x33   :  { %319 = vst [vmem:[%s665_s3 + $0xe8] sm:$0xff] %v287_v11  ;;  %v288_v42 = vsel %vm224_vm14, %v192_v37, %v256_v10  ;;  %vm225_vm15 = vcmp.ge.f32.partialorder %v193_v33, 0.0  ;;  %v257_v56 = vmul.f32 0.2, %v193_v33 }
  0x34   :  { %320 = vst [vmem:[%s665_s3 + $0xf0] sm:$0xff] %v288_v42 }
  0x35   :  { %v289_v12 = vsel %vm225_vm15, %v193_v33, %v257_v56 }
  0x36   :  { %321 = vst [vmem:[%s665_s3 + $0xf8] sm:$0xff] %v289_v12 }

// kernel: tile.73
= control target key start
LH: loop header
LB: loop body
LE: loop exit
PB: predicated region body
PF: predicated region fallthrough
CT: control target
= control target key end

     0   :  { %s40_s0 = inlined_call_operand.vmem [shape: f32[32], index: 0, kind: input, shape index: {}]   ;;  %s41_s1 = inlined_call_operand.vmem [shape: f32[32,32], index: 1, kind: output, shape index: {}]  }
   0x1   :  { %v4_v0 = vld [vmem:[%s40_s0] ss:$0 sm:$0xff] }
   0x2   :  { %5 = vst [vmem:[%s41_s1] sm:$0xff] %v4_v0  ;;  %12 = vst [vmem:[%s41_s1 + $0x8] sm:$0xff] %v4_v0 }
   0x3   :  { %13 = vst [vmem:[%s41_s1 + $0x10] sm:$0xff] %v4_v0  ;;  %14 = vst [vmem:[%s41_s1 + $0x18] sm:$0xff] %v4_v0 }

// kernel: tile.74
= control target key start
LH: loop header
LB: loop body
LE: loop exit
PB: predicated region body
PF: predicated region fallthrough
CT: control target
= control target key end

     0   :  { %s102_s8 = smov 96   ;;  %vm3_vm0 = vcmask 261120   ;;  %s104_s15 = smov 64   ;;  %vm10_vm1 = vcmask 1048320   ;;  %vm17_vm2 = vcmask 785920   ;;  %vm24_vm3 = vcmask 523520   ;;  %s151_s0 = inlined_call_operand.vmem [shape: f32[32,32], index: 0, kind: input, shape index: {}]   ;;  %s152_s1 = inlined_call_operand.vmem [shape: f32[1,1024], index: 1, kind: output, shape index: {}]  }
   0x1   :  { %v89_v0 = vld [vmem:[%s151_s0 + $0x3] ss:$4 sm:$0xff]   ;;  %v91_v1 = vld [vmem:[%s151_s0 + $0x1] ss:$4 sm:$0xff]   ;;  %v2_v2 = vld [vmem:[%s151_s0] ss:$4 sm:$0xff]  }
   0x2   :  { %8 = vrot.lane.b32.xlu0 %v89_v0, %s102_s8  ;;  %v90_v3 = vld [vmem:[%s151_s0 + $0x2] ss:$4 sm:$0xff]   ;;  %s103_s0 = smov 32   ;;  %4 = vst.msk [vmem:[#allocation0] ss:$8 sm:$0xf] %vm3_vm0, %v2_v2  }
   0x3   :  { %22 = vrot.lane.b32.xlu1 %v91_v1, %s103_s0  ;;  %5 = vst.msk [vmem:[#allocation0] ss:$8 sm:$0xf0] %vm3_vm0, %v2_v2  }
   0x6   :  { %15 = vrot.lane.b32.xlu0 %v90_v3, %s104_s15 }
  0x74   :  { %v9_v4 = vpop.permute.xlu0 %8  }
  0x75   :  { %11 = vst.msk [vmem:[#allocation0] ss:$8 sm:$0xf] %vm10_vm1, %v9_v4   ;;  %12 = vst.msk [vmem:[#allocation0] ss:$8 sm:$0xf0] %vm10_vm1, %v9_v4   ;;  %v23_v5 = vpop.permute.xlu1 %22  }
  0x78   :  { %v16_v6 = vpop.permute.xlu0 %15  }
  0x79   :  { %18 = vst.msk [vmem:[#allocation0] ss:$8 sm:$0xf] %vm17_vm2, %v16_v6   ;;  %19 = vst.msk [vmem:[#allocation0] ss:$8 sm:$0xf0] %vm17_vm2, %v16_v6  }
  0x7a   :  { %25 = vst.msk [vmem:[#allocation0] ss:$8 sm:$0xf] %vm24_vm3, %v23_v5   ;;  %26 = vst.msk [vmem:[#allocation0] ss:$8 sm:$0xf0] %vm24_vm3, %v23_v5  }
  0x81   :  { %v31_v7 = vld [vmem:[#allocation0] sm:$0x1]  ;;  %v36_v8 = vld [vmem:[#allocation0 + $0x8] sm:$0x1]  ;;  %v42_v9 = vld [vmem:[#allocation0 + $0x10] sm:$0x1] }
  0x82   :  { %34 = vst [vmem:[%s152_s1] sm:$0x1] %v31_v7  ;;  %92 = vst [vmem:[%s152_s1 + $0x1] sm:$0x1] %v36_v8  ;;  %v49_v10 = vld [vmem:[#allocation0 + $0x18] sm:$0x1] }
  0x83   :  { %93 = vst [vmem:[%s152_s1 + $0x2] sm:$0x1] %v42_v9  ;;  %v56_v11 = vld [vmem:[#allocation0 + $0x20] sm:$0x1]  ;;  %v63_v12 = vld [vmem:[#allocation0 + $0x28] sm:$0x1] }
  0x84   :  { %94 = vst [vmem:[%s152_s1 + $0x3] sm:$0x1] %v49_v10  ;;  %95 = vst [vmem:[%s152_s1 + $0x4] sm:$0x1] %v56_v11  ;;  %v70_v13 = vld [vmem:[#allocation0 + $0x30] sm:$0x1] }
  0x85   :  { %96 = vst [vmem:[%s152_s1 + $0x5] sm:$0x1] %v63_v12  ;;  %v77_v14 = vld [vmem:[#allocation0 + $0x38] sm:$0x1]  ;;  %97 = vst [vmem:[%s152_s1 + $0x6] sm:$0x1] %v70_v13 }
  0x86   :  { %98 = vst [vmem:[%s152_s1 + $0x7] sm:$0x1] %v77_v14 }

// kernel: generator_forward.32
= control target key start
LH: loop header
LB: loop body
LE: loop exit
PB: predicated region body
PF: predicated region fallthrough
CT: control target
= control target key end

     0   :  { %v1447_v0 = vmov 0   ;;  %vm815_vm0 = vcmask 261120   ;;  %vm1210_vm1 = vcmask 1040384   ;;  %vm1212_vm2 = vcmask 254976   ;;  %s2457_s1 = inlined_call_operand.vmem [shape: bf16[256,32], index: 1, kind: input, shape index: {}]   ;;  %s2458_s0 = inlined_call_operand.vmem [shape: bf16[512,256], index: 0, kind: input, shape index: {}]   ;;  %s2459_s2 = inlined_call_operand.vmem [shape: f32[512,32], index: 2, kind: output, shape index: {0}]   ;;  %s2460_s3 = inlined_call_operand.vmem [shape: f32[1,2,32], index: 3, kind: output, shape index: {1}]  }
   0x1   :  { %526 = vmatprep.subr.bf16.mxu0 %v1447_v0  ;;  %v1335_v1 = vld [vmem:[%s2457_s1 + $0x38] sm:$0xff]   ;;  %1302 = vmatprep.subr.bf16.mxu1 %v1447_v0  ;;  %v1336_v2 = vld [vmem:[%s2457_s1 + $0x30] sm:$0xff]   ;;  %v1337_v3 = vld [vmem:[%s2457_s1 + $0x28] sm:$0xff]  }
   0x2   :  { %527 = vmatpush1.bf16.msra.mxu0 %v1335_v1  ;;  %1318 = vmatpush1.bf16.msra.mxu1 %v1335_v1  ;;  %v1338_v4 = vld [vmem:[%s2457_s1 + $0x20] sm:$0xff]   ;;  %v1339_v5 = vld [vmem:[%s2457_s1 + $0x18] sm:$0xff]   ;;  %v1340_v7 = vld [vmem:[%s2457_s1 + $0x10] sm:$0xff]  }
   0x3   :  { %528 = vmatprep.subr.bf16.mxu0 %v1447_v0  ;;  %1303 = vmatprep.subr.bf16.mxu1 %v1447_v0  ;;  %v1353_v6 = vld [vmem:[%s2458_s0 + $0x4] ss:$8 sps:$4 sm:$0xff]   ;;  %v1343_v11 = vld [vmem:[%s2457_s1 + $0x78] sm:$0xff]   ;;  %v1344_v12 = vld [vmem:[%s2457_s1 + $0x70] sm:$0xff]  }
   0x4   :  { %558 = vmatprep.mubr.bf16.mxu0 %v1353_v6  ;;  %v1341_v8 = vld [vmem:[%s2457_s1 + $0x8] sm:$0xff]   ;;  %v1342_v9 = vld [vmem:[%s2457_s1] sm:$0xff]   ;;  %v1347_v15 = vld [vmem:[%s2457_s1 + $0x58] sm:$0xff]  }
   0x5   :  { %v1377_v10 = vld [vmem:[%s2458_s0 + $0x104] ss:$8 sps:$4 sm:$0xff]   ;;  %v1348_v16 = vld [vmem:[%s2457_s1 + $0x50] sm:$0xff]   ;;  %v1351_v19 = vld [vmem:[%s2458_s0] ss:$8 sps:$4 sm:$0xff]  }
   0x6   :  { %529 = vmatpush1.bf16.msra.mxu0 %v1336_v2  ;;  %1319 = vmatpush1.bf16.msra.mxu1 %v1336_v2  ;;  %v1345_v13 = vld [vmem:[%s2457_s1 + $0x68] sm:$0xff]   ;;  %v1346_v14 = vld [vmem:[%s2457_s1 + $0x60] sm:$0xff]   ;;  %v1354_v21 = vld [vmem:[%s2458_s0 + $0x14] ss:$8 sps:$4 sm:$0xff]  }
   0x7   :  { %530 = vmatprep.subr.bf16.mxu0 %v1447_v0  ;;  %1304 = vmatprep.subr.bf16.mxu1 %v1447_v0  ;;  %v1349_v17 = vld [vmem:[%s2457_s1 + $0x48] sm:$0xff]   ;;  %v1350_v18 = vld [vmem:[%s2457_s1 + $0x40] sm:$0xff]   ;;  %v1381_v22 = vld [vmem:[%s2458_s0 + $0x114] ss:$8 sps:$4 sm:$0xff]  }
   0x8   :  { %686 = vmatprep.mubr.bf16.mxu1 %v1377_v10  ;;  %v1375_v20 = vld [vmem:[%s2458_s0 + $0x100] ss:$8 sps:$4 sm:$0xff]   ;;  %v1356_v23 = vld [vmem:[%s2458_s0 + $0x10] ss:$8 sps:$4 sm:$0xff]   ;;  %v1357_v25 = vld [vmem:[%s2458_s0 + $0x24] ss:$8 sps:$4 sm:$0xff]  }
   0x9   :  { %v1383_v24 = vld [vmem:[%s2458_s0 + $0x110] ss:$8 sps:$4 sm:$0xff]   ;;  %v1387_v26 = vld [vmem:[%s2458_s0 + $0x124] ss:$8 sps:$4 sm:$0xff]   ;;  %v1359_v27 = vld [vmem:[%s2458_s0 + $0x20] ss:$8 sps:$4 sm:$0xff]  }
   0xa   :  { %531 = vmatpush1.bf16.msra.mxu0 %v1337_v3  ;;  %1320 = vmatpush1.bf16.msra.mxu1 %v1337_v3  ;;  %v1389_v28 = vld [vmem:[%s2458_s0 + $0x120] ss:$8 sps:$4 sm:$0xff]   ;;  %v1360_v29 = vld [vmem:[%s2458_s0 + $0x34] ss:$8 sps:$4 sm:$0xff]   ;;  %v1362_v31 = vld [vmem:[%s2458_s0 + $0x30] ss:$8 sps:$4 sm:$0xff]  }
   0xb   :  { %532 = vmatprep.subr.bf16.mxu0 %v1447_v0  ;;  %1305 = vmatprep.subr.bf16.mxu1 %v1447_v0  ;;  %v1393_v30 = vld [vmem:[%s2458_s0 + $0x134] ss:$8 sps:$4 sm:$0xff]   ;;  %v1395_v32 = vld [vmem:[%s2458_s0 + $0x130] ss:$8 sps:$4 sm:$0xff]   ;;  %v1363_v33 = vld [vmem:[%s2458_s0 + $0x44] ss:$8 sps:$4 sm:$0xff]  }
   0xc   :  { %v1399_v34 = vld [vmem:[%s2458_s0 + $0x144] ss:$8 sps:$4 sm:$0xff]   ;;  %v1365_v35 = vld [vmem:[%s2458_s0 + $0x40] ss:$8 sps:$4 sm:$0xff]   ;;  %v1366_v37 = vld [vmem:[%s2458_s0 + $0x54] ss:$8 sps:$4 sm:$0xff]  }
   0xd   :  { %v1401_v36 = vld [vmem:[%s2458_s0 + $0x140] ss:$8 sps:$4 sm:$0xff]   ;;  %v1405_v38 = vld [vmem:[%s2458_s0 + $0x154] ss:$8 sps:$4 sm:$0xff]   ;;  %v1368_v39 = vld [vmem:[%s2458_s0 + $0x50] ss:$8 sps:$4 sm:$0xff]  }
   0xe   :  { %533 = vmatpush1.bf16.msra.mxu0 %v1338_v4  ;;  %1321 = vmatpush1.bf16.msra.mxu1 %v1338_v4  ;;  %v1407_v40 = vld [vmem:[%s2458_s0 + $0x150] ss:$8 sps:$4 sm:$0xff]   ;;  %v1369_v41 = vld [vmem:[%s2458_s0 + $0x64] ss:$8 sps:$4 sm:$0xff]   ;;  %v1371_v43 = vld [vmem:[%s2458_s0 + $0x60] ss:$8 sps:$4 sm:$0xff]  }
   0xf   :  { %534 = vmatprep.subr.bf16.mxu0 %v1447_v0  ;;  %1306 = vmatprep.subr.bf16.mxu1 %v1447_v0  ;;  %v1411_v42 = vld [vmem:[%s2458_s0 + $0x164] ss:$8 sps:$4 sm:$0xff]   ;;  %v1413_v44 = vld [vmem:[%s2458_s0 + $0x160] ss:$8 sps:$4 sm:$0xff]   ;;  %v1372_v45 = vld [vmem:[%s2458_s0 + $0x74] ss:$8 sps:$4 sm:$0xff]  }
  0x10   :  { %v1417_v46 = vld [vmem:[%s2458_s0 + $0x174] ss:$8 sps:$4 sm:$0xff]   ;;  %v1374_v47 = vld [vmem:[%s2458_s0 + $0x70] ss:$8 sps:$4 sm:$0xff]   ;;  %v1378_v49 = vld [vmem:[%s2458_s0 + $0x84] ss:$8 sps:$4 sm:$0xff]  }
  0x11   :  { %v1419_v48 = vld [vmem:[%s2458_s0 + $0x170] ss:$8 sps:$4 sm:$0xff]   ;;  %v1423_v50 = vld [vmem:[%s2458_s0 + $0x184] ss:$8 sps:$4 sm:$0xff]   ;;  %v1380_v51 = vld [vmem:[%s2458_s0 + $0x80] ss:$8 sps:$4 sm:$0xff]  }
  0x12   :  { %535 = vmatpush1.bf16.msra.mxu0 %v1339_v5  ;;  %1322 = vmatpush1.bf16.msra.mxu1 %v1339_v5  ;;  %v1425_v52 = vld [vmem:[%s2458_s0 + $0x180] ss:$8 sps:$4 sm:$0xff]   ;;  %v1384_v53 = vld [vmem:[%s2458_s0 + $0x94] ss:$8 sps:$4 sm:$0xff]   ;;  %v1386_v55 = vld [vmem:[%s2458_s0 + $0x90] ss:$8 sps:$4 sm:$0xff]  }
  0x13   :  { %536 = vmatprep.subr.bf16.mxu0 %v1447_v0  ;;  %1307 = vmatprep.subr.bf16.mxu1 %v1447_v0  ;;  %v1426_v54 = vld [vmem:[%s2458_s0 + $0x194] ss:$8 sps:$4 sm:$0xff]   ;;  %v1428_v56 = vld [vmem:[%s2458_s0 + $0x190] ss:$8 sps:$4 sm:$0xff]   ;;  %v1390_v57 = vld [vmem:[%s2458_s0 + $0xa4] ss:$8 sps:$4 sm:$0xff]  }
  0x14   :  { %v1429_v58 = vld [vmem:[%s2458_s0 + $0x1a4] ss:$8 sps:$4 sm:$0xff]   ;;  %v1392_v59 = vld [vmem:[%s2458_s0 + $0xa0] ss:$8 sps:$4 sm:$0xff]   ;;  %v1396_v61 = vld [vmem:[%s2458_s0 + $0xb4] ss:$8 sps:$4 sm:$0xff]  }
  0x15   :  { %v1431_v60 = vld [vmem:[%s2458_s0 + $0x1a0] ss:$8 sps:$4 sm:$0xff]   ;;  %v1432_v62 = vld [vmem:[%s2458_s0 + $0x1b4] ss:$8 sps:$4 sm:$0xff]   ;;  %v1398_v63 = vld [vmem:[%s2458_s0 + $0xb0] ss:$8 sps:$4 sm:$0xff]  }
  0x16   :  { %537 = vmatpush1.bf16.msra.mxu0 %v1340_v7  ;;  %1323 = vmatpush1.bf16.msra.mxu1 %v1340_v7  ;;  %v1402_v1 = vld [vmem:[%s2458_s0 + $0xc4] ss:$8 sps:$4 sm:$0xff]   ;;  %v1404_v3 = vld [vmem:[%s2458_s0 + $0xc0] ss:$8 sps:$4 sm:$0xff]   ;;  %v1408_v5 = vld [vmem:[%s2458_s0 + $0xd4] ss:$8 sps:$4 sm:$0xff]  }
  0x17   :  { %538 = vmatprep.subr.bf16.mxu0 %v1447_v0  ;;  %1308 = vmatprep.subr.bf16.mxu1 %v1447_v0  ;;  %v1435_v2 = vld [vmem:[%s2458_s0 + $0x1c4] ss:$8 sps:$4 sm:$0xff]   ;;  %v1437_v4 = vld [vmem:[%s2458_s0 + $0x1c0] ss:$8 sps:$4 sm:$0xff]   ;;  %v1438_v6 = vld [vmem:[%s2458_s0 + $0x1d4] ss:$8 sps:$4 sm:$0xff]  }
  0x18   :  { %v1410_v7 = vld [vmem:[%s2458_s0 + $0xd0] ss:$8 sps:$4 sm:$0xff]   ;;  %v1441_v10 = vld [vmem:[%s2458_s0 + $0x1e4] ss:$8 sps:$4 sm:$0xff]  }
  0x1a   :  { %539 = vmatpush1.bf16.msra.mxu0 %v1341_v8  ;;  %1324 = vmatpush1.bf16.msra.mxu1 %v1341_v8  ;;  %v1440_v8 = vld [vmem:[%s2458_s0 + $0x1d0] ss:$8 sps:$4 sm:$0xff]  }
  0x1b   :  { %540 = vmatprep.subr.bf16.mxu0 %v1447_v0  ;;  %1309 = vmatprep.subr.bf16.mxu1 %v1447_v0 }
  0x1e   :  { %541 = vmatpush1.bf16.msra.mxu0 %v1342_v9  ;;  %1325 = vmatpush1.bf16.msra.mxu1 %v1342_v9  ;;  %v1414_v9 = vld [vmem:[%s2458_s0 + $0xe4] ss:$8 sps:$4 sm:$0xff]  }
  0x1f   :  { %542 = vmatprep.subr.bf16.mxu0 %v1447_v0  ;;  %1310 = vmatprep.subr.bf16.mxu1 %v1447_v0 }
  0x22   :  { %543 = vmatpush2.bf16.msra.mxu0 %v1343_v11  ;;  %1326 = vmatpush2.bf16.msra.mxu1 %v1343_v11  ;;  %v1416_v11 = vld [vmem:[%s2458_s0 + $0xe0] ss:$8 sps:$4 sm:$0xff]  }
  0x23   :  { %544 = vmatprep.subr.bf16.mxu0 %v1447_v0  ;;  %1311 = vmatprep.subr.bf16.mxu1 %v1447_v0 }
  0x26   :  { %545 = vmatpush2.bf16.msra.mxu0 %v1344_v12  ;;  %1327 = vmatpush2.bf16.msra.mxu1 %v1344_v12  ;;  %v1443_v12 = vld [vmem:[%s2458_s0 + $0x1e0] ss:$8 sps:$4 sm:$0xff]  }
  0x27   :  { %546 = vmatprep.subr.bf16.mxu0 %v1447_v0  ;;  %1312 = vmatprep.subr.bf16.mxu1 %v1447_v0 }
  0x2a   :  { %547 = vmatpush2.bf16.msra.mxu0 %v1345_v13  ;;  %1328 = vmatpush2.bf16.msra.mxu1 %v1345_v13  ;;  %v1420_v13 = vld [vmem:[%s2458_s0 + $0xf4] ss:$8 sps:$4 sm:$0xff]  }
  0x2b   :  { %548 = vmatprep.subr.bf16.mxu0 %v1447_v0  ;;  %1313 = vmatprep.subr.bf16.mxu1 %v1447_v0 }
  0x2e   :  { %549 = vmatpush2.bf16.msra.mxu0 %v1346_v14  ;;  %1329 = vmatpush2.bf16.msra.mxu1 %v1346_v14  ;;  %v1444_v14 = vld [vmem:[%s2458_s0 + $0x1f4] ss:$8 sps:$4 sm:$0xff]  }
  0x2f   :  { %550 = vmatprep.subr.bf16.mxu0 %v1447_v0  ;;  %1314 = vmatprep.subr.bf16.mxu1 %v1447_v0 }
  0x32   :  { %551 = vmatpush2.bf16.msra.mxu0 %v1347_v15  ;;  %1330 = vmatpush2.bf16.msra.mxu1 %v1347_v15  ;;  %v1422_v15 = vld [vmem:[%s2458_s0 + $0xf0] ss:$8 sps:$4 sm:$0xff]  }
  0x33   :  { %552 = vmatprep.subr.bf16.mxu0 %v1447_v0  ;;  %1315 = vmatprep.subr.bf16.mxu1 %v1447_v0 }
  0x36   :  { %553 = vmatpush2.bf16.msra.mxu0 %v1348_v16  ;;  %1331 = vmatpush2.bf16.msra.mxu1 %v1348_v16  ;;  %v1446_v16 = vld [vmem:[%s2458_s0 + $0x1f0] ss:$8 sps:$4 sm:$0xff]  }
  0x37   :  { %554 = vmatprep.subr.bf16.mxu0 %v1447_v0  ;;  %1316 = vmatprep.subr.bf16.mxu1 %v1447_v0 }
  0x3a   :  { %555 = vmatpush2.bf16.msra.mxu0 %v1349_v17  ;;  %1332 = vmatpush2.bf16.msra.mxu1 %v1349_v17 }
  0x3b   :  { %556 = vmatprep.subr.bf16.mxu0 %v1447_v0  ;;  %1317 = vmatprep.subr.bf16.mxu1 %v1447_v0  ;;  %v1434_v0 = vld [vmem:[%s2458_s0 + $0x1b0] ss:$8 sps:$4 sm:$0xff]  }
  0x3e   :  { %557 = vmatpush2.bf16.msra.mxu0 %v1350_v18  ;;  %1333 = vmatpush2.bf16.msra.mxu1 %v1350_v18 }
  0x41   :  { %559 = vmatmul.mubr.bf16.vlgmr.msra.gmra.mxu0 %v1351_v19  ;;  %687 = vmatmul.mubr.bf16.vlgmr.msra.gmra.mxu1 %v1375_v20 }
  0x42   :  { %566 = vmatprep.mubr.bf16.mxu0 %v1354_v21  ;;  %694 = vmatprep.mubr.bf16.mxu1 %v1381_v22 }
  0x49   :  { %567 = vmatmul.mubr.bf16.gmra.mxu0 %v1356_v23  ;;  %695 = vmatmul.mubr.bf16.gmra.mxu1 %v1383_v24 }
  0x4a   :  { %574 = vmatprep.mubr.bf16.mxu0 %v1357_v25  ;;  %702 = vmatprep.mubr.bf16.mxu1 %v1387_v26 }
  0x51   :  { %575 = vmatmul.mubr.bf16.gmra.mxu0 %v1359_v27  ;;  %703 = vmatmul.mubr.bf16.gmra.mxu1 %v1389_v28 }
  0x52   :  { %582 = vmatprep.mubr.bf16.mxu0 %v1360_v29  ;;  %710 = vmatprep.mubr.bf16.mxu1 %v1393_v30 }
  0x59   :  { %583 = vmatmul.mubr.bf16.gmra.mxu0 %v1362_v31  ;;  %711 = vmatmul.mubr.bf16.gmra.mxu1 %v1395_v32 }
  0x5a   :  { %590 = vmatprep.mubr.bf16.mxu0 %v1363_v33  ;;  %718 = vmatprep.mubr.bf16.mxu1 %v1399_v34 }
  0x61   :  { %591 = vmatmul.mubr.bf16.gmra.mxu0 %v1365_v35  ;;  %719 = vmatmul.mubr.bf16.gmra.mxu1 %v1401_v36 }
  0x62   :  { %598 = vmatprep.mubr.bf16.mxu0 %v1366_v37  ;;  %726 = vmatprep.mubr.bf16.mxu1 %v1405_v38 }
  0x69   :  { %599 = vmatmul.mubr.bf16.gmra.mxu0 %v1368_v39  ;;  %727 = vmatmul.mubr.bf16.gmra.mxu1 %v1407_v40 }
  0x6a   :  { %606 = vmatprep.mubr.bf16.mxu0 %v1369_v41  ;;  %734 = vmatprep.mubr.bf16.mxu1 %v1411_v42 }
  0x71   :  { %607 = vmatmul.mubr.bf16.gmra.mxu0 %v1371_v43  ;;  %735 = vmatmul.mubr.bf16.gmra.mxu1 %v1413_v44 }
  0x72   :  { %614 = vmatprep.mubr.bf16.mxu0 %v1372_v45  ;;  %742 = vmatprep.mubr.bf16.mxu1 %v1417_v46 }
  0x79   :  { %615 = vmatmul.mubr.bf16.gmra.mxu0 %v1374_v47  ;;  %743 = vmatmul.mubr.bf16.gmra.mxu1 %v1419_v48 }
  0x7a   :  { %622 = vmatprep.mubr.bf16.mxu0 %v1378_v49  ;;  %750 = vmatprep.mubr.bf16.mxu1 %v1423_v50 }
  0x81   :  { %623 = vmatmul.mubr.bf16.gmra.mxu0 %v1380_v51  ;;  %751 = vmatmul.mubr.bf16.gmra.mxu1 %v1425_v52 }
  0x82   :  { %630 = vmatprep.mubr.bf16.mxu0 %v1384_v53  ;;  %758 = vmatprep.mubr.bf16.mxu1 %v1426_v54 }
  0x89   :  { %631 = vmatmul.mubr.bf16.gmra.mxu0 %v1386_v55  ;;  %759 = vmatmul.mubr.bf16.gmra.mxu1 %v1428_v56 }
  0x8a   :  { %638 = vmatprep.mubr.bf16.mxu0 %v1390_v57  ;;  %766 = vmatprep.mubr.bf16.mxu1 %v1429_v58 }
  0x91   :  { %639 = vmatmul.mubr.bf16.gmra.mxu0 %v1392_v59  ;;  %767 = vmatmul.mubr.bf16.gmra.mxu1 %v1431_v60 }
  0x92   :  { %646 = vmatprep.mubr.bf16.mxu0 %v1396_v61  ;;  %774 = vmatprep.mubr.bf16.mxu1 %v1432_v62 }
  0x99   :  { %647 = vmatmul.mubr.bf16.gmra.mxu0 %v1398_v63  ;;  %775 = vmatmul.mubr.bf16.gmra.mxu1 %v1434_v0 }
  0x9a   :  { %654 = vmatprep.mubr.bf16.mxu0 %v1402_v1  ;;  %782 = vmatprep.mubr.bf16.mxu1 %v1435_v2 }
  0xa1   :  { %655 = vmatmul.mubr.bf16.gmra.mxu0 %v1404_v3  ;;  %783 = vmatmul.mubr.bf16.gmra.mxu1 %v1437_v4 }
  0xa2   :  { %662 = vmatprep.mubr.bf16.mxu0 %v1408_v5  ;;  %790 = vmatprep.mubr.bf16.mxu1 %v1438_v6 }
  0xa9   :  { %663 = vmatmul.mubr.bf16.gmra.mxu0 %v1410_v7  ;;  %791 = vmatmul.mubr.bf16.gmra.mxu1 %v1440_v8 }
  0xaa   :  { %670 = vmatprep.mubr.bf16.mxu0 %v1414_v9  ;;  %798 = vmatprep.mubr.bf16.mxu1 %v1441_v10 }
  0xb1   :  { %671 = vmatmul.mubr.bf16.gmra.mxu0 %v1416_v11  ;;  %799 = vmatmul.mubr.bf16.gmra.mxu1 %v1443_v12 }
  0xb2   :  { %678 = vmatprep.mubr.bf16.mxu0 %v1420_v13  ;;  %806 = vmatprep.mubr.bf16.mxu1 %v1444_v14 }
  0xb9   :  { %679 = vmatmul.mubr.bf16.gmra.mxu0 %v1422_v15  ;;  %807 = vmatmul.mubr.bf16.gmra.mxu1 %v1446_v16 }
 0x101   :  { %v1740_v17 = vpop.f32.mrf.mxu0  ;;  %v1742_v18 = vpop.f32.mrf.mxu1 }
 0x102   :  { %816 = vst.msk [vmem:[%s2459_s2] sm:$0xff] %vm815_vm0, %v1740_v17  ;;  %848 = vst.msk [vmem:[%s2459_s2 + $0x100] sm:$0xff] %vm815_vm0, %v1742_v18 }
 0x103   :  { %v562_v19 = vpop.f32.mrf.mxu0  ;;  %v690_v20 = vpop.f32.mrf.mxu1 }
 0x104   :  { %v1013_v20 = vmul.f32 %v1740_v17, %v1740_v17 }
 0x105   :  { %v1754_v21 = vpop.f32.mrf.mxu0  ;;  %v1756_v22 = vpop.f32.mrf.mxu1 }
 0x106   :  { %817 = vst.msk [vmem:[%s2459_s2 + $0x8] sm:$0xff] %vm815_vm0, %v1754_v21  ;;  %849 = vst.msk [vmem:[%s2459_s2 + $0x108] sm:$0xff] %vm815_vm0, %v1756_v22  ;;  %v1014_v15 = vmul.f32 %v1754_v21, %v1754_v21 }
 0x107   :  { %v565_v23 = vpop.f32.mrf.mxu0  ;;  %v693_v24 = vpop.f32.mrf.mxu1 }
 0x108   :  { %v881_v23 = vsel %vm815_vm0, %v1754_v21, 0.0 }
 0x109   :  { %v1768_v25 = vpop.f32.mrf.mxu0  ;;  %v1770_v26 = vpop.f32.mrf.mxu1 }
 0x10a   :  { %818 = vst.msk [vmem:[%s2459_s2 + $0x10] sm:$0xff] %vm815_vm0, %v1768_v25  ;;  %850 = vst.msk [vmem:[%s2459_s2 + $0x110] sm:$0xff] %vm815_vm0, %v1770_v26  ;;  %v1015_v24 = vmul.f32 %v1768_v25, %v1768_v25 }
 0x10b   :  { %v570_v27 = vpop.f32.mrf.mxu0  ;;  %v698_v28 = vpop.f32.mrf.mxu1 }
 0x10d   :  { %v1782_v29 = vpop.f32.mrf.mxu0  ;;  %v1784_v30 = vpop.f32.mrf.mxu1 }
 0x10e   :  { %819 = vst.msk [vmem:[%s2459_s2 + $0x18] sm:$0xff] %vm815_vm0, %v1782_v29  ;;  %851 = vst.msk [vmem:[%s2459_s2 + $0x118] sm:$0xff] %vm815_vm0, %v1784_v30 }
 0x10f   :  { %v573_v31 = vpop.f32.mrf.mxu0  ;;  %v701_v32 = vpop.f32.mrf.mxu1 }
 0x110   :  { %v880_v31 = vsel %vm815_vm0, %v1740_v17, 0.0  ;;  %v1078_v32 = vsel %vm815_vm0, %v1014_v15, 0.0 }
 0x111   :  { %v1796_v33 = vpop.f32.mrf.mxu0  ;;  %v1798_v34 = vpop.f32.mrf.mxu1  ;;  %v882_v17 = vadd.f32 %v881_v23, %v880_v31 }
 0x112   :  { %820 = vst.msk [vmem:[%s2459_s2 + $0x20] sm:$0xff] %vm815_vm0, %v1796_v33  ;;  %852 = vst.msk [vmem:[%s2459_s2 + $0x120] sm:$0xff] %vm815_vm0, %v1798_v34 }
 0x113   :  { %v578_v35 = vpop.f32.mrf.mxu0  ;;  %v706_v36 = vpop.f32.mrf.mxu1 }
 0x114   :  { %v883_v35 = vsel %vm815_vm0, %v1768_v25, 0.0  ;;  %v1016_v36 = vmul.f32 %v1782_v29, %v1782_v29  ;;  %v1077_v25 = vsel %vm815_vm0, %v1013_v20, 0.0 }
 0x115   :  { %v1810_v37 = vpop.f32.mrf.mxu0  ;;  %v1812_v38 = vpop.f32.mrf.mxu1 }
 0x116   :  { %821 = vst.msk [vmem:[%s2459_s2 + $0x28] sm:$0xff] %vm815_vm0, %v1810_v37  ;;  %853 = vst.msk [vmem:[%s2459_s2 + $0x128] sm:$0xff] %vm815_vm0, %v1812_v38 }
 0x117   :  { %v581_v39 = vpop.f32.mrf.mxu0  ;;  %v709_v40 = vpop.f32.mrf.mxu1 }
 0x118   :  { %v1080_v40 = vsel %vm815_vm0, %v1015_v24, 0.0 }
 0x119   :  { %v1824_v41 = vpop.f32.mrf.mxu0  ;;  %v1826_v42 = vpop.f32.mrf.mxu1 }
 0x11a   :  { %822 = vst.msk [vmem:[%s2459_s2 + $0x30] sm:$0xff] %vm815_vm0, %v1824_v41  ;;  %854 = vst.msk [vmem:[%s2459_s2 + $0x130] sm:$0xff] %vm815_vm0, %v1826_v42 }
 0x11b   :  { %v586_v43 = vpop.f32.mrf.mxu0  ;;  %v714_v44 = vpop.f32.mrf.mxu1 }
 0x11c   :  { %v885_v43 = vsel %vm815_vm0, %v1782_v29, 0.0  ;;  %v1017_v44 = vmul.f32 %v1796_v33, %v1796_v33 }
 0x11d   :  { %v1838_v45 = vpop.f32.mrf.mxu0  ;;  %v1840_v46 = vpop.f32.mrf.mxu1 }
 0x11e   :  { %823 = vst.msk [vmem:[%s2459_s2 + $0x38] sm:$0xff] %vm815_vm0, %v1838_v45  ;;  %855 = vst.msk [vmem:[%s2459_s2 + $0x138] sm:$0xff] %vm815_vm0, %v1840_v46  ;;  %v893_v31 = vsel %vm815_vm0, %v1838_v45, 0.0 }
 0x11f   :  { %v589_v47 = vpop.f32.mrf.mxu0  ;;  %v717_v48 = vpop.f32.mrf.mxu1 }
 0x120   :  { %v1079_v47 = vadd.f32 %v1078_v32, %v1077_v25  ;;  %v884_v48 = vadd.f32 %v883_v35, %v882_v17 }
 0x121   :  { %v1852_v49 = vpop.f32.mrf.mxu0  ;;  %v1854_v50 = vpop.f32.mrf.mxu1 }
 0x122   :  { %824 = vst.msk [vmem:[%s2459_s2 + $0x40] sm:$0xff] %vm815_vm0, %v1852_v49  ;;  %856 = vst.msk [vmem:[%s2459_s2 + $0x140] sm:$0xff] %vm815_vm0, %v1854_v50  ;;  %v1081_v29 = vadd.f32 %v1080_v40, %v1079_v47  ;;  %v1021_v32 = vmul.f32 %v1852_v49, %v1852_v49  ;;  %v895_v25 = vsel %vm815_vm0, %v1852_v49, 0.0 }
 0x123   :  { %v594_v51 = vpop.f32.mrf.mxu0  ;;  %v722_v52 = vpop.f32.mrf.mxu1 }
 0x124   :  { %v1092_v49 = vsel %vm815_vm0, %v1021_v32, 0.0 }
 0x125   :  { %v1866_v53 = vpop.f32.mrf.mxu0  ;;  %v1868_v54 = vpop.f32.mrf.mxu1 }
 0x126   :  { %825 = vst.msk [vmem:[%s2459_s2 + $0x48] sm:$0xff] %vm815_vm0, %v1866_v53  ;;  %857 = vst.msk [vmem:[%s2459_s2 + $0x148] sm:$0xff] %vm815_vm0, %v1868_v54  ;;  %v1022_v40 = vmul.f32 %v1866_v53, %v1866_v53 }
 0x127   :  { %v597_v55 = vpop.f32.mrf.mxu0  ;;  %v725_v56 = vpop.f32.mrf.mxu1 }
 0x128   :  { %v1082_v55 = vsel %vm815_vm0, %v1016_v36, 0.0  ;;  %v887_v56 = vsel %vm815_vm0, %v1796_v33, 0.0  ;;  %v1084_v33 = vsel %vm815_vm0, %v1017_v44, 0.0 }
 0x129   :  { %v1880_v57 = vpop.f32.mrf.mxu0  ;;  %v1882_v58 = vpop.f32.mrf.mxu1 }
 0x12a   :  { %826 = vst.msk [vmem:[%s2459_s2 + $0x50] sm:$0xff] %vm815_vm0, %v1880_v57  ;;  %858 = vst.msk [vmem:[%s2459_s2 + $0x150] sm:$0xff] %vm815_vm0, %v1882_v58 }
 0x12b   :  { %v602_v59 = vpop.f32.mrf.mxu0  ;;  %v730_v60 = vpop.f32.mrf.mxu1 }
 0x12c   :  { %v1018_v59 = vmul.f32 %v1810_v37, %v1810_v37  ;;  %v886_v60 = vadd.f32 %v885_v43, %v884_v48  ;;  %v897_v48 = vsel %vm815_vm0, %v1866_v53, 0.0 }
 0x12d   :  { %v1894_v61 = vpop.f32.mrf.mxu0  ;;  %v1896_v62 = vpop.f32.mrf.mxu1 }
 0x12e   :  { %827 = vst.msk [vmem:[%s2459_s2 + $0x58] sm:$0xff] %vm815_vm0, %v1894_v61  ;;  %859 = vst.msk [vmem:[%s2459_s2 + $0x158] sm:$0xff] %vm815_vm0, %v1896_v62  ;;  %v1086_v15 = vsel %vm815_vm0, %v1018_v59, 0.0 }
 0x12f   :  { %v605_v63 = vpop.f32.mrf.mxu0  ;;  %v733_v0 = vpop.f32.mrf.mxu1 }
 0x131   :  { %v1908_v1 = vpop.f32.mrf.mxu0  ;;  %v1910_v2 = vpop.f32.mrf.mxu1 }
 0x132   :  { %828 = vst.msk [vmem:[%s2459_s2 + $0x60] sm:$0xff] %vm815_vm0, %v1908_v1  ;;  %860 = vst.msk [vmem:[%s2459_s2 + $0x160] sm:$0xff] %vm815_vm0, %v1910_v2 }
 0x133   :  { %v610_v3 = vpop.f32.mrf.mxu0  ;;  %v738_v4 = vpop.f32.mrf.mxu1 }
 0x134   :  { %v889_v3 = vsel %vm815_vm0, %v1810_v37, 0.0  ;;  %v1019_v4 = vmul.f32 %v1824_v41, %v1824_v41 }
 0x135   :  { %v1922_v5 = vpop.f32.mrf.mxu0  ;;  %v1924_v6 = vpop.f32.mrf.mxu1 }
 0x136   :  { %829 = vst.msk [vmem:[%s2459_s2 + $0x68] sm:$0xff] %vm815_vm0, %v1922_v5  ;;  %861 = vst.msk [vmem:[%s2459_s2 + $0x168] sm:$0xff] %vm815_vm0, %v1924_v6 }
 0x137   :  { %v613_v7 = vpop.f32.mrf.mxu0  ;;  %v741_v8 = vpop.f32.mrf.mxu1 }
 0x138   :  { %v1083_v7 = vadd.f32 %v1082_v55, %v1081_v29  ;;  %v888_v8 = vadd.f32 %v887_v56, %v886_v60  ;;  %v1023_v55 = vmul.f32 %v1880_v57, %v1880_v57 }
 0x139   :  { %v1936_v9 = vpop.f32.mrf.mxu0  ;;  %v1938_v10 = vpop.f32.mrf.mxu1 }
 0x13a   :  { %830 = vst.msk [vmem:[%s2459_s2 + $0x70] sm:$0xff] %vm815_vm0, %v1936_v9  ;;  %862 = vst.msk [vmem:[%s2459_s2 + $0x170] sm:$0xff] %vm815_vm0, %v1938_v10  ;;  %v1085_v37 = vadd.f32 %v1084_v33, %v1083_v7  ;;  %v890_v20 = vadd.f32 %v889_v3, %v888_v8  ;;  %v1024_v33 = vmul.f32 %v1894_v61, %v1894_v61  ;;  %v901_v8 = vsel %vm815_vm0, %v1894_v61, 0.0 }
 0x13b   :  { %v618_v11 = vpop.f32.mrf.mxu0  ;;  %v746_v12 = vpop.f32.mrf.mxu1 }
 0x13c   :  { %v1087_v35 = vadd.f32 %v1086_v15, %v1085_v37  ;;  %v1025_v15 = vmul.f32 %v1908_v1, %v1908_v1 }
 0x13d   :  { %v1950_v13 = vpop.f32.mrf.mxu0  ;;  %v1952_v14 = vpop.f32.mrf.mxu1 }
 0x13e   :  { %831 = vst.msk [vmem:[%s2459_s2 + $0x78] sm:$0xff] %vm815_vm0, %v1950_v13  ;;  %863 = vst.msk [vmem:[%s2459_s2 + $0x178] sm:$0xff] %vm815_vm0, %v1952_v14 }
 0x13f   :  { %v621_v16 = vpop.f32.mrf.mxu0  ;;  %v749_v19 = vpop.f32.mrf.mxu1 }
 0x140   :  { %v891_v16 = vsel %vm815_vm0, %v1824_v41, 0.0  ;;  %v1020_v19 = vmul.f32 %v1838_v45, %v1838_v45  ;;  %v1088_v41 = vsel %vm815_vm0, %v1019_v4, 0.0 }
 0x141   :  { %v1972_v27 = vpop.f32.mrf.mxu0  ;;  %v1974_v28 = vpop.f32.mrf.mxu1  ;;  %v892_v36 = vadd.f32 %v891_v16, %v890_v20  ;;  %v1089_v45 = vadd.f32 %v1088_v41, %v1087_v35  ;;  %v1026_v41 = vmul.f32 %v1922_v5, %v1922_v5 }
 0x142   :  { %832 = vst.msk [vmem:[%s2459_s2 + $0x80] sm:$0xff] %vm815_vm0, %v1972_v27  ;;  %864 = vst.msk [vmem:[%s2459_s2 + $0x180] sm:$0xff] %vm815_vm0, %v1974_v28 }
 0x143   :  { %v626_v21 = vpop.f32.mrf.mxu0  ;;  %v754_v39 = vpop.f32.mrf.mxu1  ;;  %v894_v43 = vadd.f32 %v893_v31, %v892_v36  ;;  %v905_v36 = vsel %vm815_vm0, %v1922_v5, 0.0 }
 0x144   :  { %v1090_v39 = vsel %vm815_vm0, %v1020_v19, 0.0 }
 0x145   :  { %v1999_v51 = vpop.f32.mrf.mxu0  ;;  %v2001_v52 = vpop.f32.mrf.mxu1  ;;  %v1091_v56 = vadd.f32 %v1090_v39, %v1089_v45  ;;  %v896_v59 = vadd.f32 %v895_v25, %v894_v43  ;;  %v1027_v39 = vmul.f32 %v1936_v9, %v1936_v9 }
 0x146   :  { %833 = vst.msk [vmem:[%s2459_s2 + $0x88] sm:$0xff] %vm815_vm0, %v1999_v51  ;;  %865 = vst.msk [vmem:[%s2459_s2 + $0x188] sm:$0xff] %vm815_vm0, %v2001_v52 }
 0x147   :  { %v629_v63 = vpop.f32.mrf.mxu0  ;;  %v757_v0 = vpop.f32.mrf.mxu1  ;;  %v1093_v53 = vadd.f32 %v1092_v49, %v1091_v56  ;;  %v898_v3 = vadd.f32 %v897_v48, %v896_v59  ;;  %v1028_v49 = vmul.f32 %v1950_v13, %v1950_v13  ;;  %v909_v59 = vsel %vm815_vm0, %v1950_v13, 0.0 }
 0x148   :  { %v1094_v63 = vsel %vm815_vm0, %v1022_v40, 0.0  ;;  %v899_v0 = vsel %vm815_vm0, %v1880_v57, 0.0  ;;  %v1096_v57 = vsel %vm815_vm0, %v1023_v55, 0.0 }
 0x149   :  { %v2023_v11 = vpop.f32.mrf.mxu0  ;;  %v2025_v12 = vpop.f32.mrf.mxu1  ;;  %v1095_v16 = vadd.f32 %v1094_v63, %v1093_v53  ;;  %v900_v19 = vadd.f32 %v899_v0, %v898_v3  ;;  %v1029_v63 = vmul.f32 %v1972_v27, %v1972_v27 }
 0x14a   :  { %834 = vst.msk [vmem:[%s2459_s2 + $0x90] sm:$0xff] %vm815_vm0, %v2023_v11  ;;  %866 = vst.msk [vmem:[%s2459_s2 + $0x190] sm:$0xff] %vm815_vm0, %v2025_v12 }
 0x14b   :  { %v634_v23 = vpop.f32.mrf.mxu0  ;;  %v762_v24 = vpop.f32.mrf.mxu1  ;;  %v1097_v61 = vadd.f32 %v1096_v57, %v1095_v16  ;;  %v902_v31 = vadd.f32 %v901_v8, %v900_v19  ;;  %v1030_v57 = vmul.f32 %v1999_v51, %v1999_v51  ;;  %v913_v19 = vsel %vm815_vm0, %v1999_v51, 0.0 }
 0x14c   :  { %v1098_v23 = vsel %vm815_vm0, %v1024_v33, 0.0  ;;  %v903_v24 = vsel %vm815_vm0, %v1908_v1, 0.0  ;;  %v1100_v1 = vsel %vm815_vm0, %v1025_v15, 0.0 }
 0x14d   :  { %v2047_v17 = vpop.f32.mrf.mxu0  ;;  %v2049_v21 = vpop.f32.mrf.mxu1  ;;  %v1099_v25 = vadd.f32 %v1098_v23, %v1097_v61  ;;  %v904_v40 = vadd.f32 %v903_v24, %v902_v31  ;;  %v1031_v23 = vmul.f32 %v2023_v11, %v2023_v11 }
 0x14e   :  { %835 = vst.msk [vmem:[%s2459_s2 + $0x98] sm:$0xff] %vm815_vm0, %v2047_v17  ;;  %867 = vst.msk [vmem:[%s2459_s2 + $0x198] sm:$0xff] %vm815_vm0, %v2049_v21 }
 0x14f   :  { %v637_v44 = vpop.f32.mrf.mxu0  ;;  %v765_v47 = vpop.f32.mrf.mxu1  ;;  %v1101_v5 = vadd.f32 %v1100_v1, %v1099_v25  ;;  %v906_v48 = vadd.f32 %v905_v36, %v904_v40  ;;  %v1032_v1 = vmul.f32 %v2047_v17, %v2047_v17  ;;  %v917_v40 = vsel %vm815_vm0, %v2047_v17, 0.0 }
 0x150   :  { %v1102_v44 = vsel %vm815_vm0, %v1026_v41, 0.0  ;;  %v907_v47 = vsel %vm815_vm0, %v1936_v9, 0.0  ;;  %v1104_v9 = vsel %vm815_vm0, %v1027_v39, 0.0 }
 0x151   :  { %v2071_v29 = vpop.f32.mrf.mxu0  ;;  %v2073_v60 = vpop.f32.mrf.mxu1  ;;  %v1103_v0 = vadd.f32 %v1102_v44, %v1101_v5  ;;  %v908_v33 = vadd.f32 %v907_v47, %v906_v48 }
 0x152   :  { %836 = vst.msk [vmem:[%s2459_s2 + $0xa0] sm:$0xff] %vm815_vm0, %v2071_v29  ;;  %868 = vst.msk [vmem:[%s2459_s2 + $0x1a0] sm:$0xff] %vm815_vm0, %v2073_v60  ;;  %v1033_v44 = vmul.f32 %v2071_v29, %v2071_v29 }
 0x153   :  { %v642_v4 = vpop.f32.mrf.mxu0  ;;  %v770_v7 = vpop.f32.mrf.mxu1  ;;  %v1105_v13 = vadd.f32 %v1104_v9, %v1103_v0  ;;  %v910_v8 = vadd.f32 %v909_v59, %v908_v33 }
 0x154   :  { %v1106_v4 = vsel %vm815_vm0, %v1028_v49, 0.0  ;;  %v911_v7 = vsel %vm815_vm0, %v1972_v27, 0.0  ;;  %v1108_v27 = vsel %vm815_vm0, %v1029_v63, 0.0 }
 0x155   :  { %v2095_v37 = vpop.f32.mrf.mxu0  ;;  %v2097_v20 = vpop.f32.mrf.mxu1  ;;  %v1107_v24 = vadd.f32 %v1106_v4, %v1105_v13  ;;  %v912_v41 = vadd.f32 %v911_v7, %v910_v8 }
 0x156   :  { %837 = vst.msk [vmem:[%s2459_s2 + $0xa8] sm:$0xff] %vm815_vm0, %v2095_v37  ;;  %869 = vst.msk [vmem:[%s2459_s2 + $0x1a8] sm:$0xff] %vm815_vm0, %v2097_v20  ;;  %v1034_v9 = vmul.f32 %v2095_v37, %v2095_v37  ;;  %v921_v33 = vsel %vm815_vm0, %v2095_v37, 0.0 }
 0x157   :  { %v645_v32 = vpop.f32.mrf.mxu0  ;;  %v773_v35 = vpop.f32.mrf.mxu1  ;;  %v1109_v51 = vadd.f32 %v1108_v27, %v1107_v24  ;;  %v914_v36 = vadd.f32 %v913_v19, %v912_v41 }
 0x158   :  { %v1110_v32 = vsel %vm815_vm0, %v1030_v57, 0.0  ;;  %v915_v35 = vsel %vm815_vm0, %v2023_v11, 0.0  ;;  %v1112_v11 = vsel %vm815_vm0, %v1031_v23, 0.0 }
 0x159   :  { %v2119_v45 = vpop.f32.mrf.mxu0  ;;  %v2121_v43 = vpop.f32.mrf.mxu1  ;;  %v1111_v47 = vadd.f32 %v1110_v32, %v1109_v51  ;;  %v916_v49 = vadd.f32 %v915_v35, %v914_v36 }
 0x15a   :  { %838 = vst.msk [vmem:[%s2459_s2 + $0xb0] sm:$0xff] %vm815_vm0, %v2119_v45  ;;  %870 = vst.msk [vmem:[%s2459_s2 + $0x1b0] sm:$0xff] %vm815_vm0, %v2121_v43  ;;  %v1035_v4 = vmul.f32 %v2119_v45, %v2119_v45 }
 0x15b   :  { %v650_v55 = vpop.f32.mrf.mxu0  ;;  %v778_v56 = vpop.f32.mrf.mxu1  ;;  %v1113_v17 = vadd.f32 %v1112_v11, %v1111_v47  ;;  %v918_v59 = vadd.f32 %v917_v40, %v916_v49 }
 0x15c   :  { %v1114_v55 = vsel %vm815_vm0, %v1032_v1, 0.0  ;;  %v919_v56 = vsel %vm815_vm0, %v2071_v29, 0.0  ;;  %v1116_v29 = vsel %vm815_vm0, %v1033_v44, 0.0  ;;  %v1120_v41 = vsel %vm815_vm0, %v1035_v4, 0.0 }
 0x15d   :  { %v651_v53 = vpop.f32.mrf.mxu0  ;;  %v2143_v3 = vpop.f32.mrf.mxu1  ;;  %v1115_v7 = vadd.f32 %v1114_v55, %v1113_v17  ;;  %v920_v57 = vadd.f32 %v919_v56, %v918_v59 }
 0x15e   :  { %839 = vst.msk [vmem:[%s2459_s2 + $0xb8] sm:$0xff] %vm815_vm0, %v651_v53  ;;  %871 = vst.msk [vmem:[%s2459_s2 + $0x1b8] sm:$0xff] %vm815_vm0, %v2143_v3  ;;  %v1036_v27 = vmul.f32 %v651_v53, %v651_v53 }
 0x15f   :  { %v653_v15 = vpop.f32.mrf.mxu0  ;;  %v781_v16 = vpop.f32.mrf.mxu1  ;;  %v1117_v37 = vadd.f32 %v1116_v29, %v1115_v7  ;;  %v922_v19 = vadd.f32 %v921_v33, %v920_v57 }
 0x160   :  { %v1118_v15 = vsel %vm815_vm0, %v1034_v9, 0.0  ;;  %v923_v16 = vsel %vm815_vm0, %v2119_v45, 0.0  ;;  %v925_v45 = vsel %vm815_vm0, %v651_v53, 0.0 }
 0x161   :  { %v656_v61 = vpop.f32.mrf.mxu0  ;;  %v2164_v31 = vpop.f32.mrf.mxu1  ;;  %v1119_v35 = vadd.f32 %v1118_v15, %v1117_v37  ;;  %v924_v1 = vadd.f32 %v923_v16, %v922_v19 }
 0x162   :  { %840 = vst.msk [vmem:[%s2459_s2 + $0xc0] sm:$0xff] %vm815_vm0, %v656_v61  ;;  %872 = vst.msk [vmem:[%s2459_s2 + $0x1c0] sm:$0xff] %vm815_vm0, %v2164_v31  ;;  %v1037_v32 = vmul.f32 %v656_v61, %v656_v61 }
 0x163   :  { %v658_v39 = vpop.f32.mrf.mxu0  ;;  %v786_v25 = vpop.f32.mrf.mxu1  ;;  %v1121_v53 = vadd.f32 %v1120_v41, %v1119_v35  ;;  %v926_v40 = vadd.f32 %v925_v45, %v924_v1 }
 0x164   :  { %v1122_v39 = vsel %vm815_vm0, %v1036_v27, 0.0  ;;  %v927_v25 = vsel %vm815_vm0, %v656_v61, 0.0  ;;  %v1124_v49 = vsel %vm815_vm0, %v1037_v32, 0.0 }
 0x165   :  { %v659_v5 = vpop.f32.mrf.mxu0  ;;  %v2185_v48 = vpop.f32.mrf.mxu1  ;;  %v1123_v56 = vadd.f32 %v1122_v39, %v1121_v53  ;;  %v928_v9 = vadd.f32 %v927_v25, %v926_v40 }
 0x166   :  { %841 = vst.msk [vmem:[%s2459_s2 + $0xc8] sm:$0xff] %vm815_vm0, %v659_v5  ;;  %873 = vst.msk [vmem:[%s2459_s2 + $0x1c8] sm:$0xff] %vm815_vm0, %v2185_v48  ;;  %v1038_v11 = vmul.f32 %v659_v5, %v659_v5  ;;  %v929_v61 = vsel %vm815_vm0, %v659_v5, 0.0 }
 0x167   :  { %v661_v63 = vpop.f32.mrf.mxu0  ;;  %v789_v0 = vpop.f32.mrf.mxu1  ;;  %v1125_v5 = vadd.f32 %v1124_v49, %v1123_v56  ;;  %v930_v33 = vadd.f32 %v929_v61, %v928_v9 }
 0x168   :  { %v1126_v63 = vsel %vm815_vm0, %v1038_v11, 0.0 }
 0x169   :  { %v664_v13 = vpop.f32.mrf.mxu0  ;;  %v2206_v8 = vpop.f32.mrf.mxu1  ;;  %v1127_v16 = vadd.f32 %v1126_v63, %v1125_v5 }
 0x16a   :  { %842 = vst.msk [vmem:[%s2459_s2 + $0xd0] sm:$0xff] %vm815_vm0, %v664_v13  ;;  %874 = vst.msk [vmem:[%s2459_s2 + $0x1d0] sm:$0xff] %vm815_vm0, %v2206_v8  ;;  %v1039_v55 = vmul.f32 %v664_v13, %v664_v13  ;;  %v931_v0 = vsel %vm815_vm0, %v664_v13, 0.0 }
 0x16b   :  { %v666_v23 = vpop.f32.mrf.mxu0  ;;  %v794_v24 = vpop.f32.mrf.mxu1  ;;  %v932_v27 = vadd.f32 %v931_v0, %v930_v33  ;;  %v1045_v33 = vmul.f32 %v1742_v18, %v1742_v18 }
 0x16c   :  { %v1128_v57 = vsel %vm815_vm0, %v1039_v55, 0.0 }
 0x16d   :  { %v667_v51 = vpop.f32.mrf.mxu0  ;;  %v2222_v36 = vpop.f32.mrf.mxu1  ;;  %v1129_v45 = vadd.f32 %v1128_v57, %v1127_v16 }
 0x16e   :  { %843 = vst.msk [vmem:[%s2459_s2 + $0xd8] sm:$0xff] %vm815_vm0, %v667_v51  ;;  %875 = vst.msk [vmem:[%s2459_s2 + $0x1d8] sm:$0xff] %vm815_vm0, %v2222_v36  ;;  %v1040_v29 = vmul.f32 %v667_v51, %v667_v51  ;;  %v933_v13 = vsel %vm815_vm0, %v667_v51, 0.0 }
 0x16f   :  { %v669_v44 = vpop.f32.mrf.mxu0  ;;  %v797_v47 = vpop.f32.mrf.mxu1  ;;  %v934_v32 = vadd.f32 %v933_v13, %v932_v27  ;;  %v943_v27 = vsel %vm815_vm0, %v1742_v18, 0.0  ;;  %v947_v18 = vsel %vm815_vm0, %v1770_v26, 0.0 }
 0x170   :  { %v1130_v23 = vsel %vm815_vm0, %v1040_v29, 0.0 }
 0x171   :  { %v672_v17 = vpop.f32.mrf.mxu0  ;;  %v2237_v59 = vpop.f32.mrf.mxu1  ;;  %v1131_v25 = vadd.f32 %v1130_v23, %v1129_v45  ;;  %v1140_v45 = vsel %vm815_vm0, %v1045_v33, 0.0 }
 0x172   :  { %844 = vst.msk [vmem:[%s2459_s2 + $0xe0] sm:$0xff] %vm815_vm0, %v672_v17  ;;  %876 = vst.msk [vmem:[%s2459_s2 + $0x1e0] sm:$0xff] %vm815_vm0, %v2237_v59  ;;  %v1041_v15 = vmul.f32 %v672_v17, %v672_v17  ;;  %v935_v24 = vsel %vm815_vm0, %v672_v17, 0.0 }
 0x173   :  { %v674_v4 = vpop.f32.mrf.mxu0  ;;  %v802_v7 = vpop.f32.mrf.mxu1  ;;  %v936_v11 = vadd.f32 %v935_v24, %v934_v32  ;;  %v945_v32 = vsel %vm815_vm0, %v1756_v22, 0.0 }
 0x174   :  { %v1132_v51 = vsel %vm815_vm0, %v1041_v15, 0.0 }
 0x175   :  { %v675_v37 = vpop.f32.mrf.mxu0  ;;  %v2252_v19 = vpop.f32.mrf.mxu1  ;;  %v1133_v61 = vadd.f32 %v1132_v51, %v1131_v25  ;;  %v1048_v25 = vmul.f32 %v1784_v30, %v1784_v30 }
 0x176   :  { %845 = vst.msk [vmem:[%s2459_s2 + $0xe8] sm:$0xff] %vm815_vm0, %v675_v37  ;;  %v1042_v41 = vmul.f32 %v675_v37, %v675_v37  ;;  %877 = vst.msk [vmem:[%s2459_s2 + $0x1e8] sm:$0xff] %vm815_vm0, %v2252_v19  ;;  %v937_v39 = vsel %vm815_vm0, %v675_v37, 0.0  ;;  %v1046_v37 = vmul.f32 %v1756_v22, %v1756_v22  ;;  %v949_v22 = vsel %vm815_vm0, %v1784_v30, 0.0 }
 0x177   :  { %v677_v35 = vpop.f32.mrf.mxu0  ;;  %v805_v1 = vpop.f32.mrf.mxu1  ;;  %v938_v55 = vadd.f32 %v937_v39, %v936_v11  ;;  %v953_v30 = vsel %vm815_vm0, %v1812_v38, 0.0 }
 0x178   :  { %v1134_v44 = vsel %vm815_vm0, %v1042_v41, 0.0  ;;  %v1047_v35 = vmul.f32 %v1770_v26, %v1770_v26  ;;  %v1142_v39 = vsel %vm815_vm0, %v1046_v37, 0.0  ;;  %v951_v26 = vsel %vm815_vm0, %v1798_v34, 0.0 }
 0x179   :  { %v680_v53 = vpop.f32.mrf.mxu0  ;;  %v2267_v40 = vpop.f32.mrf.mxu1  ;;  %v1135_v63 = vadd.f32 %v1134_v44, %v1133_v61 }
 0x17a   :  { %846 = vst.msk [vmem:[%s2459_s2 + $0xf0] sm:$0xff] %vm815_vm0, %v680_v53  ;;  %v939_v47 = vsel %vm815_vm0, %v680_v53, 0.0  ;;  %v1043_v49 = vmul.f32 %v680_v53, %v680_v53  ;;  %878 = vst.msk [vmem:[%s2459_s2 + $0x1f0] sm:$0xff] %vm815_vm0, %v2267_v40  ;;  %v1144_v44 = vsel %vm815_vm0, %v1047_v35, 0.0  ;;  %v1055_v35 = vmul.f32 %v1882_v58, %v1882_v58 }
 0x17b   :  { %v682_v56 = vpop.f32.mrf.mxu0  ;;  %v810_v9 = vpop.f32.mrf.mxu1  ;;  %v940_v0 = vadd.f32 %v939_v47, %v938_v55  ;;  %v1049_v47 = vmul.f32 %v1798_v34, %v1798_v34  ;;  %v1146_v55 = vsel %vm815_vm0, %v1048_v25, 0.0  ;;  %v955_v34 = vsel %vm815_vm0, %v1826_v42, 0.0 }
 0x17c   :  { %v1136_v17 = vsel %vm815_vm0, %v1043_v49, 0.0  ;;  %v1050_v56 = vmul.f32 %v1812_v38, %v1812_v38  ;;  %v957_v38 = vsel %vm815_vm0, %v1840_v46, 0.0 }
 0x17d   :  { %v683_v29 = vpop.f32.mrf.mxu0  ;;  %v2281_v5 = vpop.f32.mrf.mxu1  ;;  %v1137_v57 = vadd.f32 %v1136_v17, %v1135_v63  ;;  %v1148_v63 = vsel %vm815_vm0, %v1049_v47, 0.0 }
 0x17e   :  { %847 = vst.msk [vmem:[%s2459_s2 + $0xf8] sm:$0xff] %vm815_vm0, %v683_v29  ;;  %v941_v4 = vsel %vm815_vm0, %v683_v29, 0.0  ;;  %v1044_v7 = vmul.f32 %v683_v29, %v683_v29  ;;  %879 = vst.msk [vmem:[%s2459_s2 + $0x1f8] sm:$0xff] %vm815_vm0, %v2281_v5 }
 0x17f   :  { %v942_v13 = vadd.f32 %v941_v4, %v940_v0  ;;  %v685_v15 = vpop.f32.mrf.mxu0  ;;  %v813_v16 = vpop.f32.mrf.mxu1  ;;  %v1051_v0 = vmul.f32 %v1826_v42, %v1826_v42  ;;  %v1150_v4 = vsel %vm815_vm0, %v1050_v56, 0.0  ;;  %v959_v42 = vsel %vm815_vm0, %v1854_v50, 0.0 }
 0x180   :  { %v1138_v23 = vsel %vm815_vm0, %v1044_v7, 0.0  ;;  %v1052_v7 = vmul.f32 %v1840_v46, %v1840_v46  ;;  %v1053_v16 = vmul.f32 %v1854_v50, %v1854_v50  ;;  %v961_v46 = vsel %vm815_vm0, %v1868_v54, 0.0 }
 0x181   :  { %v944_v24 = vadd.f32 %v943_v27, %v942_v13  ;;  %v1139_v41 = vadd.f32 %v1138_v23, %v1137_v57  ;;  %v1152_v15 = vsel %vm815_vm0, %v1051_v0, 0.0  ;;  %v963_v50 = vsel %vm815_vm0, %v1882_v58, 0.0 }
 0x182   :  { %v1154_v23 = vsel %vm815_vm0, %v1052_v7, 0.0  ;;  %v967_v58 = vsel %vm815_vm0, %v1910_v2, 0.0  ;;  %v1060_v0 = vmul.f32 %v1952_v14, %v1952_v14 }
 0x183   :  { %v946_v1 = vadd.f32 %v945_v32, %v944_v24  ;;  %v1141_v51 = vadd.f32 %v1140_v45, %v1139_v41  ;;  %v1054_v24 = vmul.f32 %v1868_v54, %v1868_v54  ;;  %v1156_v32 = vsel %vm815_vm0, %v1053_v16, 0.0 }
 0x184   :  { %v965_v54 = vsel %vm815_vm0, %v1896_v62, 0.0 }
 0x185   :  { %v948_v11 = vadd.f32 %v947_v18, %v946_v1  ;;  %v1143_v53 = vadd.f32 %v1142_v39, %v1141_v51  ;;  %v1158_v39 = vsel %vm815_vm0, %v1054_v24, 0.0  ;;  %v1056_v18 = vmul.f32 %v1896_v62, %v1896_v62 }
 0x186   :  { %v969_v62 = vsel %vm815_vm0, %v1924_v6, 0.0 }
 0x187   :  { %v950_v49 = vadd.f32 %v949_v22, %v948_v11  ;;  %v1145_v61 = vadd.f32 %v1144_v44, %v1143_v53  ;;  %v1160_v53 = vsel %vm815_vm0, %v1055_v35, 0.0  ;;  %v1057_v44 = vmul.f32 %v1910_v2, %v1910_v2 }
 0x188   :  { %v971_v2 = vsel %vm815_vm0, %v1938_v10, 0.0  ;;  %v1065_v35 = vmul.f32 %v2073_v60, %v2073_v60 }
 0x189   :  { %v952_v9 = vadd.f32 %v951_v26, %v950_v49  ;;  %v1147_v17 = vadd.f32 %v1146_v55, %v1145_v61  ;;  %v1162_v49 = vsel %vm815_vm0, %v1056_v18, 0.0  ;;  %v1058_v61 = vmul.f32 %v1924_v6, %v1924_v6 }
 0x18a   :  { %v1164_v56 = vsel %vm815_vm0, %v1057_v44, 0.0  ;;  %v973_v6 = vsel %vm815_vm0, %v1952_v14, 0.0  ;;  %v977_v14 = vsel %vm815_vm0, %v2001_v52, 0.0 }
 0x18b   :  { %v954_v29 = vadd.f32 %v953_v30, %v952_v9  ;;  %v1149_v33 = vadd.f32 %v1148_v63, %v1147_v17  ;;  %v1059_v9 = vmul.f32 %v1938_v10, %v1938_v10  ;;  %v1166_v30 = vsel %vm815_vm0, %v1058_v61, 0.0 }
 0x18c   :  { %v975_v10 = vsel %vm815_vm0, %v1974_v28, 0.0 }
 0x18d   :  { %v956_v57 = vadd.f32 %v955_v34, %v954_v29  ;;  %v1151_v13 = vadd.f32 %v1150_v4, %v1149_v33  ;;  %v1168_v4 = vsel %vm815_vm0, %v1059_v9, 0.0  ;;  %v1061_v34 = vmul.f32 %v1974_v28, %v1974_v28 }
 0x18e   :  { %v979_v28 = vsel %vm815_vm0, %v2025_v12, 0.0  ;;  %v1070_v9 = vmul.f32 %v2185_v48, %v2185_v48 }
 0x18f   :  { %v958_v27 = vadd.f32 %v957_v38, %v956_v57  ;;  %v1153_v37 = vadd.f32 %v1152_v15, %v1151_v13  ;;  %v1170_v13 = vsel %vm815_vm0, %v1060_v0, 0.0  ;;  %v1062_v15 = vmul.f32 %v2001_v52, %v2001_v52 }
 0x190   :  { %v981_v52 = vsel %vm815_vm0, %v2049_v21, 0.0 }
 0x191   :  { %v1155_v41 = vadd.f32 %v1154_v23, %v1153_v37  ;;  %v960_v45 = vadd.f32 %v959_v42, %v958_v27  ;;  %v1172_v27 = vsel %vm815_vm0, %v1061_v34, 0.0  ;;  %v1063_v37 = vmul.f32 %v2025_v12, %v2025_v12 }
 0x192   :  { %v1174_v24 = vsel %vm815_vm0, %v1062_v15, 0.0  ;;  %v983_v12 = vsel %vm815_vm0, %v2073_v60, 0.0  ;;  %v987_v60 = vsel %vm815_vm0, %v2121_v43, 0.0 }
 0x193   :  { %v962_v1 = vadd.f32 %v961_v46, %v960_v45  ;;  %v1157_v51 = vadd.f32 %v1156_v32, %v1155_v41  ;;  %v1064_v41 = vmul.f32 %v2049_v21, %v2049_v21  ;;  %v1176_v46 = vsel %vm815_vm0, %v1063_v37, 0.0 }
 0x194   :  { %v985_v21 = vsel %vm815_vm0, %v2097_v20, 0.0  ;;  %v1075_v37 = vmul.f32 %v2267_v40, %v2267_v40 }
 0x195   :  { %v964_v25 = vadd.f32 %v963_v50, %v962_v1  ;;  %v1159_v11 = vadd.f32 %v1158_v39, %v1157_v51  ;;  %v1178_v39 = vsel %vm815_vm0, %v1064_v41, 0.0  ;;  %v1066_v50 = vmul.f32 %v2097_v20, %v2097_v20 }
 0x196   :  { %v989_v20 = vsel %vm815_vm0, %v2143_v3, 0.0 }
 0x197   :  { %v966_v22 = vadd.f32 %v965_v54, %v964_v25  ;;  %v1161_v47 = vadd.f32 %v1160_v53, %v1159_v11  ;;  %v1180_v11 = vsel %vm815_vm0, %v1065_v35, 0.0  ;;  %v1067_v53 = vmul.f32 %v2121_v43, %v2121_v43 }
 0x198   :  { %v991_v43 = vsel %vm815_vm0, %v2164_v31, 0.0 }
 0x199   :  { %v968_v55 = vadd.f32 %v967_v58, %v966_v22  ;;  %v1163_v26 = vadd.f32 %v1162_v49, %v1161_v47  ;;  %v1182_v22 = vsel %vm815_vm0, %v1066_v50, 0.0  ;;  %v1068_v47 = vmul.f32 %v2143_v3, %v2143_v3 }
 0x19a   :  { %v1184_v61 = vsel %vm815_vm0, %v1067_v53, 0.0  ;;  %v993_v3 = vsel %vm815_vm0, %v2185_v48, 0.0  ;;  %v997_v48 = vsel %vm815_vm0, %v2222_v36, 0.0 }
 0x19b   :  { %v970_v17 = vadd.f32 %v969_v62, %v968_v55  ;;  %v1165_v63 = vadd.f32 %v1164_v56, %v1163_v26  ;;  %v1069_v55 = vmul.f32 %v2164_v31, %v2164_v31  ;;  %v1186_v62 = vsel %vm815_vm0, %v1068_v47, 0.0 }
 0x19c   :  { %v995_v31 = vsel %vm815_vm0, %v2206_v8, 0.0 }
 0x19d   :  { %v972_v29 = vadd.f32 %v971_v2, %v970_v17  ;;  %v1167_v33 = vadd.f32 %v1166_v30, %v1165_v63  ;;  %v1188_v30 = vsel %vm815_vm0, %v1069_v55, 0.0  ;;  %v1071_v2 = vmul.f32 %v2206_v8, %v2206_v8 }
 0x19e   :  { %v999_v8 = vsel %vm815_vm0, %v2237_v59, 0.0 }
 0x19f   :  { %v974_v7 = vadd.f32 %v973_v6, %v972_v29  ;;  %v1169_v57 = vadd.f32 %v1168_v4, %v1167_v33  ;;  %v1190_v33 = vsel %vm815_vm0, %v1070_v9, 0.0  ;;  %v1072_v4 = vmul.f32 %v2222_v36, %v2222_v36 }
 0x1a0   :  { %v1001_v36 = vsel %vm815_vm0, %v2252_v19, 0.0 }
 0x1a1   :  { %v976_v38 = vadd.f32 %v975_v10, %v974_v7  ;;  %v1171_v16 = vadd.f32 %v1170_v13, %v1169_v57  ;;  %v1192_v7 = vsel %vm815_vm0, %v1071_v2, 0.0  ;;  %v1073_v57 = vmul.f32 %v2237_v59, %v2237_v59 }
 0x1a2   :  { %v1194_v15 = vsel %vm815_vm0, %v1072_v4, 0.0  ;;  %v1003_v59 = vsel %vm815_vm0, %v2267_v40, 0.0 }
 0x1a3   :  { %v978_v23 = vadd.f32 %v977_v14, %v976_v38  ;;  %v1173_v42 = vadd.f32 %v1172_v27, %v1171_v16  ;;  %v1074_v38 = vmul.f32 %v2252_v19, %v2252_v19  ;;  %v1196_v14 = vsel %vm815_vm0, %v1073_v57, 0.0 }
 0x1a4   :  { %v1005_v19 = vsel %vm815_vm0, %v2281_v5, 0.0 }
 0x1a5   :  { %v1175_v45 = vadd.f32 %v1174_v24, %v1173_v42  ;;  %v980_v32 = vadd.f32 %v979_v28, %v978_v23  ;;  %v1198_v24 = vsel %vm815_vm0, %v1074_v38, 0.0  ;;  %v1076_v28 = vmul.f32 %v2281_v5, %v2281_v5 }
 0x1a7   :  { %v1177_v1 = vadd.f32 %v1176_v46, %v1175_v45  ;;  %v982_v51 = vadd.f32 %v981_v52, %v980_v32  ;;  %v1200_v32 = vsel %vm815_vm0, %v1075_v37, 0.0  ;;  %v1202_v35 = vsel %vm815_vm0, %v1076_v28, 0.0 }
 0x1a9   :  { %v1179_v18 = vadd.f32 %v1178_v39, %v1177_v1  ;;  %v984_v25 = vadd.f32 %v983_v12, %v982_v51 }
 0x1ab   :  { %v1181_v54 = vadd.f32 %v1180_v11, %v1179_v18  ;;  %v986_v44 = vadd.f32 %v985_v21, %v984_v25 }
 0x1ad   :  { %v1183_v49 = vadd.f32 %v1182_v22, %v1181_v54  ;;  %v988_v58 = vadd.f32 %v987_v60, %v986_v44 }
 0x1af   :  { %v1185_v26 = vadd.f32 %v1184_v61, %v1183_v49  ;;  %v990_v56 = vadd.f32 %v989_v20, %v988_v58 }
 0x1b1   :  { %v1187_v17 = vadd.f32 %v1186_v62, %v1185_v26  ;;  %v992_v63 = vadd.f32 %v991_v43, %v990_v56 }
 0x1b3   :  { %v1189_v0 = vadd.f32 %v1188_v30, %v1187_v17  ;;  %v994_v29 = vadd.f32 %v993_v3, %v992_v63 }
 0x1b5   :  { %v1191_v6 = vadd.f32 %v1190_v33, %v1189_v0  ;;  %v996_v34 = vadd.f32 %v995_v31, %v994_v29 }
 0x1b7   :  { %v1193_v13 = vadd.f32 %v1192_v7, %v1191_v6  ;;  %v998_v10 = vadd.f32 %v997_v48, %v996_v34 }
 0x1b9   :  { %v1195_v16 = vadd.f32 %v1194_v15, %v1193_v13  ;;  %v1000_v27 = vadd.f32 %v999_v8, %v998_v10 }
 0x1bb   :  { %v1197_v23 = vadd.f32 %v1196_v14, %v1195_v16  ;;  %v1002_v42 = vadd.f32 %v1001_v36, %v1000_v27 }
 0x1bd   :  { %v1199_v41 = vadd.f32 %v1198_v24, %v1197_v23  ;;  %v1004_v45 = vadd.f32 %v1003_v59, %v1002_v42 }
 0x1bf   :  { %v1201_v46 = vadd.f32 %v1200_v32, %v1199_v41  ;;  %v1006_v52 = vadd.f32 %v1005_v19, %v1004_v45 }
 0x1c1   :  { %v1007_v1 = vrot.slane %v1006_v52, 4  ;;  %v1203_v51 = vadd.f32 %v1202_v35, %v1201_v46 }
 0x1c3   :  { %v1008_v39 = vadd.f32 %v1007_v1, %v1006_v52  ;;  %v1204_v12 = vrot.slane %v1203_v51, 4 }
 0x1c5   :  { %v1009_v50 = vrot.slane %v1008_v39, 2  ;;  %v1205_v40 = vadd.f32 %v1204_v12, %v1203_v51 }
 0x1c7   :  { %v1010_v18 = vadd.f32 %v1009_v50, %v1008_v39  ;;  %v1206_v25 = vrot.slane %v1205_v40, 2 }
 0x1c9   :  { %v1011_v11 = vrot.slane %v1010_v18, 1  ;;  %v1207_v21 = vadd.f32 %v1206_v25, %v1205_v40 }
 0x1cb   :  { %v1208_v53 = vrot.slane %v1207_v21, 1  ;;  %v1012_v54 = vadd.f32 %v1011_v11, %v1010_v18 }
 0x1cd   :  { %v1209_v44 = vadd.f32 %v1208_v53, %v1207_v21 }
 0x1cf   :  { %v1211_v5 = vsel %vm1210_vm1, %v1012_v54, %v1209_v44 }
 0x1d0   :  { %1213 = vst.msk [vmem:[%s2460_s3] sm:$0x3] %vm1212_vm2, %v1211_v5 }

// kernel: generator_forward.34
= control target key start
LH: loop header
LB: loop body
LE: loop exit
PB: predicated region body
PF: predicated region fallthrough
CT: control target
= control target key end

     0   :  { %v80_v0 = vlaneseq  ;;  %s1146_s1 = inlined_call_operand.vmem [shape: f32[1,1024], index: 1, kind: input, shape index: {}]   ;;  %s1147_s2 = inlined_call_operand.vmem [shape: f32[1,1024], index: 2, kind: input, shape index: {}]   ;;  %s1148_s0 = inlined_call_operand.vmem [shape: f32[64,1024], index: 0, kind: input, shape index: {}]   ;;  %s1149_s3 = inlined_call_operand.vmem [shape: f32[64,1024], index: 3, kind: output, shape index: {}]  }
   0x1   :  { %v78_v2 = vld [vmem:[%s1146_s1] sm:$0xff]  ;;  %v15_v9 = vld [vmem:[%s1148_s0 + $0x8] sm:$0xff]  ;;  %v16_v18 = vld [vmem:[%s1148_s0 + $0x10] sm:$0xff] }
   0x2   :  { %v570_v1 = vshrl.u32 %v80_v0, 7  ;;  %v578_v3 = vld [vmem:[%s1147_s2] sm:$0xff]  ;;  %v17_v19 = vld [vmem:[%s1148_s0 + $0x18] sm:$0xff]  ;;  %v19_v29 = vld [vmem:[%s1148_s0 + $0x28] sm:$0xff] }
   0x3   :  { %v14_v8 = vld [vmem:[%s1148_s0] sm:$0xff]  ;;  %v20_v41 = vld [vmem:[%s1148_s0 + $0x30] sm:$0xff]  ;;  %v21_v51 = vld [vmem:[%s1148_s0 + $0x38] sm:$0xff] }
   0x4   :  { %v82_v4 = vsub.s32 0, %v570_v1  ;;  %v86_v5 = vsub.s32 1, %v570_v1  ;;  %v90_v6 = vsub.s32 2, %v570_v1  ;;  %v94_v7 = vsub.s32 3, %v570_v1  ;;  %v18_v24 = vld [vmem:[%s1148_s0 + $0x20] sm:$0xff]  ;;  %v23_v57 = vld [vmem:[%s1148_s0 + $0x48] sm:$0xff] }
   0x5   :  { %v98_v10 = vsub.s32 4, %v570_v1  ;;  %v102_v11 = vsub.s32 5, %v570_v1  ;;  %v106_v12 = vsub.s32 6, %v570_v1  ;;  %v110_v13 = vsub.s32 7, %v570_v1  ;;  %v22_v52 = vld [vmem:[%s1148_s0 + $0x40] sm:$0xff]  ;;  %v24_v58 = vld [vmem:[%s1148_s0 + $0x50] sm:$0xff] }
   0x6   :  { %v594_v14 = vrot.slane %v78_v2, %v82_v4  ;;  %v597_v15 = vrot.slane %v578_v3, %v82_v4  ;;  %v599_v16 = vrot.slane %v78_v2, %v86_v5  ;;  %v602_v17 = vrot.slane %v578_v3, %v86_v5  ;;  %v25_v1 = vld [vmem:[%s1148_s0 + $0x58] sm:$0xff] }
   0x7   :  { %v610_v20 = vrot.slane %v78_v2, %v90_v6  ;;  %v613_v21 = vrot.slane %v578_v3, %v90_v6  ;;  %v615_v22 = vrot.slane %v78_v2, %v94_v7  ;;  %v618_v23 = vrot.slane %v578_v3, %v94_v7 }
   0x8   :  { %v120_v25 = vmul.f32 %v594_v14, %v14_v8  ;;  %v121_v26 = vmul.f32 %v599_v16, %v15_v9  ;;  %v625_v27 = vrot.slane %v78_v2, %v98_v10  ;;  %v628_v28 = vrot.slane %v578_v3, %v98_v10 }
   0x9   :  { %v122_v30 = vmul.f32 %v610_v20, %v16_v18  ;;  %v123_v31 = vmul.f32 %v615_v22, %v17_v19  ;;  %v635_v32 = vrot.slane %v78_v2, %v102_v11  ;;  %v638_v33 = vrot.slane %v578_v3, %v102_v11 }
   0xa   :  { %v226_v34 = vadd.f32 %v597_v15, %v120_v25  ;;  %v227_v35 = vadd.f32 %v602_v17, %v121_v26  ;;  %v124_v36 = vmul.f32 %v625_v27, %v18_v24  ;;  %v643_v37 = vrot.slane %v78_v2, %v106_v12  ;;  %v27_v24 = vld [vmem:[%s1148_s0 + $0x68] sm:$0xff]  ;;  %v28_v25 = vld [vmem:[%s1148_s0 + $0x70] sm:$0xff] }
   0xb   :  { %v228_v38 = vadd.f32 %v613_v21, %v122_v30  ;;  %v229_v39 = vadd.f32 %v618_v23, %v123_v31  ;;  %v125_v40 = vmul.f32 %v635_v32, %v19_v29  ;;  %v652_v42 = vrot.slane %v578_v3, %v106_v12 }
   0xc   :  { %vm290_vm0 = vcmp.ge.f32.partialorder %v226_v34, 0.0  ;;  %v354_v43 = vmul.f32 0.2, %v226_v34  ;;  %vm291_vm1 = vcmp.ge.f32.partialorder %v227_v35, 0.0  ;;  %v355_v44 = vmul.f32 0.2, %v227_v35 }
   0xd   :  { %vm292_vm2 = vcmp.ge.f32.partialorder %v228_v38, 0.0  ;;  %v356_v45 = vmul.f32 0.2, %v228_v38  ;;  %vm293_vm3 = vcmp.ge.f32.partialorder %v229_v39, 0.0  ;;  %v357_v46 = vmul.f32 0.2, %v229_v39 }
   0xe   :  { %v418_v47 = vsel %vm290_vm0, %v226_v34, %v354_v43  ;;  %v419_v48 = vsel %vm291_vm1, %v227_v35, %v355_v44  ;;  %v230_v49 = vadd.f32 %v628_v28, %v124_v36  ;;  %v231_v50 = vadd.f32 %v638_v33, %v125_v40  ;;  %v29_v36 = vld [vmem:[%s1148_s0 + $0x78] sm:$0xff]  ;;  %v30_v43 = vld [vmem:[%s1148_s0 + $0x80] sm:$0xff]  ;;  %v31_v44 = vld [vmem:[%s1148_s0 + $0x88] sm:$0xff] }
   0xf   :  { %482 = vst [vmem:[%s1149_s3] sm:$0xff] %v418_v47  ;;  %483 = vst [vmem:[%s1149_s3 + $0x8] sm:$0xff] %v419_v48  ;;  %v420_v53 = vsel %vm292_vm2, %v228_v38, %v356_v45  ;;  %v421_v54 = vsel %vm293_vm3, %v229_v39, %v357_v46  ;;  %v126_v55 = vmul.f32 %v643_v37, %v20_v41  ;;  %v32_v45 = vld [vmem:[%s1148_s0 + $0x90] sm:$0xff] }
  0x10   :  { %v669_v56 = vrot.slane %v78_v2, %v110_v13  ;;  %484 = vst [vmem:[%s1149_s3 + $0x10] sm:$0xff] %v420_v53  ;;  %485 = vst [vmem:[%s1149_s3 + $0x18] sm:$0xff] %v421_v54  ;;  %vm294_vm4 = vcmp.ge.f32.partialorder %v230_v49, 0.0  ;;  %v358_v59 = vmul.f32 0.2, %v230_v49  ;;  %vm295_vm5 = vcmp.ge.f32.partialorder %v231_v50, 0.0 }
  0x11   :  { %v359_v60 = vmul.f32 0.2, %v231_v50  ;;  %v232_v61 = vadd.f32 %v652_v42, %v126_v55  ;;  %v686_v63 = vrot.slane %v578_v3, %v110_v13  ;;  %v128_v0 = vmul.f32 %v594_v14, %v22_v52  ;;  %v26_v2 = vld [vmem:[%s1148_s0 + $0x60] sm:$0xff] }
  0x12   :  { %v127_v62 = vmul.f32 %v669_v56, %v21_v51  ;;  %v422_v4 = vsel %vm294_vm4, %v230_v49, %v358_v59  ;;  %v129_v6 = vmul.f32 %v599_v16, %v23_v57  ;;  %v130_v7 = vmul.f32 %v610_v20, %v24_v58  ;;  %v33_v57 = vld [vmem:[%s1148_s0 + $0x98] sm:$0xff]  ;;  %v34_v58 = vld [vmem:[%s1148_s0 + $0xa0] sm:$0xff] }
  0x13   :  { %v423_v5 = vsel %vm295_vm5, %v231_v50, %v359_v60  ;;  %486 = vst [vmem:[%s1149_s3 + $0x20] sm:$0xff] %v422_v4  ;;  %vm296_vm6 = vcmp.ge.f32.partialorder %v232_v61, 0.0  ;;  %v360_v3 = vmul.f32 0.2, %v232_v61  ;;  %v234_v9 = vadd.f32 %v597_v15, %v128_v0 }
  0x14   :  { %487 = vst [vmem:[%s1149_s3 + $0x28] sm:$0xff] %v423_v5  ;;  %v233_v8 = vadd.f32 %v686_v63, %v127_v62  ;;  %v235_v10 = vadd.f32 %v602_v17, %v129_v6  ;;  %v236_v11 = vadd.f32 %v613_v21, %v130_v7  ;;  %v131_v12 = vmul.f32 %v615_v22, %v25_v1 }
  0x15   :  { %v132_v13 = vmul.f32 %v625_v27, %v26_v2  ;;  %v424_v18 = vsel %vm296_vm6, %v232_v61, %v360_v3  ;;  %vm298_vm8 = vcmp.ge.f32.partialorder %v234_v9, 0.0  ;;  %v362_v26 = vmul.f32 0.2, %v234_v9 }
  0x16   :  { %vm297_vm7 = vcmp.ge.f32.partialorder %v233_v8, 0.0  ;;  %v361_v19 = vmul.f32 0.2, %v233_v8  ;;  %488 = vst [vmem:[%s1149_s3 + $0x30] sm:$0xff] %v424_v18  ;;  %vm299_vm9 = vcmp.ge.f32.partialorder %v235_v10, 0.0  ;;  %vm300_vm10 = vcmp.ge.f32.partialorder %v236_v11, 0.0 }
  0x17   :  { %v363_v29 = vmul.f32 0.2, %v235_v10  ;;  %v364_v31 = vmul.f32 0.2, %v236_v11  ;;  %v237_v34 = vadd.f32 %v618_v23, %v131_v12  ;;  %v238_v35 = vadd.f32 %v628_v28, %v132_v13 }
  0x18   :  { %v425_v30 = vsel %vm297_vm7, %v233_v8, %v361_v19  ;;  %v426_v38 = vsel %vm298_vm8, %v234_v9, %v362_v26  ;;  %v133_v40 = vmul.f32 %v635_v32, %v27_v24  ;;  %v134_v41 = vmul.f32 %v643_v37, %v28_v25  ;;  %v35_v8 = vld [vmem:[%s1148_s0 + $0xa8] sm:$0xff]  ;;  %v36_v9 = vld [vmem:[%s1148_s0 + $0xb0] sm:$0xff]  ;;  %v37_v24 = vld [vmem:[%s1148_s0 + $0xb8] sm:$0xff] }
  0x19   :  { %489 = vst [vmem:[%s1149_s3 + $0x38] sm:$0xff] %v425_v30  ;;  %v427_v39 = vsel %vm299_vm9, %v235_v10, %v363_v29  ;;  %490 = vst [vmem:[%s1149_s3 + $0x40] sm:$0xff] %v426_v38  ;;  %v428_v46 = vsel %vm300_vm10, %v236_v11, %v364_v31  ;;  %vm301_vm11 = vcmp.ge.f32.partialorder %v237_v34, 0.0  ;;  %v365_v47 = vmul.f32 0.2, %v237_v34  ;;  %v38_v31 = vld [vmem:[%s1148_s0 + $0xc0] sm:$0xff] }
  0x1a   :  { %491 = vst [vmem:[%s1149_s3 + $0x48] sm:$0xff] %v427_v39  ;;  %vm302_vm12 = vcmp.ge.f32.partialorder %v238_v35, 0.0  ;;  %492 = vst [vmem:[%s1149_s3 + $0x50] sm:$0xff] %v428_v46  ;;  %v366_v48 = vmul.f32 0.2, %v238_v35  ;;  %v239_v49 = vadd.f32 %v638_v33, %v133_v40  ;;  %v240_v50 = vadd.f32 %v652_v42, %v134_v41 }
  0x1b   :  { %v135_v51 = vmul.f32 %v669_v56, %v29_v36  ;;  %v429_v52 = vsel %vm301_vm11, %v237_v34, %v365_v47  ;;  %v136_v53 = vmul.f32 %v594_v14, %v30_v43  ;;  %v137_v54 = vmul.f32 %v599_v16, %v31_v44  ;;  %v39_v34 = vld [vmem:[%s1148_s0 + $0xc8] sm:$0xff] }
  0x1c   :  { %v138_v55 = vmul.f32 %v610_v20, %v32_v45  ;;  %493 = vst [vmem:[%s1149_s3 + $0x58] sm:$0xff] %v429_v52  ;;  %v430_v59 = vsel %vm302_vm12, %v238_v35, %v366_v48  ;;  %vm303_vm13 = vcmp.ge.f32.partialorder %v239_v49, 0.0  ;;  %v367_v60 = vmul.f32 0.2, %v239_v49  ;;  %v40_v35 = vld [vmem:[%s1148_s0 + $0xd0] sm:$0xff]  ;;  %v41_v48 = vld [vmem:[%s1148_s0 + $0xd8] sm:$0xff] }
  0x1d   :  { %vm304_vm14 = vcmp.ge.f32.partialorder %v240_v50, 0.0  ;;  %494 = vst [vmem:[%s1149_s3 + $0x60] sm:$0xff] %v430_v59  ;;  %v368_v61 = vmul.f32 0.2, %v240_v50  ;;  %v241_v62 = vadd.f32 %v686_v63, %v135_v51  ;;  %v242_v0 = vadd.f32 %v597_v15, %v136_v53 }
  0x1e   :  { %v243_v1 = vadd.f32 %v602_v17, %v137_v54  ;;  %v431_v2 = vsel %vm303_vm13, %v239_v49, %v367_v60  ;;  %v244_v4 = vadd.f32 %v613_v21, %v138_v55  ;;  %v139_v5 = vmul.f32 %v615_v22, %v33_v57  ;;  %v42_v49 = vld [vmem:[%s1148_s0 + $0xe0] sm:$0xff] }
  0x1f   :  { %v140_v6 = vmul.f32 %v625_v27, %v34_v58  ;;  %495 = vst [vmem:[%s1149_s3 + $0x68] sm:$0xff] %v431_v2  ;;  %v432_v7 = vsel %vm304_vm14, %v240_v50, %v368_v61  ;;  %vm305_vm15 = vcmp.ge.f32.partialorder %v241_v62, 0.0  ;;  %v369_v3 = vmul.f32 0.2, %v241_v62 }
  0x20   :  { %vm306_vm0 = vcmp.ge.f32.partialorder %v242_v0, 0.0  ;;  %496 = vst [vmem:[%s1149_s3 + $0x70] sm:$0xff] %v432_v7  ;;  %v370_v10 = vmul.f32 0.2, %v242_v0  ;;  %vm307_vm1 = vcmp.ge.f32.partialorder %v243_v1, 0.0  ;;  %vm308_vm2 = vcmp.ge.f32.partialorder %v244_v4, 0.0 }
  0x21   :  { %v371_v11 = vmul.f32 0.2, %v243_v1  ;;  %v433_v12 = vsel %vm305_vm15, %v241_v62, %v369_v3  ;;  %v372_v13 = vmul.f32 0.2, %v244_v4  ;;  %v245_v18 = vadd.f32 %v618_v23, %v139_v5 }
  0x22   :  { %v246_v19 = vadd.f32 %v628_v28, %v140_v6  ;;  %497 = vst [vmem:[%s1149_s3 + $0x78] sm:$0xff] %v433_v12  ;;  %v434_v25 = vsel %vm306_vm0, %v242_v0, %v370_v10  ;;  %v141_v29 = vmul.f32 %v635_v32, %v35_v8  ;;  %v142_v30 = vmul.f32 %v643_v37, %v36_v9  ;;  %v43_v0 = vld [vmem:[%s1148_s0 + $0xe8] sm:$0xff]  ;;  %v45_v8 = vld [vmem:[%s1148_s0 + $0xf8] sm:$0xff] }
  0x23   :  { %v435_v26 = vsel %vm307_vm1, %v243_v1, %v371_v11  ;;  %498 = vst [vmem:[%s1149_s3 + $0x80] sm:$0xff] %v434_v25  ;;  %v436_v36 = vsel %vm308_vm2, %v244_v4, %v372_v13  ;;  %vm309_vm3 = vcmp.ge.f32.partialorder %v245_v18, 0.0  ;;  %v373_v38 = vmul.f32 0.2, %v245_v18  ;;  %v44_v1 = vld [vmem:[%s1148_s0 + $0xf0] sm:$0xff]  ;;  %v46_v13 = vld [vmem:[%s1148_s0 + $0x100] sm:$0xff] }
  0x24   :  { %499 = vst [vmem:[%s1149_s3 + $0x88] sm:$0xff] %v435_v26  ;;  %vm310_vm4 = vcmp.ge.f32.partialorder %v246_v19, 0.0  ;;  %500 = vst [vmem:[%s1149_s3 + $0x90] sm:$0xff] %v436_v36  ;;  %v374_v39 = vmul.f32 0.2, %v246_v19  ;;  %v247_v40 = vadd.f32 %v638_v33, %v141_v29  ;;  %v248_v41 = vadd.f32 %v652_v42, %v142_v30 }
  0x25   :  { %v143_v43 = vmul.f32 %v669_v56, %v37_v24  ;;  %v437_v44 = vsel %vm309_vm3, %v245_v18, %v373_v38  ;;  %v144_v45 = vmul.f32 %v594_v14, %v38_v31  ;;  %v145_v46 = vmul.f32 %v599_v16, %v39_v34  ;;  %v47_v18 = vld [vmem:[%s1148_s0 + $0x108] sm:$0xff] }
  0x26   :  { %v146_v47 = vmul.f32 %v610_v20, %v40_v35  ;;  %501 = vst [vmem:[%s1149_s3 + $0x98] sm:$0xff] %v437_v44  ;;  %v438_v50 = vsel %vm310_vm4, %v246_v19, %v374_v39  ;;  %vm311_vm5 = vcmp.ge.f32.partialorder %v247_v40, 0.0  ;;  %v375_v51 = vmul.f32 0.2, %v247_v40  ;;  %v48_v19 = vld [vmem:[%s1148_s0 + $0x110] sm:$0xff]  ;;  %v49_v39 = vld [vmem:[%s1148_s0 + $0x118] sm:$0xff] }
  0x27   :  { %vm312_vm6 = vcmp.ge.f32.partialorder %v248_v41, 0.0  ;;  %502 = vst [vmem:[%s1149_s3 + $0xa0] sm:$0xff] %v438_v50  ;;  %v376_v52 = vmul.f32 0.2, %v248_v41  ;;  %v249_v53 = vadd.f32 %v686_v63, %v143_v43  ;;  %v250_v54 = vadd.f32 %v597_v15, %v144_v45 }
  0x28   :  { %v251_v55 = vadd.f32 %v602_v17, %v145_v46  ;;  %v439_v57 = vsel %vm311_vm5, %v247_v40, %v375_v51  ;;  %v252_v58 = vadd.f32 %v613_v21, %v146_v47  ;;  %v147_v59 = vmul.f32 %v615_v22, %v41_v48  ;;  %v50_v40 = vld [vmem:[%s1148_s0 + $0x120] sm:$0xff] }
  0x29   :  { %v148_v60 = vmul.f32 %v625_v27, %v42_v49  ;;  %503 = vst [vmem:[%s1149_s3 + $0xa8] sm:$0xff] %v439_v57  ;;  %v440_v61 = vsel %vm312_vm6, %v248_v41, %v376_v52  ;;  %vm313_vm7 = vcmp.ge.f32.partialorder %v249_v53, 0.0  ;;  %v377_v62 = vmul.f32 0.2, %v249_v53 }
  0x2a   :  { %vm314_vm8 = vcmp.ge.f32.partialorder %v250_v54, 0.0  ;;  %504 = vst [vmem:[%s1149_s3 + $0xb0] sm:$0xff] %v440_v61  ;;  %v378_v2 = vmul.f32 0.2, %v250_v54  ;;  %vm315_vm9 = vcmp.ge.f32.partialorder %v251_v55, 0.0  ;;  %vm316_vm10 = vcmp.ge.f32.partialorder %v252_v58, 0.0 }
  0x2b   :  { %v379_v4 = vmul.f32 0.2, %v251_v55  ;;  %v441_v5 = vsel %vm313_vm7, %v249_v53, %v377_v62  ;;  %v380_v6 = vmul.f32 0.2, %v252_v58  ;;  %v253_v7 = vadd.f32 %v618_v23, %v147_v59 }
  0x2c   :  { %v254_v3 = vadd.f32 %v628_v28, %v148_v60  ;;  %505 = vst [vmem:[%s1149_s3 + $0xb8] sm:$0xff] %v441_v5  ;;  %v442_v9 = vsel %vm314_vm8, %v250_v54, %v378_v2  ;;  %v149_v11 = vmul.f32 %v635_v32, %v43_v0  ;;  %v150_v12 = vmul.f32 %v643_v37, %v44_v1  ;;  %v51_v54 = vld [vmem:[%s1148_s0 + $0x128] sm:$0xff]  ;;  %v53_v0 = vld [vmem:[%s1148_s0 + $0x138] sm:$0xff] }
  0x2d   :  { %v443_v10 = vsel %vm315_vm9, %v251_v55, %v379_v4  ;;  %506 = vst [vmem:[%s1149_s3 + $0xc0] sm:$0xff] %v442_v9  ;;  %v444_v24 = vsel %vm316_vm10, %v252_v58, %v380_v6  ;;  %vm317_vm11 = vcmp.ge.f32.partialorder %v253_v7, 0.0  ;;  %v381_v25 = vmul.f32 0.2, %v253_v7  ;;  %v52_v55 = vld [vmem:[%s1148_s0 + $0x130] sm:$0xff]  ;;  %v54_v6 = vld [vmem:[%s1148_s0 + $0x140] sm:$0xff] }
  0x2e   :  { %507 = vst [vmem:[%s1149_s3 + $0xc8] sm:$0xff] %v443_v10  ;;  %vm318_vm12 = vcmp.ge.f32.partialorder %v254_v3, 0.0  ;;  %508 = vst [vmem:[%s1149_s3 + $0xd0] sm:$0xff] %v444_v24  ;;  %v382_v26 = vmul.f32 0.2, %v254_v3  ;;  %v255_v29 = vadd.f32 %v638_v33, %v149_v11  ;;  %v256_v30 = vadd.f32 %v652_v42, %v150_v12 }
  0x2f   :  { %v151_v31 = vmul.f32 %v669_v56, %v45_v8  ;;  %v445_v34 = vsel %vm317_vm11, %v253_v7, %v381_v25  ;;  %v152_v35 = vmul.f32 %v594_v14, %v46_v13  ;;  %v153_v36 = vmul.f32 %v599_v16, %v47_v18  ;;  %v55_v7 = vld [vmem:[%s1148_s0 + $0x148] sm:$0xff] }
  0x30   :  { %v154_v38 = vmul.f32 %v610_v20, %v48_v19  ;;  %509 = vst [vmem:[%s1149_s3 + $0xd8] sm:$0xff] %v445_v34  ;;  %v446_v41 = vsel %vm318_vm12, %v254_v3, %v382_v26  ;;  %vm319_vm13 = vcmp.ge.f32.partialorder %v255_v29, 0.0  ;;  %v383_v43 = vmul.f32 0.2, %v255_v29  ;;  %v56_v3 = vld [vmem:[%s1148_s0 + $0x150] sm:$0xff]  ;;  %v57_v26 = vld [vmem:[%s1148_s0 + $0x158] sm:$0xff] }
  0x31   :  { %vm320_vm14 = vcmp.ge.f32.partialorder %v256_v30, 0.0  ;;  %510 = vst [vmem:[%s1149_s3 + $0xe0] sm:$0xff] %v446_v41  ;;  %v384_v44 = vmul.f32 0.2, %v256_v30  ;;  %v257_v45 = vadd.f32 %v686_v63, %v151_v31  ;;  %v258_v46 = vadd.f32 %v597_v15, %v152_v35 }
  0x32   :  { %v259_v47 = vadd.f32 %v602_v17, %v153_v36  ;;  %v447_v48 = vsel %vm319_vm13, %v255_v29, %v383_v43  ;;  %v260_v49 = vadd.f32 %v613_v21, %v154_v38  ;;  %v155_v50 = vmul.f32 %v615_v22, %v49_v39  ;;  %v58_v29 = vld [vmem:[%s1148_s0 + $0x160] sm:$0xff] }
  0x33   :  { %v156_v51 = vmul.f32 %v625_v27, %v50_v40  ;;  %511 = vst [vmem:[%s1149_s3 + $0xe8] sm:$0xff] %v447_v48  ;;  %v448_v52 = vsel %vm320_vm14, %v256_v30, %v384_v44  ;;  %vm321_vm15 = vcmp.ge.f32.partialorder %v257_v45, 0.0  ;;  %v385_v53 = vmul.f32 0.2, %v257_v45 }
  0x34   :  { %vm322_vm0 = vcmp.ge.f32.partialorder %v258_v46, 0.0  ;;  %512 = vst [vmem:[%s1149_s3 + $0xf0] sm:$0xff] %v448_v52  ;;  %v386_v57 = vmul.f32 0.2, %v258_v46  ;;  %vm323_vm1 = vcmp.ge.f32.partialorder %v259_v47, 0.0  ;;  %vm324_vm2 = vcmp.ge.f32.partialorder %v260_v49, 0.0 }
  0x35   :  { %v387_v58 = vmul.f32 0.2, %v259_v47  ;;  %v449_v59 = vsel %vm321_vm15, %v257_v45, %v385_v53  ;;  %v388_v60 = vmul.f32 0.2, %v260_v49  ;;  %v261_v61 = vadd.f32 %v618_v23, %v155_v50 }
  0x36   :  { %v262_v62 = vadd.f32 %v628_v28, %v156_v51  ;;  %513 = vst [vmem:[%s1149_s3 + $0xf8] sm:$0xff] %v449_v59  ;;  %v450_v1 = vsel %vm322_vm0, %v258_v46, %v386_v57  ;;  %v157_v4 = vmul.f32 %v635_v32, %v51_v54  ;;  %v158_v5 = vmul.f32 %v643_v37, %v52_v55  ;;  %v59_v46 = vld [vmem:[%s1148_s0 + $0x168] sm:$0xff]  ;;  %v61_v54 = vld [vmem:[%s1148_s0 + $0x178] sm:$0xff] }
  0x37   :  { %v451_v2 = vsel %vm323_vm1, %v259_v47, %v387_v58  ;;  %514 = vst [vmem:[%s1149_s3 + $0x100] sm:$0xff] %v450_v1  ;;  %v452_v8 = vsel %vm324_vm2, %v260_v49, %v388_v60  ;;  %vm325_vm3 = vcmp.ge.f32.partialorder %v261_v61, 0.0  ;;  %v389_v9 = vmul.f32 0.2, %v261_v61  ;;  %v60_v47 = vld [vmem:[%s1148_s0 + $0x170] sm:$0xff]  ;;  %v62_v60 = vld [vmem:[%s1148_s0 + $0x180] sm:$0xff] }
  0x38   :  { %515 = vst [vmem:[%s1149_s3 + $0x108] sm:$0xff] %v451_v2  ;;  %vm326_vm4 = vcmp.ge.f32.partialorder %v262_v62, 0.0  ;;  %516 = vst [vmem:[%s1149_s3 + $0x110] sm:$0xff] %v452_v8  ;;  %v390_v10 = vmul.f32 0.2, %v262_v62  ;;  %v263_v11 = vadd.f32 %v638_v33, %v157_v4  ;;  %v264_v12 = vadd.f32 %v652_v42, %v158_v5 }
  0x39   :  { %v159_v13 = vmul.f32 %v669_v56, %v53_v0  ;;  %v453_v18 = vsel %vm325_vm3, %v261_v61, %v389_v9  ;;  %v160_v19 = vmul.f32 %v594_v14, %v54_v6  ;;  %v161_v24 = vmul.f32 %v599_v16, %v55_v7  ;;  %v63_v61 = vld [vmem:[%s1148_s0 + $0x188] sm:$0xff] }
  0x3a   :  { %v162_v25 = vmul.f32 %v610_v20, %v56_v3  ;;  %517 = vst [vmem:[%s1149_s3 + $0x118] sm:$0xff] %v453_v18  ;;  %v454_v30 = vsel %vm326_vm4, %v262_v62, %v390_v10  ;;  %vm327_vm5 = vcmp.ge.f32.partialorder %v263_v11, 0.0  ;;  %v391_v31 = vmul.f32 0.2, %v263_v11  ;;  %v64_v62 = vld [vmem:[%s1148_s0 + $0x190] sm:$0xff]  ;;  %v65_v10 = vld [vmem:[%s1148_s0 + $0x198] sm:$0xff] }
  0x3b   :  { %vm328_vm6 = vcmp.ge.f32.partialorder %v264_v12, 0.0  ;;  %518 = vst [vmem:[%s1149_s3 + $0x120] sm:$0xff] %v454_v30  ;;  %v392_v34 = vmul.f32 0.2, %v264_v12  ;;  %v265_v35 = vadd.f32 %v686_v63, %v159_v13  ;;  %v266_v36 = vadd.f32 %v597_v15, %v160_v19 }
  0x3c   :  { %v267_v38 = vadd.f32 %v602_v17, %v161_v24  ;;  %v455_v39 = vsel %vm327_vm5, %v263_v11, %v391_v31  ;;  %v268_v40 = vadd.f32 %v613_v21, %v162_v25  ;;  %v163_v41 = vmul.f32 %v615_v22, %v57_v26  ;;  %v66_v11 = vld [vmem:[%s1148_s0 + $0x1a0] sm:$0xff] }
  0x3d   :  { %v164_v43 = vmul.f32 %v625_v27, %v58_v29  ;;  %519 = vst [vmem:[%s1149_s3 + $0x128] sm:$0xff] %v455_v39  ;;  %v456_v44 = vsel %vm328_vm6, %v264_v12, %v392_v34  ;;  %vm329_vm7 = vcmp.ge.f32.partialorder %v265_v35, 0.0  ;;  %v393_v45 = vmul.f32 0.2, %v265_v35 }
  0x3e   :  { %vm330_vm8 = vcmp.ge.f32.partialorder %v266_v36, 0.0  ;;  %520 = vst [vmem:[%s1149_s3 + $0x130] sm:$0xff] %v456_v44  ;;  %v394_v48 = vmul.f32 0.2, %v266_v36  ;;  %vm331_vm9 = vcmp.ge.f32.partialorder %v267_v38, 0.0  ;;  %vm332_vm10 = vcmp.ge.f32.partialorder %v268_v40, 0.0 }
  0x3f   :  { %v395_v49 = vmul.f32 0.2, %v267_v38  ;;  %v457_v50 = vsel %vm329_vm7, %v265_v35, %v393_v45  ;;  %v396_v51 = vmul.f32 0.2, %v268_v40  ;;  %v269_v52 = vadd.f32 %v618_v23, %v163_v41 }
  0x40   :  { %v270_v53 = vadd.f32 %v628_v28, %v164_v43  ;;  %521 = vst [vmem:[%s1149_s3 + $0x138] sm:$0xff] %v457_v50  ;;  %v458_v55 = vsel %vm330_vm8, %v266_v36, %v394_v48  ;;  %v165_v58 = vmul.f32 %v635_v32, %v59_v46  ;;  %v166_v59 = vmul.f32 %v643_v37, %v60_v47  ;;  %v67_v36 = vld [vmem:[%s1148_s0 + $0x1a8] sm:$0xff]  ;;  %v69_v46 = vld [vmem:[%s1148_s0 + $0x1b8] sm:$0xff] }
  0x41   :  { %v459_v57 = vsel %vm331_vm9, %v267_v38, %v395_v49  ;;  %522 = vst [vmem:[%s1149_s3 + $0x140] sm:$0xff] %v458_v55  ;;  %v460_v0 = vsel %vm332_vm10, %v268_v40, %v396_v51  ;;  %vm333_vm11 = vcmp.ge.f32.partialorder %v269_v52, 0.0  ;;  %v397_v1 = vmul.f32 0.2, %v269_v52  ;;  %v68_v38 = vld [vmem:[%s1148_s0 + $0x1b0] sm:$0xff]  ;;  %v70_v51 = vld [vmem:[%s1148_s0 + $0x1c0] sm:$0xff] }
  0x42   :  { %523 = vst [vmem:[%s1149_s3 + $0x148] sm:$0xff] %v459_v57  ;;  %vm334_vm12 = vcmp.ge.f32.partialorder %v270_v53, 0.0  ;;  %524 = vst [vmem:[%s1149_s3 + $0x150] sm:$0xff] %v460_v0  ;;  %v398_v2 = vmul.f32 0.2, %v270_v53  ;;  %v271_v4 = vadd.f32 %v638_v33, %v165_v58  ;;  %v272_v5 = vadd.f32 %v652_v42, %v166_v59 }
  0x43   :  { %v167_v6 = vmul.f32 %v669_v56, %v61_v54  ;;  %v461_v7 = vsel %vm333_vm11, %v269_v52, %v397_v1  ;;  %v168_v3 = vmul.f32 %v594_v14, %v62_v60  ;;  %v169_v8 = vmul.f32 %v599_v16, %v63_v61  ;;  %v71_v52 = vld [vmem:[%s1148_s0 + $0x1c8] sm:$0xff] }
  0x44   :  { %v170_v9 = vmul.f32 %v610_v20, %v64_v62  ;;  %525 = vst [vmem:[%s1149_s3 + $0x158] sm:$0xff] %v461_v7  ;;  %v462_v12 = vsel %vm334_vm12, %v270_v53, %v398_v2  ;;  %vm335_vm13 = vcmp.ge.f32.partialorder %v271_v4, 0.0  ;;  %v399_v13 = vmul.f32 0.2, %v271_v4  ;;  %v72_v53 = vld [vmem:[%s1148_s0 + $0x1d0] sm:$0xff]  ;;  %v73_v2 = vld [vmem:[%s1148_s0 + $0x1d8] sm:$0xff] }
  0x45   :  { %vm336_vm14 = vcmp.ge.f32.partialorder %v272_v5, 0.0  ;;  %526 = vst [vmem:[%s1149_s3 + $0x160] sm:$0xff] %v462_v12  ;;  %v400_v18 = vmul.f32 0.2, %v272_v5  ;;  %v273_v19 = vadd.f32 %v686_v63, %v167_v6  ;;  %v274_v24 = vadd.f32 %v597_v15, %v168_v3 }
  0x46   :  { %v275_v25 = vadd.f32 %v602_v17, %v169_v8  ;;  %v463_v26 = vsel %vm335_vm13, %v271_v4, %v399_v13  ;;  %v276_v29 = vadd.f32 %v613_v21, %v170_v9  ;;  %v171_v30 = vmul.f32 %v615_v22, %v65_v10  ;;  %v74_v4 = vld [vmem:[%s1148_s0 + $0x1e0] sm:$0xff] }
  0x47   :  { %v172_v31 = vmul.f32 %v625_v27, %v66_v11  ;;  %527 = vst [vmem:[%s1149_s3 + $0x168] sm:$0xff] %v463_v26  ;;  %v464_v34 = vsel %vm336_vm14, %v272_v5, %v400_v18  ;;  %vm337_vm15 = vcmp.ge.f32.partialorder %v273_v19, 0.0  ;;  %v401_v35 = vmul.f32 0.2, %v273_v19 }
  0x48   :  { %vm338_vm0 = vcmp.ge.f32.partialorder %v274_v24, 0.0  ;;  %528 = vst [vmem:[%s1149_s3 + $0x170] sm:$0xff] %v464_v34  ;;  %v402_v39 = vmul.f32 0.2, %v274_v24  ;;  %vm339_vm1 = vcmp.ge.f32.partialorder %v275_v25, 0.0  ;;  %vm340_vm2 = vcmp.ge.f32.partialorder %v276_v29, 0.0 }
  0x49   :  { %v403_v40 = vmul.f32 0.2, %v275_v25  ;;  %v465_v41 = vsel %vm337_vm15, %v273_v19, %v401_v35  ;;  %v404_v43 = vmul.f32 0.2, %v276_v29  ;;  %v277_v44 = vadd.f32 %v618_v23, %v171_v30 }
  0x4a   :  { %v278_v45 = vadd.f32 %v628_v28, %v172_v31  ;;  %529 = vst [vmem:[%s1149_s3 + $0x178] sm:$0xff] %v465_v41  ;;  %v466_v47 = vsel %vm338_vm0, %v274_v24, %v402_v39  ;;  %v173_v49 = vmul.f32 %v635_v32, %v67_v36  ;;  %v174_v50 = vmul.f32 %v643_v37, %v68_v38  ;;  %v77_v24 = vld [vmem:[%s1148_s0 + $0x1f8] sm:$0xff] }
  0x4b   :  { %v467_v48 = vsel %vm339_vm1, %v275_v25, %v403_v40  ;;  %530 = vst [vmem:[%s1149_s3 + $0x180] sm:$0xff] %v466_v47  ;;  %v468_v54 = vsel %vm340_vm2, %v276_v29, %v404_v43  ;;  %vm341_vm3 = vcmp.ge.f32.partialorder %v277_v44, 0.0  ;;  %v405_v55 = vmul.f32 0.2, %v277_v44 }
  0x4c   :  { %531 = vst [vmem:[%s1149_s3 + $0x188] sm:$0xff] %v467_v48  ;;  %vm342_vm4 = vcmp.ge.f32.partialorder %v278_v45, 0.0  ;;  %532 = vst [vmem:[%s1149_s3 + $0x190] sm:$0xff] %v468_v54  ;;  %v406_v57 = vmul.f32 0.2, %v278_v45  ;;  %v279_v58 = vadd.f32 %v638_v33, %v173_v49  ;;  %v280_v59 = vadd.f32 %v652_v42, %v174_v50 }
  0x4d   :  { %v175_v60 = vmul.f32 %v669_v56, %v69_v46  ;;  %v469_v61 = vsel %vm341_vm3, %v277_v44, %v405_v55  ;;  %v176_v62 = vmul.f32 %v594_v14, %v70_v51  ;;  %v177_v0 = vmul.f32 %v599_v16, %v71_v52 }
  0x4e   :  { %v178_v1 = vmul.f32 %v610_v20, %v72_v53  ;;  %533 = vst [vmem:[%s1149_s3 + $0x198] sm:$0xff] %v469_v61  ;;  %v470_v5 = vsel %vm342_vm4, %v278_v45, %v406_v57  ;;  %vm343_vm5 = vcmp.ge.f32.partialorder %v279_v58, 0.0  ;;  %v407_v6 = vmul.f32 0.2, %v279_v58 }
  0x4f   :  { %vm344_vm6 = vcmp.ge.f32.partialorder %v280_v59, 0.0  ;;  %534 = vst [vmem:[%s1149_s3 + $0x1a0] sm:$0xff] %v470_v5  ;;  %v408_v14 = vmul.f32 0.2, %v280_v59  ;;  %v281_v16 = vadd.f32 %v686_v63, %v175_v60  ;;  %v282_v20 = vadd.f32 %v597_v15, %v176_v62  ;;  %v75_v15 = vld [vmem:[%s1148_s0 + $0x1e8] sm:$0xff] }
  0x50   :  { %v283_v7 = vadd.f32 %v602_v17, %v177_v0  ;;  %v471_v3 = vsel %vm343_vm5, %v279_v58, %v407_v6  ;;  %v284_v8 = vadd.f32 %v613_v21, %v178_v1  ;;  %v179_v9 = vmul.f32 %v615_v22, %v73_v2  ;;  %v76_v17 = vld [vmem:[%s1148_s0 + $0x1f0] sm:$0xff] }
  0x51   :  { %v180_v10 = vmul.f32 %v625_v27, %v74_v4  ;;  %535 = vst [vmem:[%s1149_s3 + $0x1a8] sm:$0xff] %v471_v3  ;;  %v472_v11 = vsel %vm344_vm6, %v280_v59, %v408_v14  ;;  %vm345_vm7 = vcmp.ge.f32.partialorder %v281_v16, 0.0  ;;  %v409_v12 = vmul.f32 0.2, %v281_v16 }
  0x52   :  { %vm346_vm8 = vcmp.ge.f32.partialorder %v282_v20, 0.0  ;;  %536 = vst [vmem:[%s1149_s3 + $0x1b0] sm:$0xff] %v472_v11  ;;  %v410_v21 = vmul.f32 0.2, %v282_v20  ;;  %vm347_vm9 = vcmp.ge.f32.partialorder %v283_v7, 0.0  ;;  %vm348_vm10 = vcmp.ge.f32.partialorder %v284_v8, 0.0 }
  0x53   :  { %v411_v22 = vmul.f32 0.2, %v283_v7  ;;  %v473_v27 = vsel %vm345_vm7, %v281_v16, %v409_v12  ;;  %v412_v13 = vmul.f32 0.2, %v284_v8  ;;  %v285_v18 = vadd.f32 %v618_v23, %v179_v9 }
  0x54   :  { %v286_v19 = vadd.f32 %v628_v28, %v180_v10  ;;  %537 = vst [vmem:[%s1149_s3 + $0x1b8] sm:$0xff] %v473_v27  ;;  %v474_v25 = vsel %vm346_vm8, %v282_v20, %v410_v21  ;;  %v181_v29 = vmul.f32 %v635_v32, %v75_v15  ;;  %v182_v30 = vmul.f32 %v643_v37, %v76_v17 }
  0x55   :  { %v475_v26 = vsel %vm347_vm9, %v283_v7, %v411_v22  ;;  %538 = vst [vmem:[%s1149_s3 + $0x1c0] sm:$0xff] %v474_v25  ;;  %v476_v23 = vsel %vm348_vm10, %v284_v8, %v412_v13  ;;  %vm349_vm11 = vcmp.ge.f32.partialorder %v285_v18, 0.0  ;;  %v413_v28 = vmul.f32 0.2, %v285_v18 }
  0x56   :  { %539 = vst [vmem:[%s1149_s3 + $0x1c8] sm:$0xff] %v475_v26  ;;  %vm350_vm12 = vcmp.ge.f32.partialorder %v286_v19, 0.0  ;;  %540 = vst [vmem:[%s1149_s3 + $0x1d0] sm:$0xff] %v476_v23  ;;  %v414_v31 = vmul.f32 0.2, %v286_v19  ;;  %v287_v32 = vadd.f32 %v638_v33, %v181_v29  ;;  %v288_v37 = vadd.f32 %v652_v42, %v182_v30 }
  0x57   :  { %v183_v34 = vmul.f32 %v669_v56, %v77_v24  ;;  %v477_v35 = vsel %vm349_vm11, %v285_v18, %v413_v28 }
  0x58   :  { %541 = vst [vmem:[%s1149_s3 + $0x1d8] sm:$0xff] %v477_v35  ;;  %v478_v36 = vsel %vm350_vm12, %v286_v19, %v414_v31  ;;  %vm351_vm13 = vcmp.ge.f32.partialorder %v287_v32, 0.0  ;;  %v415_v38 = vmul.f32 0.2, %v287_v32  ;;  %vm352_vm14 = vcmp.ge.f32.partialorder %v288_v37, 0.0 }
  0x59   :  { %542 = vst [vmem:[%s1149_s3 + $0x1e0] sm:$0xff] %v478_v36  ;;  %v416_v39 = vmul.f32 0.2, %v288_v37  ;;  %v289_v33 = vadd.f32 %v686_v63, %v183_v34 }
  0x5a   :  { %v479_v40 = vsel %vm351_vm13, %v287_v32, %v415_v38 }
  0x5b   :  { %543 = vst [vmem:[%s1149_s3 + $0x1e8] sm:$0xff] %v479_v40  ;;  %v480_v42 = vsel %vm352_vm14, %v288_v37, %v416_v39  ;;  %vm353_vm15 = vcmp.ge.f32.partialorder %v289_v33, 0.0  ;;  %v417_v56 = vmul.f32 0.2, %v289_v33 }
  0x5c   :  { %544 = vst [vmem:[%s1149_s3 + $0x1f0] sm:$0xff] %v480_v42 }
  0x5d   :  { %v481_v41 = vsel %vm353_vm15, %v289_v33, %v417_v56 }
  0x5e   :  { %545 = vst [vmem:[%s1149_s3 + $0x1f8] sm:$0xff] %v481_v41 }

// kernel: generator_forward.35
= control target key start
LH: loop header
LB: loop body
LE: loop exit
PB: predicated region body
PF: predicated region fallthrough
CT: control target
= control target key end

     0   :  { %s2015_s12 = smov 0   ;;  %s2563_s0 = inlined_call_operand.vmem [shape: bf16[2048,32], index: 0, kind: input, shape index: {}]   ;;  %s2564_s1 = inlined_call_operand.vmem [shape: bf16[32,3], index: 1, kind: input, shape index: {}]   ;;  %s2565_s2 = inlined_call_operand.vmem [shape: f32[1,3], index: 2, kind: input, shape index: {}]   ;;  %s2566_s3 = inlined_call_operand.vmem [shape: f32[2048,3], index: 3, kind: output, shape index: {}]  }
   0x1 LB: > { %s1569_s13 = sadd.s32 4294967295, %s1993_s12   ;;  %p1573_p0 = scmp.ge.s32.totalorder %s1993_s12, 1  ;;  %s1993_s12 = sphi %s2015_s12, %s13_s12  }
   0x2   : > { %p138_p1 = scmp.lt.s32.totalorder %s1993_s12, 3 }
   0x4   : > { %p139_p2 = pnand %p1573_p0, %p138_p1 }
   0x5   : > { %s1574_s16 = sshll.u32 (!%p139_p2), %s1569_s13, 7 }
   0x6   : > { %142 = sbr.rel (%p139_p2) target bundleno = 342 (0x156), region = 32  ;;  %p163_p3 = scmp.lt.s32.totalorder (!%p139_p2), %s1574_s16, 255 }
   0xb   : > { %v1921_v0 = vld [vmem:[%s2564_s1 + $0x8] sm:$0xff]   ;;  %v1922_v1 = vld [vmem:[%s2564_s1] sm:$0xff]   ;;  %s2568_s16 = smov (!%p163_p3, %s1574_s16), 255  ;;  %vm646_vm0 = vcmask 261120   ;;  %vm1384_vm1 = vcmask 23552  }
   0xc   : > { %1777 = vmatprep.subr.bf16.mxu0 %v1921_v0  ;;  %1909 = vmatprep.subr.bf16.mxu1 %v1921_v0  ;;  %s1575_s19 = sshll.u32 %s2568_s16, 2  ;;  %s1577_s23 = sshll.u32 %s2568_s16, 3 }
   0xd   : > { %1778 = vmatpush3.bf16.msra.mxu0 %v1921_v0  ;;  %1911 = vmatpush3.bf16.msra.mxu1 %v1921_v0  ;;  %s2035_s22 = scalar_lea.vmem %s2563_s0, %s1575_s19  ;;  %s2174_s28 = scalar_lea.vmem %s2566_s3, %s1577_s23 }
   0xe   : > { %1779 = vmatprep.subr.bf16.mxu0 %v1922_v1  ;;  %1910 = vmatprep.subr.bf16.mxu1 %v1922_v1  ;;  %v1923_v2 = vld [vmem:[%s2035_s22] sm:$0xff]   ;;  %v1925_v4 = vld [vmem:[%s2035_s22 + $0x8] sm:$0xff]   ;;  %v1927_v6 = vld [vmem:[%s2035_s22 + $0x10] sm:$0xff]  }
   0xf   : > { %v1924_v3 = vld [vmem:[%s2035_s22 + $0x100] sm:$0xff]   ;;  %1781 = vmatprep.mubr.msk.bf16.mxu0 %vm646_vm0, %v1923_v2  ;;  %v1926_v5 = vld [vmem:[%s2035_s22 + $0x108] sm:$0xff]   ;;  %v1928_v7 = vld [vmem:[%s2035_s22 + $0x110] sm:$0xff]  }
  0x10   : > { %1845 = vmatprep.mubr.msk.bf16.mxu1 %vm646_vm0, %v1924_v3  ;;  %v1929_v8 = vld [vmem:[%s2035_s22 + $0x18] sm:$0xff]   ;;  %v1931_v10 = vld [vmem:[%s2035_s22 + $0x20] sm:$0xff]   ;;  %v1933_v12 = vld [vmem:[%s2035_s22 + $0x28] sm:$0xff]  }
  0x11   : > { %1780 = vmatpush3.bf16.msra.mxu0 %v1922_v1  ;;  %1912 = vmatpush3.bf16.msra.mxu1 %v1922_v1  ;;  %v1930_v9 = vld [vmem:[%s2035_s22 + $0x118] sm:$0xff]   ;;  %v1932_v11 = vld [vmem:[%s2035_s22 + $0x120] sm:$0xff]   ;;  %v1934_v13 = vld [vmem:[%s2035_s22 + $0x128] sm:$0xff]  }
  0x12   : > { %v1935_v14 = vld [vmem:[%s2035_s22 + $0x30] sm:$0xff]   ;;  %v1937_v16 = vld [vmem:[%s2035_s22 + $0x38] sm:$0xff]   ;;  %v1939_v18 = vld [vmem:[%s2035_s22 + $0x40] sm:$0xff]  }
  0x13   : > { %v1936_v15 = vld [vmem:[%s2035_s22 + $0x130] sm:$0xff]   ;;  %v1938_v17 = vld [vmem:[%s2035_s22 + $0x138] sm:$0xff]   ;;  %v1940_v19 = vld [vmem:[%s2035_s22 + $0x140] sm:$0xff]  }
  0x14   : > { %1782 = vmatmul.mubr.msk.bf16.vlgmr.msra.gmra.mxu0 %vm646_vm0, %v1925_v4  ;;  %1846 = vmatmul.mubr.msk.bf16.vlgmr.msra.gmra.mxu1 %vm646_vm0, %v1926_v5  ;;  %v1941_v20 = vld [vmem:[%s2035_s22 + $0x48] sm:$0xff]   ;;  %v1943_v22 = vld [vmem:[%s2035_s22 + $0x50] sm:$0xff]   ;;  %v1945_v24 = vld [vmem:[%s2035_s22 + $0x58] sm:$0xff]  }
  0x15   : > { %1785 = vmatprep.mubr.msk.bf16.mxu0 %vm646_vm0, %v1927_v6  ;;  %1849 = vmatprep.mubr.msk.bf16.mxu1 %vm646_vm0, %v1928_v7  ;;  %v1942_v21 = vld [vmem:[%s2035_s22 + $0x148] sm:$0xff]   ;;  %v1944_v23 = vld [vmem:[%s2035_s22 + $0x150] sm:$0xff]   ;;  %v1946_v25 = vld [vmem:[%s2035_s22 + $0x158] sm:$0xff]  }
  0x16   : > { %v1947_v26 = vld [vmem:[%s2035_s22 + $0x60] sm:$0xff]   ;;  %v1949_v28 = vld [vmem:[%s2035_s22 + $0x68] sm:$0xff]   ;;  %v1951_v30 = vld [vmem:[%s2035_s22 + $0x70] sm:$0xff]  }
  0x17   : > { %v1948_v27 = vld [vmem:[%s2035_s22 + $0x160] sm:$0xff]   ;;  %v1950_v29 = vld [vmem:[%s2035_s22 + $0x168] sm:$0xff]   ;;  %v1952_v31 = vld [vmem:[%s2035_s22 + $0x170] sm:$0xff]  }
  0x18   : > { %v1953_v32 = vld [vmem:[%s2035_s22 + $0x78] sm:$0xff]   ;;  %v1955_v34 = vld [vmem:[%s2035_s22 + $0x80] sm:$0xff]   ;;  %v1957_v36 = vld [vmem:[%s2035_s22 + $0x88] sm:$0xff]  }
  0x19   : > { %v1954_v33 = vld [vmem:[%s2035_s22 + $0x178] sm:$0xff]   ;;  %v1956_v35 = vld [vmem:[%s2035_s22 + $0x180] sm:$0xff]   ;;  %v1958_v37 = vld [vmem:[%s2035_s22 + $0x188] sm:$0xff]  }
  0x1a   : > { %v1959_v38 = vld [vmem:[%s2035_s22 + $0x90] sm:$0xff]   ;;  %v1961_v40 = vld [vmem:[%s2035_s22 + $0x98] sm:$0xff]   ;;  %v1963_v42 = vld [vmem:[%s2035_s22 + $0xa0] sm:$0xff]  }
  0x1b   : > { %v1960_v39 = vld [vmem:[%s2035_s22 + $0x190] sm:$0xff]   ;;  %v1962_v41 = vld [vmem:[%s2035_s22 + $0x198] sm:$0xff]   ;;  %v1964_v43 = vld [vmem:[%s2035_s22 + $0x1a0] sm:$0xff]  }
  0x1c   : > { %1786 = vmatmul.mubr.msk.bf16.gmra.mxu0 %vm646_vm0, %v1929_v8  ;;  %1850 = vmatmul.mubr.msk.bf16.gmra.mxu1 %vm646_vm0, %v1930_v9  ;;  %v1965_v44 = vld [vmem:[%s2035_s22 + $0xa8] sm:$0xff]   ;;  %v1967_v46 = vld [vmem:[%s2035_s22 + $0xb0] sm:$0xff]   ;;  %v1969_v48 = vld [vmem:[%s2035_s22 + $0xb8] sm:$0xff]  }
  0x1d   : > { %1789 = vmatprep.mubr.msk.bf16.mxu0 %vm646_vm0, %v1931_v10  ;;  %1853 = vmatprep.mubr.msk.bf16.mxu1 %vm646_vm0, %v1932_v11  ;;  %v1966_v45 = vld [vmem:[%s2035_s22 + $0x1a8] sm:$0xff]   ;;  %v1968_v47 = vld [vmem:[%s2035_s22 + $0x1b0] sm:$0xff]   ;;  %v1970_v49 = vld [vmem:[%s2035_s22 + $0x1b8] sm:$0xff]  }
  0x1e   : > { %v1971_v50 = vld [vmem:[%s2035_s22 + $0xc0] sm:$0xff]   ;;  %v1973_v52 = vld [vmem:[%s2035_s22 + $0xc8] sm:$0xff]   ;;  %v1975_v54 = vld [vmem:[%s2035_s22 + $0xd0] sm:$0xff]  }
  0x1f   : > { %v1972_v51 = vld [vmem:[%s2035_s22 + $0x1c0] sm:$0xff]   ;;  %v1974_v53 = vld [vmem:[%s2035_s22 + $0x1c8] sm:$0xff]   ;;  %v1976_v55 = vld [vmem:[%s2035_s22 + $0x1d0] sm:$0xff]  }
  0x20   : > { %v1977_v56 = vld [vmem:[%s2035_s22 + $0xd8] sm:$0xff]   ;;  %v1979_v58 = vld [vmem:[%s2035_s22 + $0xe0] sm:$0xff]   ;;  %v1981_v60 = vld [vmem:[%s2035_s22 + $0xe8] sm:$0xff]  }
  0x21   : > { %v1978_v57 = vld [vmem:[%s2035_s22 + $0x1d8] sm:$0xff]   ;;  %v1980_v59 = vld [vmem:[%s2035_s22 + $0x1e0] sm:$0xff]   ;;  %v1982_v61 = vld [vmem:[%s2035_s22 + $0x1e8] sm:$0xff]  }
  0x22   : > { %v1983_v62 = vld [vmem:[%s2035_s22 + $0xf0] sm:$0xff]   ;;  %v1985_v0 = vld [vmem:[%s2035_s22 + $0xf8] sm:$0xff]   ;;  %v2169_v2 = vld [vmem:[%s2565_s2] ss:$0 sm:$0xff] }
  0x23   : > { %v1984_v63 = vld [vmem:[%s2035_s22 + $0x1f0] sm:$0xff]   ;;  %v1986_v1 = vld [vmem:[%s2035_s22 + $0x1f8] sm:$0xff]  }
  0x24   : > { %1790 = vmatmul.mubr.msk.bf16.gmra.mxu0 %vm646_vm0, %v1933_v12  ;;  %1854 = vmatmul.mubr.msk.bf16.gmra.mxu1 %vm646_vm0, %v1934_v13 }
  0x25   : > { %1793 = vmatprep.mubr.msk.bf16.mxu0 %vm646_vm0, %v1935_v14  ;;  %1857 = vmatprep.mubr.msk.bf16.mxu1 %vm646_vm0, %v1936_v15 }
  0x2c   : > { %1794 = vmatmul.mubr.msk.bf16.gmra.mxu0 %vm646_vm0, %v1937_v16  ;;  %1858 = vmatmul.mubr.msk.bf16.gmra.mxu1 %vm646_vm0, %v1938_v17 }
  0x2d   : > { %1797 = vmatprep.mubr.msk.bf16.mxu0 %vm646_vm0, %v1939_v18  ;;  %1861 = vmatprep.mubr.msk.bf16.mxu1 %vm646_vm0, %v1940_v19 }
  0x34   : > { %1798 = vmatmul.mubr.msk.bf16.gmra.mxu0 %vm646_vm0, %v1941_v20  ;;  %1862 = vmatmul.mubr.msk.bf16.gmra.mxu1 %vm646_vm0, %v1942_v21 }
  0x35   : > { %1801 = vmatprep.mubr.msk.bf16.mxu0 %vm646_vm0, %v1943_v22  ;;  %1865 = vmatprep.mubr.msk.bf16.mxu1 %vm646_vm0, %v1944_v23 }
  0x3c   : > { %1802 = vmatmul.mubr.msk.bf16.gmra.mxu0 %vm646_vm0, %v1945_v24  ;;  %1866 = vmatmul.mubr.msk.bf16.gmra.mxu1 %vm646_vm0, %v1946_v25 }
  0x3d   : > { %1805 = vmatprep.mubr.msk.bf16.mxu0 %vm646_vm0, %v1947_v26  ;;  %1869 = vmatprep.mubr.msk.bf16.mxu1 %vm646_vm0, %v1948_v27 }
  0x44   : > { %1806 = vmatmul.mubr.msk.bf16.gmra.mxu0 %vm646_vm0, %v1949_v28  ;;  %1870 = vmatmul.mubr.msk.bf16.gmra.mxu1 %vm646_vm0, %v1950_v29 }
  0x45   : > { %1809 = vmatprep.mubr.msk.bf16.mxu0 %vm646_vm0, %v1951_v30  ;;  %1873 = vmatprep.mubr.msk.bf16.mxu1 %vm646_vm0, %v1952_v31 }
  0x4c   : > { %1810 = vmatmul.mubr.msk.bf16.gmra.mxu0 %vm646_vm0, %v1953_v32  ;;  %1874 = vmatmul.mubr.msk.bf16.gmra.mxu1 %vm646_vm0, %v1954_v33 }
  0x4d   : > { %1813 = vmatprep.mubr.msk.bf16.mxu0 %vm646_vm0, %v1955_v34  ;;  %1877 = vmatprep.mubr.msk.bf16.mxu1 %vm646_vm0, %v1956_v35 }
  0x54   : > { %1814 = vmatmul.mubr.msk.bf16.gmra.mxu0 %vm646_vm0, %v1957_v36  ;;  %1878 = vmatmul.mubr.msk.bf16.gmra.mxu1 %vm646_vm0, %v1958_v37 }
  0x55   : > { %1817 = vmatprep.mubr.msk.bf16.mxu0 %vm646_vm0, %v1959_v38  ;;  %1881 = vmatprep.mubr.msk.bf16.mxu1 %vm646_vm0, %v1960_v39 }
  0x5c   : > { %1818 = vmatmul.mubr.msk.bf16.gmra.mxu0 %vm646_vm0, %v1961_v40  ;;  %1882 = vmatmul.mubr.msk.bf16.gmra.mxu1 %vm646_vm0, %v1962_v41 }
  0x5d   : > { %1821 = vmatprep.mubr.msk.bf16.mxu0 %vm646_vm0, %v1963_v42  ;;  %1885 = vmatprep.mubr.msk.bf16.mxu1 %vm646_vm0, %v1964_v43 }
  0x64   : > { %1822 = vmatmul.mubr.msk.bf16.gmra.mxu0 %vm646_vm0, %v1965_v44  ;;  %1886 = vmatmul.mubr.msk.bf16.gmra.mxu1 %vm646_vm0, %v1966_v45 }
  0x65   : > { %1825 = vmatprep.mubr.msk.bf16.mxu0 %vm646_vm0, %v1967_v46  ;;  %1889 = vmatprep.mubr.msk.bf16.mxu1 %vm646_vm0, %v1968_v47 }
  0x6c   : > { %1826 = vmatmul.mubr.msk.bf16.gmra.mxu0 %vm646_vm0, %v1969_v48  ;;  %1890 = vmatmul.mubr.msk.bf16.gmra.mxu1 %vm646_vm0, %v1970_v49 }
  0x6d   : > { %1829 = vmatprep.mubr.msk.bf16.mxu0 %vm646_vm0, %v1971_v50  ;;  %1893 = vmatprep.mubr.msk.bf16.mxu1 %vm646_vm0, %v1972_v51 }
  0x74   : > { %1830 = vmatmul.mubr.msk.bf16.gmra.mxu0 %vm646_vm0, %v1973_v52  ;;  %1894 = vmatmul.mubr.msk.bf16.gmra.mxu1 %vm646_vm0, %v1974_v53 }
  0x75   : > { %1833 = vmatprep.mubr.msk.bf16.mxu0 %vm646_vm0, %v1975_v54  ;;  %1897 = vmatprep.mubr.msk.bf16.mxu1 %vm646_vm0, %v1976_v55 }
  0x7c   : > { %1834 = vmatmul.mubr.msk.bf16.gmra.mxu0 %vm646_vm0, %v1977_v56  ;;  %1898 = vmatmul.mubr.msk.bf16.gmra.mxu1 %vm646_vm0, %v1978_v57 }
  0x7d   : > { %1837 = vmatprep.mubr.msk.bf16.mxu0 %vm646_vm0, %v1979_v58  ;;  %1901 = vmatprep.mubr.msk.bf16.mxu1 %vm646_vm0, %v1980_v59 }
  0x84   : > { %1838 = vmatmul.mubr.msk.bf16.gmra.mxu0 %vm646_vm0, %v1981_v60  ;;  %1902 = vmatmul.mubr.msk.bf16.gmra.mxu1 %vm646_vm0, %v1982_v61 }
  0x85   : > { %1841 = vmatprep.mubr.msk.bf16.mxu0 %vm646_vm0, %v1983_v62  ;;  %1905 = vmatprep.mubr.msk.bf16.mxu1 %vm646_vm0, %v1984_v63 }
  0x8c   : > { %1842 = vmatmul.mubr.msk.bf16.gmra.mxu0 %vm646_vm0, %v1985_v0  ;;  %1906 = vmatmul.mubr.msk.bf16.gmra.mxu1 %vm646_vm0, %v1986_v1 }
  0xd4   : > { %v1783_v3 = vpop.f32.mrf.mxu0  ;;  %v1847_v5 = vpop.f32.mrf.mxu1 }
  0xd5   : > { %v882_v4 = vadd.f32 %v1783_v3, %v2169_v2  ;;  %v1138_v6 = vadd.f32 %v1847_v5, %v2169_v2 }
  0xd6   : > { %v873_v7 = vpop.f32.mrf.mxu0  ;;  %v1129_v9 = vpop.f32.mrf.mxu1 }
  0xd7   : > { %1387 = vst.msk [vmem:[%s2174_s28 + $0x10] sm:$0xff] %vm1384_vm1, %v882_v4  ;;  %v874_v8 = vadd.f32 %v2169_v2, %v873_v7  ;;  %1451 = vst.msk [vmem:[%s2174_s28 + $0x210] sm:$0xff] %vm1384_vm1, %v1138_v6  ;;  %v1130_v10 = vadd.f32 %v2169_v2, %v1129_v9 }
  0xd8   : > { %v1784_v11 = vpop.f32.mrf.mxu0  ;;  %v1848_v13 = vpop.f32.mrf.mxu1 }
  0xd9   : > { %1385 = vst.msk [vmem:[%s2174_s28] sm:$0xff] %vm1384_vm1, %v874_v8  ;;  %v885_v12 = vadd.f32 %v1784_v11, %v2169_v2  ;;  %1449 = vst.msk [vmem:[%s2174_s28 + $0x200] sm:$0xff] %vm1384_vm1, %v1130_v10  ;;  %v1141_v14 = vadd.f32 %v1848_v13, %v2169_v2 }
  0xda   : > { %v876_v15 = vpop.f32.mrf.mxu0  ;;  %v1132_v17 = vpop.f32.mrf.mxu1 }
  0xdb   : > { %1388 = vst.msk [vmem:[%s2174_s28 + $0x18] sm:$0xff] %vm1384_vm1, %v885_v12  ;;  %v877_v16 = vadd.f32 %v2169_v2, %v876_v15  ;;  %1452 = vst.msk [vmem:[%s2174_s28 + $0x218] sm:$0xff] %vm1384_vm1, %v1141_v14  ;;  %v1133_v18 = vadd.f32 %v2169_v2, %v1132_v17 }
  0xdc   : > { %v1787_v19 = vpop.f32.mrf.mxu0  ;;  %v1851_v21 = vpop.f32.mrf.mxu1 }
  0xdd   : > { %1386 = vst.msk [vmem:[%s2174_s28 + $0x8] sm:$0xff] %vm1384_vm1, %v877_v16  ;;  %v898_v20 = vadd.f32 %v1787_v19, %v2169_v2  ;;  %1450 = vst.msk [vmem:[%s2174_s28 + $0x208] sm:$0xff] %vm1384_vm1, %v1133_v18  ;;  %v1154_v22 = vadd.f32 %v1851_v21, %v2169_v2 }
  0xde   : > { %v889_v23 = vpop.f32.mrf.mxu0  ;;  %v1145_v25 = vpop.f32.mrf.mxu1 }
  0xdf   : > { %1391 = vst.msk [vmem:[%s2174_s28 + $0x30] sm:$0xff] %vm1384_vm1, %v898_v20  ;;  %v890_v24 = vadd.f32 %v2169_v2, %v889_v23  ;;  %1455 = vst.msk [vmem:[%s2174_s28 + $0x230] sm:$0xff] %vm1384_vm1, %v1154_v22  ;;  %v1146_v26 = vadd.f32 %v2169_v2, %v1145_v25 }
  0xe0   : > { %v1788_v27 = vpop.f32.mrf.mxu0  ;;  %v1852_v29 = vpop.f32.mrf.mxu1 }
  0xe1   : > { %1389 = vst.msk [vmem:[%s2174_s28 + $0x20] sm:$0xff] %vm1384_vm1, %v890_v24  ;;  %v901_v28 = vadd.f32 %v1788_v27, %v2169_v2  ;;  %1453 = vst.msk [vmem:[%s2174_s28 + $0x220] sm:$0xff] %vm1384_vm1, %v1146_v26  ;;  %v1157_v30 = vadd.f32 %v1852_v29, %v2169_v2 }
  0xe2   : > { %v892_v31 = vpop.f32.mrf.mxu0  ;;  %v1148_v33 = vpop.f32.mrf.mxu1 }
  0xe3   : > { %1392 = vst.msk [vmem:[%s2174_s28 + $0x38] sm:$0xff] %vm1384_vm1, %v901_v28  ;;  %v893_v32 = vadd.f32 %v2169_v2, %v892_v31  ;;  %1456 = vst.msk [vmem:[%s2174_s28 + $0x238] sm:$0xff] %vm1384_vm1, %v1157_v30  ;;  %v1149_v34 = vadd.f32 %v2169_v2, %v1148_v33 }
  0xe4   : > { %v1791_v35 = vpop.f32.mrf.mxu0  ;;  %v1855_v37 = vpop.f32.mrf.mxu1 }
  0xe5   : > { %1390 = vst.msk [vmem:[%s2174_s28 + $0x28] sm:$0xff] %vm1384_vm1, %v893_v32  ;;  %v914_v36 = vadd.f32 %v1791_v35, %v2169_v2  ;;  %1454 = vst.msk [vmem:[%s2174_s28 + $0x228] sm:$0xff] %vm1384_vm1, %v1149_v34  ;;  %v1170_v38 = vadd.f32 %v1855_v37, %v2169_v2 }
  0xe6   : > { %v905_v39 = vpop.f32.mrf.mxu0  ;;  %v1161_v41 = vpop.f32.mrf.mxu1 }
  0xe7   : > { %1395 = vst.msk [vmem:[%s2174_s28 + $0x50] sm:$0xff] %vm1384_vm1, %v914_v36  ;;  %v906_v40 = vadd.f32 %v2169_v2, %v905_v39  ;;  %1459 = vst.msk [vmem:[%s2174_s28 + $0x250] sm:$0xff] %vm1384_vm1, %v1170_v38  ;;  %v1162_v42 = vadd.f32 %v2169_v2, %v1161_v41 }
  0xe8   : > { %v1792_v43 = vpop.f32.mrf.mxu0  ;;  %v1856_v45 = vpop.f32.mrf.mxu1 }
  0xe9   : > { %1393 = vst.msk [vmem:[%s2174_s28 + $0x40] sm:$0xff] %vm1384_vm1, %v906_v40  ;;  %v917_v44 = vadd.f32 %v1792_v43, %v2169_v2  ;;  %1457 = vst.msk [vmem:[%s2174_s28 + $0x240] sm:$0xff] %vm1384_vm1, %v1162_v42  ;;  %v1173_v46 = vadd.f32 %v1856_v45, %v2169_v2 }
  0xea   : > { %v908_v47 = vpop.f32.mrf.mxu0  ;;  %v1164_v49 = vpop.f32.mrf.mxu1 }
  0xeb   : > { %1396 = vst.msk [vmem:[%s2174_s28 + $0x58] sm:$0xff] %vm1384_vm1, %v917_v44  ;;  %v909_v48 = vadd.f32 %v2169_v2, %v908_v47  ;;  %1460 = vst.msk [vmem:[%s2174_s28 + $0x258] sm:$0xff] %vm1384_vm1, %v1173_v46  ;;  %v1165_v50 = vadd.f32 %v2169_v2, %v1164_v49 }
  0xec   : > { %v1795_v51 = vpop.f32.mrf.mxu0  ;;  %v1859_v53 = vpop.f32.mrf.mxu1 }
  0xed   : > { %1394 = vst.msk [vmem:[%s2174_s28 + $0x48] sm:$0xff] %vm1384_vm1, %v909_v48  ;;  %v930_v52 = vadd.f32 %v1795_v51, %v2169_v2  ;;  %1458 = vst.msk [vmem:[%s2174_s28 + $0x248] sm:$0xff] %vm1384_vm1, %v1165_v50  ;;  %v1186_v54 = vadd.f32 %v1859_v53, %v2169_v2 }
  0xee   : > { %v921_v55 = vpop.f32.mrf.mxu0  ;;  %v1177_v57 = vpop.f32.mrf.mxu1 }
  0xef   : > { %1399 = vst.msk [vmem:[%s2174_s28 + $0x70] sm:$0xff] %vm1384_vm1, %v930_v52  ;;  %v922_v56 = vadd.f32 %v2169_v2, %v921_v55  ;;  %1463 = vst.msk [vmem:[%s2174_s28 + $0x270] sm:$0xff] %vm1384_vm1, %v1186_v54  ;;  %v1178_v58 = vadd.f32 %v2169_v2, %v1177_v57 }
  0xf0   : > { %v1796_v59 = vpop.f32.mrf.mxu0  ;;  %v1860_v61 = vpop.f32.mrf.mxu1 }
  0xf1   : > { %1397 = vst.msk [vmem:[%s2174_s28 + $0x60] sm:$0xff] %vm1384_vm1, %v922_v56  ;;  %v933_v60 = vadd.f32 %v1796_v59, %v2169_v2  ;;  %1461 = vst.msk [vmem:[%s2174_s28 + $0x260] sm:$0xff] %vm1384_vm1, %v1178_v58  ;;  %v1189_v62 = vadd.f32 %v1860_v61, %v2169_v2 }
  0xf2   : > { %v924_v63 = vpop.f32.mrf.mxu0  ;;  %v1180_v1 = vpop.f32.mrf.mxu1 }
  0xf3   : > { %1400 = vst.msk [vmem:[%s2174_s28 + $0x78] sm:$0xff] %vm1384_vm1, %v933_v60  ;;  %v925_v0 = vadd.f32 %v2169_v2, %v924_v63  ;;  %1464 = vst.msk [vmem:[%s2174_s28 + $0x278] sm:$0xff] %vm1384_vm1, %v1189_v62  ;;  %v1181_v3 = vadd.f32 %v2169_v2, %v1180_v1 }
  0xf4   : > { %v1799_v4 = vpop.f32.mrf.mxu0  ;;  %v1863_v6 = vpop.f32.mrf.mxu1 }
  0xf5   : > { %1398 = vst.msk [vmem:[%s2174_s28 + $0x68] sm:$0xff] %vm1384_vm1, %v925_v0  ;;  %v946_v5 = vadd.f32 %v1799_v4, %v2169_v2  ;;  %1462 = vst.msk [vmem:[%s2174_s28 + $0x268] sm:$0xff] %vm1384_vm1, %v1181_v3  ;;  %v1202_v7 = vadd.f32 %v1863_v6, %v2169_v2 }
  0xf6   : > { %v937_v8 = vpop.f32.mrf.mxu0  ;;  %v1193_v10 = vpop.f32.mrf.mxu1 }
  0xf7   : > { %1403 = vst.msk [vmem:[%s2174_s28 + $0x90] sm:$0xff] %vm1384_vm1, %v946_v5  ;;  %v938_v9 = vadd.f32 %v2169_v2, %v937_v8  ;;  %1467 = vst.msk [vmem:[%s2174_s28 + $0x290] sm:$0xff] %vm1384_vm1, %v1202_v7  ;;  %v1194_v11 = vadd.f32 %v2169_v2, %v1193_v10 }
  0xf8   : > { %v1800_v12 = vpop.f32.mrf.mxu0  ;;  %v1864_v14 = vpop.f32.mrf.mxu1 }
  0xf9   : > { %1401 = vst.msk [vmem:[%s2174_s28 + $0x80] sm:$0xff] %vm1384_vm1, %v938_v9  ;;  %v949_v13 = vadd.f32 %v1800_v12, %v2169_v2  ;;  %1465 = vst.msk [vmem:[%s2174_s28 + $0x280] sm:$0xff] %vm1384_vm1, %v1194_v11  ;;  %v1205_v15 = vadd.f32 %v1864_v14, %v2169_v2 }
  0xfa   : > { %v940_v16 = vpop.f32.mrf.mxu0  ;;  %v1196_v18 = vpop.f32.mrf.mxu1 }
  0xfb   : > { %1404 = vst.msk [vmem:[%s2174_s28 + $0x98] sm:$0xff] %vm1384_vm1, %v949_v13  ;;  %v941_v17 = vadd.f32 %v2169_v2, %v940_v16  ;;  %1468 = vst.msk [vmem:[%s2174_s28 + $0x298] sm:$0xff] %vm1384_vm1, %v1205_v15  ;;  %v1197_v19 = vadd.f32 %v2169_v2, %v1196_v18 }
  0xfc   : > { %v1803_v20 = vpop.f32.mrf.mxu0  ;;  %v1867_v22 = vpop.f32.mrf.mxu1 }
  0xfd   : > { %1402 = vst.msk [vmem:[%s2174_s28 + $0x88] sm:$0xff] %vm1384_vm1, %v941_v17  ;;  %v962_v21 = vadd.f32 %v1803_v20, %v2169_v2  ;;  %1466 = vst.msk [vmem:[%s2174_s28 + $0x288] sm:$0xff] %vm1384_vm1, %v1197_v19  ;;  %v1218_v23 = vadd.f32 %v1867_v22, %v2169_v2 }
  0xfe   : > { %v953_v24 = vpop.f32.mrf.mxu0  ;;  %v1209_v26 = vpop.f32.mrf.mxu1 }
  0xff   : > { %1407 = vst.msk [vmem:[%s2174_s28 + $0xb0] sm:$0xff] %vm1384_vm1, %v962_v21  ;;  %v954_v25 = vadd.f32 %v2169_v2, %v953_v24  ;;  %1471 = vst.msk [vmem:[%s2174_s28 + $0x2b0] sm:$0xff] %vm1384_vm1, %v1218_v23  ;;  %v1210_v27 = vadd.f32 %v2169_v2, %v1209_v26 }
 0x100   : > { %v1804_v28 = vpop.f32.mrf.mxu0  ;;  %v1868_v30 = vpop.f32.mrf.mxu1 }
 0x101   : > { %1405 = vst.msk [vmem:[%s2174_s28 + $0xa0] sm:$0xff] %vm1384_vm1, %v954_v25  ;;  %v965_v29 = vadd.f32 %v1804_v28, %v2169_v2  ;;  %1469 = vst.msk [vmem:[%s2174_s28 + $0x2a0] sm:$0xff] %vm1384_vm1, %v1210_v27  ;;  %v1221_v31 = vadd.f32 %v1868_v30, %v2169_v2 }
 0x102   : > { %v956_v32 = vpop.f32.mrf.mxu0  ;;  %v1212_v34 = vpop.f32.mrf.mxu1 }
 0x103   : > { %1408 = vst.msk [vmem:[%s2174_s28 + $0xb8] sm:$0xff] %vm1384_vm1, %v965_v29  ;;  %v957_v33 = vadd.f32 %v2169_v2, %v956_v32  ;;  %1472 = vst.msk [vmem:[%s2174_s28 + $0x2b8] sm:$0xff] %vm1384_vm1, %v1221_v31  ;;  %v1213_v35 = vadd.f32 %v2169_v2, %v1212_v34 }
 0x104   : > { %v1807_v36 = vpop.f32.mrf.mxu0  ;;  %v1871_v38 = vpop.f32.mrf.mxu1 }
 0x105   : > { %1406 = vst.msk [vmem:[%s2174_s28 + $0xa8] sm:$0xff] %vm1384_vm1, %v957_v33  ;;  %v978_v37 = vadd.f32 %v1807_v36, %v2169_v2  ;;  %1470 = vst.msk [vmem:[%s2174_s28 + $0x2a8] sm:$0xff] %vm1384_vm1, %v1213_v35  ;;  %v1234_v39 = vadd.f32 %v1871_v38, %v2169_v2 }
 0x106   : > { %v969_v40 = vpop.f32.mrf.mxu0  ;;  %v1225_v42 = vpop.f32.mrf.mxu1 }
 0x107   : > { %1411 = vst.msk [vmem:[%s2174_s28 + $0xd0] sm:$0xff] %vm1384_vm1, %v978_v37  ;;  %v970_v41 = vadd.f32 %v2169_v2, %v969_v40  ;;  %1475 = vst.msk [vmem:[%s2174_s28 + $0x2d0] sm:$0xff] %vm1384_vm1, %v1234_v39  ;;  %v1226_v43 = vadd.f32 %v2169_v2, %v1225_v42 }
 0x108   : > { %v1808_v44 = vpop.f32.mrf.mxu0  ;;  %v1872_v46 = vpop.f32.mrf.mxu1 }
 0x109   : > { %1409 = vst.msk [vmem:[%s2174_s28 + $0xc0] sm:$0xff] %vm1384_vm1, %v970_v41  ;;  %v981_v45 = vadd.f32 %v1808_v44, %v2169_v2  ;;  %1473 = vst.msk [vmem:[%s2174_s28 + $0x2c0] sm:$0xff] %vm1384_vm1, %v1226_v43  ;;  %v1237_v47 = vadd.f32 %v1872_v46, %v2169_v2 }
 0x10a   : > { %v972_v48 = vpop.f32.mrf.mxu0  ;;  %v1228_v50 = vpop.f32.mrf.mxu1 }
 0x10b   : > { %1412 = vst.msk [vmem:[%s2174_s28 + $0xd8] sm:$0xff] %vm1384_vm1, %v981_v45  ;;  %v973_v49 = vadd.f32 %v2169_v2, %v972_v48  ;;  %1476 = vst.msk [vmem:[%s2174_s28 + $0x2d8] sm:$0xff] %vm1384_vm1, %v1237_v47  ;;  %v1229_v51 = vadd.f32 %v2169_v2, %v1228_v50 }
 0x10c   : > { %v1811_v52 = vpop.f32.mrf.mxu0  ;;  %v1875_v54 = vpop.f32.mrf.mxu1 }
 0x10d   : > { %1410 = vst.msk [vmem:[%s2174_s28 + $0xc8] sm:$0xff] %vm1384_vm1, %v973_v49  ;;  %v994_v53 = vadd.f32 %v1811_v52, %v2169_v2  ;;  %1474 = vst.msk [vmem:[%s2174_s28 + $0x2c8] sm:$0xff] %vm1384_vm1, %v1229_v51  ;;  %v1250_v55 = vadd.f32 %v1875_v54, %v2169_v2 }
 0x10e   : > { %v985_v56 = vpop.f32.mrf.mxu0  ;;  %v1241_v58 = vpop.f32.mrf.mxu1 }
 0x10f   : > { %1415 = vst.msk [vmem:[%s2174_s28 + $0xf0] sm:$0xff] %vm1384_vm1, %v994_v53  ;;  %v986_v57 = vadd.f32 %v2169_v2, %v985_v56  ;;  %1479 = vst.msk [vmem:[%s2174_s28 + $0x2f0] sm:$0xff] %vm1384_vm1, %v1250_v55  ;;  %v1242_v59 = vadd.f32 %v2169_v2, %v1241_v58 }
 0x110   : > { %v1812_v60 = vpop.f32.mrf.mxu0  ;;  %v1876_v62 = vpop.f32.mrf.mxu1 }
 0x111   : > { %1413 = vst.msk [vmem:[%s2174_s28 + $0xe0] sm:$0xff] %vm1384_vm1, %v986_v57  ;;  %v997_v61 = vadd.f32 %v1812_v60, %v2169_v2  ;;  %1477 = vst.msk [vmem:[%s2174_s28 + $0x2e0] sm:$0xff] %vm1384_vm1, %v1242_v59  ;;  %v1253_v63 = vadd.f32 %v1876_v62, %v2169_v2 }
 0x112   : > { %v988_v0 = vpop.f32.mrf.mxu0  ;;  %v1244_v3 = vpop.f32.mrf.mxu1 }
 0x113   : > { %1416 = vst.msk [vmem:[%s2174_s28 + $0xf8] sm:$0xff] %vm1384_vm1, %v997_v61  ;;  %v989_v1 = vadd.f32 %v2169_v2, %v988_v0  ;;  %1480 = vst.msk [vmem:[%s2174_s28 + $0x2f8] sm:$0xff] %vm1384_vm1, %v1253_v63  ;;  %v1245_v4 = vadd.f32 %v2169_v2, %v1244_v3 }
 0x114   : > { %v1815_v5 = vpop.f32.mrf.mxu0  ;;  %v1879_v7 = vpop.f32.mrf.mxu1 }
 0x115   : > { %1414 = vst.msk [vmem:[%s2174_s28 + $0xe8] sm:$0xff] %vm1384_vm1, %v989_v1  ;;  %v1010_v6 = vadd.f32 %v1815_v5, %v2169_v2  ;;  %1478 = vst.msk [vmem:[%s2174_s28 + $0x2e8] sm:$0xff] %vm1384_vm1, %v1245_v4  ;;  %v1266_v8 = vadd.f32 %v1879_v7, %v2169_v2 }
 0x116   : > { %v1001_v9 = vpop.f32.mrf.mxu0  ;;  %v1257_v11 = vpop.f32.mrf.mxu1 }
 0x117   : > { %1419 = vst.msk [vmem:[%s2174_s28 + $0x110] sm:$0xff] %vm1384_vm1, %v1010_v6  ;;  %v1002_v10 = vadd.f32 %v2169_v2, %v1001_v9  ;;  %1483 = vst.msk [vmem:[%s2174_s28 + $0x310] sm:$0xff] %vm1384_vm1, %v1266_v8  ;;  %v1258_v12 = vadd.f32 %v2169_v2, %v1257_v11 }
 0x118   : > { %v1816_v13 = vpop.f32.mrf.mxu0  ;;  %v1880_v15 = vpop.f32.mrf.mxu1 }
 0x119   : > { %1417 = vst.msk [vmem:[%s2174_s28 + $0x100] sm:$0xff] %vm1384_vm1, %v1002_v10  ;;  %v1013_v14 = vadd.f32 %v1816_v13, %v2169_v2  ;;  %1481 = vst.msk [vmem:[%s2174_s28 + $0x300] sm:$0xff] %vm1384_vm1, %v1258_v12  ;;  %v1269_v16 = vadd.f32 %v1880_v15, %v2169_v2 }
 0x11a   : > { %v1004_v17 = vpop.f32.mrf.mxu0  ;;  %v1260_v19 = vpop.f32.mrf.mxu1 }
 0x11b   : > { %1420 = vst.msk [vmem:[%s2174_s28 + $0x118] sm:$0xff] %vm1384_vm1, %v1013_v14  ;;  %v1005_v18 = vadd.f32 %v2169_v2, %v1004_v17  ;;  %1484 = vst.msk [vmem:[%s2174_s28 + $0x318] sm:$0xff] %vm1384_vm1, %v1269_v16  ;;  %v1261_v20 = vadd.f32 %v2169_v2, %v1260_v19 }
 0x11c   : > { %v1819_v21 = vpop.f32.mrf.mxu0  ;;  %v1883_v23 = vpop.f32.mrf.mxu1 }
 0x11d   : > { %1418 = vst.msk [vmem:[%s2174_s28 + $0x108] sm:$0xff] %vm1384_vm1, %v1005_v18  ;;  %v1026_v22 = vadd.f32 %v1819_v21, %v2169_v2  ;;  %1482 = vst.msk [vmem:[%s2174_s28 + $0x308] sm:$0xff] %vm1384_vm1, %v1261_v20  ;;  %v1282_v24 = vadd.f32 %v1883_v23, %v2169_v2 }
 0x11e   : > { %v1017_v25 = vpop.f32.mrf.mxu0  ;;  %v1273_v27 = vpop.f32.mrf.mxu1 }
 0x11f   : > { %1423 = vst.msk [vmem:[%s2174_s28 + $0x130] sm:$0xff] %vm1384_vm1, %v1026_v22  ;;  %v1018_v26 = vadd.f32 %v2169_v2, %v1017_v25  ;;  %1487 = vst.msk [vmem:[%s2174_s28 + $0x330] sm:$0xff] %vm1384_vm1, %v1282_v24  ;;  %v1274_v28 = vadd.f32 %v2169_v2, %v1273_v27 }
 0x120   : > { %v1820_v29 = vpop.f32.mrf.mxu0  ;;  %v1884_v31 = vpop.f32.mrf.mxu1 }
 0x121   : > { %1421 = vst.msk [vmem:[%s2174_s28 + $0x120] sm:$0xff] %vm1384_vm1, %v1018_v26  ;;  %v1029_v30 = vadd.f32 %v1820_v29, %v2169_v2  ;;  %1485 = vst.msk [vmem:[%s2174_s28 + $0x320] sm:$0xff] %vm1384_vm1, %v1274_v28  ;;  %v1285_v32 = vadd.f32 %v1884_v31, %v2169_v2 }
 0x122   : > { %v1020_v33 = vpop.f32.mrf.mxu0  ;;  %v1276_v35 = vpop.f32.mrf.mxu1 }
 0x123   : > { %1424 = vst.msk [vmem:[%s2174_s28 + $0x138] sm:$0xff] %vm1384_vm1, %v1029_v30  ;;  %v1021_v34 = vadd.f32 %v2169_v2, %v1020_v33  ;;  %1488 = vst.msk [vmem:[%s2174_s28 + $0x338] sm:$0xff] %vm1384_vm1, %v1285_v32  ;;  %v1277_v36 = vadd.f32 %v2169_v2, %v1276_v35 }
 0x124   : > { %v1823_v37 = vpop.f32.mrf.mxu0  ;;  %v1887_v39 = vpop.f32.mrf.mxu1 }
 0x125   : > { %1422 = vst.msk [vmem:[%s2174_s28 + $0x128] sm:$0xff] %vm1384_vm1, %v1021_v34  ;;  %v1042_v38 = vadd.f32 %v1823_v37, %v2169_v2  ;;  %1486 = vst.msk [vmem:[%s2174_s28 + $0x328] sm:$0xff] %vm1384_vm1, %v1277_v36  ;;  %v1298_v40 = vadd.f32 %v1887_v39, %v2169_v2 }
 0x126   : > { %v1033_v41 = vpop.f32.mrf.mxu0  ;;  %v1289_v43 = vpop.f32.mrf.mxu1 }
 0x127   : > { %1427 = vst.msk [vmem:[%s2174_s28 + $0x150] sm:$0xff] %vm1384_vm1, %v1042_v38  ;;  %v1034_v42 = vadd.f32 %v2169_v2, %v1033_v41  ;;  %1491 = vst.msk [vmem:[%s2174_s28 + $0x350] sm:$0xff] %vm1384_vm1, %v1298_v40  ;;  %v1290_v44 = vadd.f32 %v2169_v2, %v1289_v43 }
 0x128   : > { %v1824_v45 = vpop.f32.mrf.mxu0  ;;  %v1888_v47 = vpop.f32.mrf.mxu1 }
 0x129   : > { %1425 = vst.msk [vmem:[%s2174_s28 + $0x140] sm:$0xff] %vm1384_vm1, %v1034_v42  ;;  %v1045_v46 = vadd.f32 %v1824_v45, %v2169_v2  ;;  %1489 = vst.msk [vmem:[%s2174_s28 + $0x340] sm:$0xff] %vm1384_vm1, %v1290_v44  ;;  %v1301_v48 = vadd.f32 %v1888_v47, %v2169_v2 }
 0x12a   : > { %v1036_v49 = vpop.f32.mrf.mxu0  ;;  %v1292_v51 = vpop.f32.mrf.mxu1 }
 0x12b   : > { %1428 = vst.msk [vmem:[%s2174_s28 + $0x158] sm:$0xff] %vm1384_vm1, %v1045_v46  ;;  %v1037_v50 = vadd.f32 %v2169_v2, %v1036_v49  ;;  %1492 = vst.msk [vmem:[%s2174_s28 + $0x358] sm:$0xff] %vm1384_vm1, %v1301_v48  ;;  %v1293_v52 = vadd.f32 %v2169_v2, %v1292_v51 }
 0x12c   : > { %v1827_v53 = vpop.f32.mrf.mxu0  ;;  %v1891_v55 = vpop.f32.mrf.mxu1 }
 0x12d   : > { %1426 = vst.msk [vmem:[%s2174_s28 + $0x148] sm:$0xff] %vm1384_vm1, %v1037_v50  ;;  %v1058_v54 = vadd.f32 %v1827_v53, %v2169_v2  ;;  %1490 = vst.msk [vmem:[%s2174_s28 + $0x348] sm:$0xff] %vm1384_vm1, %v1293_v52  ;;  %v1314_v56 = vadd.f32 %v1891_v55, %v2169_v2 }
 0x12e   : > { %v1049_v57 = vpop.f32.mrf.mxu0  ;;  %v1305_v59 = vpop.f32.mrf.mxu1 }
 0x12f   : > { %1431 = vst.msk [vmem:[%s2174_s28 + $0x170] sm:$0xff] %vm1384_vm1, %v1058_v54  ;;  %v1050_v58 = vadd.f32 %v2169_v2, %v1049_v57  ;;  %1495 = vst.msk [vmem:[%s2174_s28 + $0x370] sm:$0xff] %vm1384_vm1, %v1314_v56  ;;  %v1306_v60 = vadd.f32 %v2169_v2, %v1305_v59 }
 0x130   : > { %v1828_v61 = vpop.f32.mrf.mxu0  ;;  %v1892_v63 = vpop.f32.mrf.mxu1 }
 0x131   : > { %1429 = vst.msk [vmem:[%s2174_s28 + $0x160] sm:$0xff] %vm1384_vm1, %v1050_v58  ;;  %v1061_v62 = vadd.f32 %v1828_v61, %v2169_v2  ;;  %1493 = vst.msk [vmem:[%s2174_s28 + $0x360] sm:$0xff] %vm1384_vm1, %v1306_v60  ;;  %v1317_v0 = vadd.f32 %v1892_v63, %v2169_v2 }
 0x132   : > { %v1052_v1 = vpop.f32.mrf.mxu0  ;;  %v1308_v4 = vpop.f32.mrf.mxu1 }
 0x133   : > { %1432 = vst.msk [vmem:[%s2174_s28 + $0x178] sm:$0xff] %vm1384_vm1, %v1061_v62  ;;  %v1053_v3 = vadd.f32 %v2169_v2, %v1052_v1  ;;  %1496 = vst.msk [vmem:[%s2174_s28 + $0x378] sm:$0xff] %vm1384_vm1, %v1317_v0  ;;  %v1309_v5 = vadd.f32 %v2169_v2, %v1308_v4 }
 0x134   : > { %v1831_v6 = vpop.f32.mrf.mxu0  ;;  %v1895_v8 = vpop.f32.mrf.mxu1 }
 0x135   : > { %1430 = vst.msk [vmem:[%s2174_s28 + $0x168] sm:$0xff] %vm1384_vm1, %v1053_v3  ;;  %v1074_v7 = vadd.f32 %v1831_v6, %v2169_v2  ;;  %1494 = vst.msk [vmem:[%s2174_s28 + $0x368] sm:$0xff] %vm1384_vm1, %v1309_v5  ;;  %v1330_v9 = vadd.f32 %v1895_v8, %v2169_v2 }
 0x136   : > { %v1065_v10 = vpop.f32.mrf.mxu0  ;;  %v1321_v12 = vpop.f32.mrf.mxu1 }
 0x137   : > { %1435 = vst.msk [vmem:[%s2174_s28 + $0x190] sm:$0xff] %vm1384_vm1, %v1074_v7  ;;  %v1066_v11 = vadd.f32 %v2169_v2, %v1065_v10  ;;  %1499 = vst.msk [vmem:[%s2174_s28 + $0x390] sm:$0xff] %vm1384_vm1, %v1330_v9  ;;  %v1322_v13 = vadd.f32 %v2169_v2, %v1321_v12 }
 0x138   : > { %v1832_v14 = vpop.f32.mrf.mxu0  ;;  %v1896_v16 = vpop.f32.mrf.mxu1 }
 0x139   : > { %1433 = vst.msk [vmem:[%s2174_s28 + $0x180] sm:$0xff] %vm1384_vm1, %v1066_v11  ;;  %v1077_v15 = vadd.f32 %v1832_v14, %v2169_v2  ;;  %1497 = vst.msk [vmem:[%s2174_s28 + $0x380] sm:$0xff] %vm1384_vm1, %v1322_v13  ;;  %v1333_v17 = vadd.f32 %v1896_v16, %v2169_v2 }
 0x13a   : > { %v1068_v18 = vpop.f32.mrf.mxu0  ;;  %v1324_v20 = vpop.f32.mrf.mxu1 }
 0x13b   : > { %1436 = vst.msk [vmem:[%s2174_s28 + $0x198] sm:$0xff] %vm1384_vm1, %v1077_v15  ;;  %v1069_v19 = vadd.f32 %v2169_v2, %v1068_v18  ;;  %1500 = vst.msk [vmem:[%s2174_s28 + $0x398] sm:$0xff] %vm1384_vm1, %v1333_v17  ;;  %v1325_v21 = vadd.f32 %v2169_v2, %v1324_v20 }
 0x13c   : > { %v1835_v22 = vpop.f32.mrf.mxu0  ;;  %v1899_v24 = vpop.f32.mrf.mxu1 }
 0x13d   : > { %1434 = vst.msk [vmem:[%s2174_s28 + $0x188] sm:$0xff] %vm1384_vm1, %v1069_v19  ;;  %v1090_v23 = vadd.f32 %v1835_v22, %v2169_v2  ;;  %1498 = vst.msk [vmem:[%s2174_s28 + $0x388] sm:$0xff] %vm1384_vm1, %v1325_v21  ;;  %v1346_v25 = vadd.f32 %v1899_v24, %v2169_v2 }
 0x13e   : > { %v1081_v26 = vpop.f32.mrf.mxu0  ;;  %v1337_v28 = vpop.f32.mrf.mxu1 }
 0x13f   : > { %1439 = vst.msk [vmem:[%s2174_s28 + $0x1b0] sm:$0xff] %vm1384_vm1, %v1090_v23  ;;  %v1082_v27 = vadd.f32 %v2169_v2, %v1081_v26  ;;  %1503 = vst.msk [vmem:[%s2174_s28 + $0x3b0] sm:$0xff] %vm1384_vm1, %v1346_v25  ;;  %v1338_v29 = vadd.f32 %v2169_v2, %v1337_v28 }
 0x140   : > { %v1836_v30 = vpop.f32.mrf.mxu0  ;;  %v1900_v32 = vpop.f32.mrf.mxu1 }
 0x141   : > { %1437 = vst.msk [vmem:[%s2174_s28 + $0x1a0] sm:$0xff] %vm1384_vm1, %v1082_v27  ;;  %v1093_v31 = vadd.f32 %v1836_v30, %v2169_v2  ;;  %1501 = vst.msk [vmem:[%s2174_s28 + $0x3a0] sm:$0xff] %vm1384_vm1, %v1338_v29  ;;  %v1349_v33 = vadd.f32 %v1900_v32, %v2169_v2 }
 0x142   : > { %v1084_v34 = vpop.f32.mrf.mxu0  ;;  %v1340_v36 = vpop.f32.mrf.mxu1 }
 0x143   : > { %1440 = vst.msk [vmem:[%s2174_s28 + $0x1b8] sm:$0xff] %vm1384_vm1, %v1093_v31  ;;  %v1085_v35 = vadd.f32 %v2169_v2, %v1084_v34  ;;  %1504 = vst.msk [vmem:[%s2174_s28 + $0x3b8] sm:$0xff] %vm1384_vm1, %v1349_v33  ;;  %v1341_v37 = vadd.f32 %v2169_v2, %v1340_v36 }
 0x144   : > { %v1839_v38 = vpop.f32.mrf.mxu0  ;;  %v1903_v40 = vpop.f32.mrf.mxu1 }
 0x145   : > { %1438 = vst.msk [vmem:[%s2174_s28 + $0x1a8] sm:$0xff] %vm1384_vm1, %v1085_v35  ;;  %v1106_v39 = vadd.f32 %v1839_v38, %v2169_v2  ;;  %1502 = vst.msk [vmem:[%s2174_s28 + $0x3a8] sm:$0xff] %vm1384_vm1, %v1341_v37  ;;  %v1362_v41 = vadd.f32 %v1903_v40, %v2169_v2 }
 0x146   : > { %v1097_v42 = vpop.f32.mrf.mxu0  ;;  %v1353_v44 = vpop.f32.mrf.mxu1 }
 0x147   : > { %1443 = vst.msk [vmem:[%s2174_s28 + $0x1d0] sm:$0xff] %vm1384_vm1, %v1106_v39  ;;  %v1098_v43 = vadd.f32 %v2169_v2, %v1097_v42  ;;  %1507 = vst.msk [vmem:[%s2174_s28 + $0x3d0] sm:$0xff] %vm1384_vm1, %v1362_v41  ;;  %v1354_v45 = vadd.f32 %v2169_v2, %v1353_v44 }
 0x148   : > { %v1840_v46 = vpop.f32.mrf.mxu0  ;;  %v1904_v48 = vpop.f32.mrf.mxu1 }
 0x149   : > { %1441 = vst.msk [vmem:[%s2174_s28 + $0x1c0] sm:$0xff] %vm1384_vm1, %v1098_v43  ;;  %v1109_v47 = vadd.f32 %v1840_v46, %v2169_v2  ;;  %1505 = vst.msk [vmem:[%s2174_s28 + $0x3c0] sm:$0xff] %vm1384_vm1, %v1354_v45  ;;  %v1365_v49 = vadd.f32 %v1904_v48, %v2169_v2 }
 0x14a   : > { %v1100_v50 = vpop.f32.mrf.mxu0  ;;  %v1356_v52 = vpop.f32.mrf.mxu1 }
 0x14b   : > { %1444 = vst.msk [vmem:[%s2174_s28 + $0x1d8] sm:$0xff] %vm1384_vm1, %v1109_v47  ;;  %v1101_v51 = vadd.f32 %v2169_v2, %v1100_v50  ;;  %1508 = vst.msk [vmem:[%s2174_s28 + $0x3d8] sm:$0xff] %vm1384_vm1, %v1365_v49  ;;  %v1357_v53 = vadd.f32 %v2169_v2, %v1356_v52 }
 0x14c   : > { %v1843_v54 = vpop.f32.mrf.mxu0  ;;  %v1907_v56 = vpop.f32.mrf.mxu1 }
 0x14d   : > { %1442 = vst.msk [vmem:[%s2174_s28 + $0x1c8] sm:$0xff] %vm1384_vm1, %v1101_v51  ;;  %v1122_v55 = vadd.f32 %v1843_v54, %v2169_v2  ;;  %1506 = vst.msk [vmem:[%s2174_s28 + $0x3c8] sm:$0xff] %vm1384_vm1, %v1357_v53  ;;  %v1378_v57 = vadd.f32 %v1907_v56, %v2169_v2 }
 0x14e   : > { %v1113_v58 = vpop.f32.mrf.mxu0  ;;  %v1369_v60 = vpop.f32.mrf.mxu1 }
 0x14f   : > { %1447 = vst.msk [vmem:[%s2174_s28 + $0x1f0] sm:$0xff] %vm1384_vm1, %v1122_v55  ;;  %v1114_v59 = vadd.f32 %v2169_v2, %v1113_v58  ;;  %1511 = vst.msk [vmem:[%s2174_s28 + $0x3f0] sm:$0xff] %vm1384_vm1, %v1378_v57  ;;  %v1370_v61 = vadd.f32 %v2169_v2, %v1369_v60 }
 0x150   : > { %v1844_v62 = vpop.f32.mrf.mxu0  ;;  %v1908_v0 = vpop.f32.mrf.mxu1 }
 0x151   : > { %1445 = vst.msk [vmem:[%s2174_s28 + $0x1e0] sm:$0xff] %vm1384_vm1, %v1114_v59  ;;  %v1125_v63 = vadd.f32 %v1844_v62, %v2169_v2  ;;  %1509 = vst.msk [vmem:[%s2174_s28 + $0x3e0] sm:$0xff] %vm1384_vm1, %v1370_v61  ;;  %v1381_v1 = vadd.f32 %v1908_v0, %v2169_v2 }
 0x152   : > { %v1116_v3 = vpop.f32.mrf.mxu0  ;;  %v1372_v5 = vpop.f32.mrf.mxu1 }
 0x153   : > { %1448 = vst.msk [vmem:[%s2174_s28 + $0x1f8] sm:$0xff] %vm1384_vm1, %v1125_v63  ;;  %v1117_v4 = vadd.f32 %v2169_v2, %v1116_v3  ;;  %1512 = vst.msk [vmem:[%s2174_s28 + $0x3f8] sm:$0xff] %vm1384_vm1, %v1381_v1  ;;  %v1373_v6 = vadd.f32 %v2169_v2, %v1372_v5 }
 0x155   : > { %1446 = vst.msk [vmem:[%s2174_s28 + $0x1e8] sm:$0xff] %vm1384_vm1, %v1117_v4  ;;  %1510 = vst.msk [vmem:[%s2174_s28 + $0x3e8] sm:$0xff] %vm1384_vm1, %v1373_v6 }
 0x156 PF: > { %s13_s12 = sadd.s32 1, %s1993_s12  }
 0x157   : > { %p10_p4 = scmp.ge.s32.totalorder %s13_s12, 4  }
 0x159   :  { %12 = sbr.rel (!%p10_p4) target bundleno = 1 (0x1), region = 62 }

</bundles_post_ra>
